<compile_context>
chip_gen: v6e
topology: v6e:2x2x1
jax: 0.10.0
libtpu: 0.0.40
codegen_flags: <defaults>
</compile_context>

<pallas_src>
import jax
import jax.numpy as jnp
from jax import lax
from jax.experimental import pallas as pl
from jax.experimental.pallas import tpu as pltpu

# Logical (PyTorch) dims.
D_IN, H, D_OUT = 224, 672, 1
H_PAD = 768        # hidden padded to a multiple of 128 (MXU lane dim)
OUT_LANES = 128    # layer-3 lanes; the single real output column is broadcast


def _round_up(n, m):
    return ((n + m - 1) // m) * m


def mlp_kernel(x_ref, w1_ref, b1_ref, w2_ref, b2_ref, w3_ref, b3_ref, o_ref):
    # x arrives as f32 straight from HBM; cast to bf16 in VMEM for the MXU.
    x = x_ref[...].astype(jnp.bfloat16)                                   # (TB, 224)

    # Layer 1: (TB,224) @ (224,768) -> f32, bias + ReLU in f32.
    h1 = jnp.dot(x, w1_ref[...], preferred_element_type=jnp.float32)
    h1 = jnp.maximum(h1 + b1_ref[...], 0.0).astype(jnp.bfloat16)

    # Layer 2: (TB,768) @ (768,768) -> f32, bias + ReLU in f32.
    h2 = jnp.dot(h1, w2_ref[...], preferred_element_type=jnp.float32)
    h2 = jnp.maximum(h2 + b2_ref[...], 0.0).astype(jnp.bfloat16)

    # Layer 3: w3/b3 are broadcast across all 128 lanes, so every column of
    # `logits` holds that row's real logit.
    logits = jnp.dot(h2, w3_ref[...], preferred_element_type=jnp.float32)
    logits = logits + b3_ref[...]                                          # (TB, 128)

    # Pack (TB,128) -> (TB//128, 128): out[r, c] = logits[r*128 + c, c]
    # (diagonal of each 128-row block), extracted with an identity mask and a
    # sublane reduction -- cheap VPU/XLU work, and the store is a lane-dense
    # (R,128) block instead of a 128x-padded (TB,128) writeback.
    eye = (lax.broadcasted_iota(jnp.int32, (128, 128), 0) ==
           lax.broadcasted_iota(jnp.int32, (128, 128), 1)).astype(jnp.float32)
    n_row_blocks = o_ref.shape[0]                                          # TB // 128 (static)
    for r in range(n_row_blocks):
        blk = logits[r * 128:(r + 1) * 128, :]                             # (128, 128)
        row = jnp.sum(blk * eye, axis=0, keepdims=True)                    # (1, 128)
        o_ref[r:r + 1, :] = jax.nn.sigmoid(row).astype(o_ref.dtype)


def net_forward(x, params):
    """x: (B, 224) f32. params: f32 weights in (in, out) layout. Returns (B, 1) f32."""
    w1, b1, w2, b2, w3, b3 = params
    B = x.shape[0]

    # ---- batch tiling -------------------------------------------------------
    # TB is a multiple of 128 so each tile's packed output is a clean
    # (TB//128, 128) lane-dense block.  Tiles are capped at 1024 rows
    # (working set ~12-14 MiB << 32 MiB), and for larger batches we force
    # >= 2 tiles so the "parallel" axis can be sharded across v7x's two TCs.
    B_aligned = _round_up(max(B, 1), 128)
    if B_aligned <= 256:
        TB = B_aligned
    else:
        TB = min(1024, _round_up(B_aligned // 2, 128))
    B_pad = _round_up(B_aligned, TB)
    n_tiles = B_pad // TB
    R = TB // 128

    # x fed unpadded in the lane dim and uncast (f32); only batch rows are
    # zero-padded (no-op when already aligned).
    xp = x if B == B_pad else jnp.pad(x, ((0, B_pad - B), (0, 0)))

    # Weights: zero-pad hidden dims to 768; broadcast w3/b3 to all 128 output
    # lanes (needed for the in-kernel diagonal packing).  ~1.7 MiB total,
    # VMEM-resident across grid steps.  (If this re-pad shows up in traces,
    # hoist the padded params out of the per-call path.)
    bf16 = jnp.bfloat16
    w1p = jnp.pad(w1, ((0, 0), (0, H_PAD - H))).astype(bf16)                 # (224, 768)
    b1p = jnp.pad(b1, ((0, 0), (0, H_PAD - H))).astype(jnp.float32)          # (1, 768)
    w2p = jnp.pad(w2, ((0, H_PAD - H), (0, H_PAD - H))).astype(bf16)         # (768, 768)
    b2p = jnp.pad(b2, ((0, 0), (0, H_PAD - H))).astype(jnp.float32)          # (1, 768)
    w3p = jnp.pad(jnp.broadcast_to(w3, (H, OUT_LANES)),
                  ((0, H_PAD - H), (0, 0))).astype(bf16)                     # (768, 128)
    b3p = jnp.broadcast_to(b3.reshape(1, 1), (1, OUT_LANES)).astype(jnp.float32)

    # Weights/biases: same block index every iteration -> resident in VMEM.
    resident = lambda shape: pl.BlockSpec(shape, lambda i: (0, 0))

    out = pl.pallas_call(
        mlp_kernel,
        out_shape=jax.ShapeDtypeStruct((n_tiles, R, OUT_LANES), jnp.float32),
        grid=(n_tiles,),
        in_specs=[
            pl.BlockSpec((TB, D_IN), lambda i: (i, 0)),   # x tile (pipelined)
            resident((D_IN, H_PAD)),                       # w1
            resident((1, H_PAD)),                          # b1
            resident((H_PAD, H_PAD)),                      # w2
            resident((1, H_PAD)),                          # b2
            resident((H_PAD, OUT_LANES)),                  # w3 (column broadcast)
            resident((1, OUT_LANES)),                      # b3 (broadcast)
        ],
        out_specs=pl.BlockSpec((None, R, OUT_LANES), lambda i: (i, 0, 0)),
        compiler_params=pltpu.CompilerParams(
            dimension_semantics=("parallel",),
            vmem_limit_bytes=32 << 20,
        ),
    )(xp, w1p, b1p, w2p, b2p, w3p, b3p)

    # (n_tiles, R, 128) flattened row-major is exactly batch order.
    return out.reshape(-1)[:B].reshape(B, 1)


def init_params(key):
    # Deterministic init mimicking nn.Linear's U(-1/sqrt(fan_in), 1/sqrt(fan_in)),
    # stored as (in_features, out_features) so the kernel computes x @ W + b.
    ks = jax.random.split(key, 6)

    def linear(kw, kb, fan_in, fan_out):
        bound = 1.0 / jnp.sqrt(fan_in)
        w = jax.random.uniform(kw, (fan_in, fan_out), jnp.float32, -bound, bound)
        b = jax.random.uniform(kb, (1, fan_out), jnp.float32, -bound, bound)
        return w, b

    w1, b1 = linear(ks[0], ks[1], D_IN, H)
    w2, b2 = linear(ks[2], ks[3], H, H)
    w3, b3 = linear(ks[4], ks[5], H, D_OUT)
    return (w1, b1, w2, b2, w3, b3)


def reference_forward(x, params):
    w1, b1, w2, b2, w3, b3 = params
    h = jnp.maximum(x @ w1 + b1, 0.0)
    h = jnp.maximum(h @ w2 + b2, 0.0)
    return jax.nn.sigmoid(h @ w3 + b3)


if __name__ == "__main__":
    key = jax.random.PRNGKey(0)
    kx, kp = jax.random.split(key)
    params = init_params(kp)

    # Small single-tile case and a multi-tile / row-padded case.
    for B in (8, 300):
        x = jax.random.normal(jax.random.fold_in(kx, B), (B, D_IN), dtype=jnp.float32)
        out = jax.jit(net_forward)(x, params)
        jax.block_until_ready(out)

        ref = reference_forward(x, params)
        assert out.shape == (B, D_OUT)
        # bf16 matmuls -> relaxed tolerance vs the f32 reference.
        assert jnp.allclose(out, ref, atol=2e-2, rtol=2e-2), (
            f"B={B}: max abs err {jnp.max(jnp.abs(out - ref))}")

    print("KERNEL_OK")
</pallas_src>

<mosaic_0001>
module attributes {stable_mosaic.version = 11 : i64} {
  func.func @mlp_kernel(%arg0: i32, %arg1: memref<128x224xf32, #tpu.memory_space<vmem>>, %arg2: memref<224x768xbf16, #tpu.memory_space<vmem>>, %arg3: memref<1x768xf32, #tpu.memory_space<vmem>>, %arg4: memref<768x768xbf16, #tpu.memory_space<vmem>>, %arg5: memref<1x768xf32, #tpu.memory_space<vmem>>, %arg6: memref<768x128xbf16, #tpu.memory_space<vmem>>, %arg7: memref<1x128xf32, #tpu.memory_space<vmem>>, %arg8: memref<1x1x128xf32, #tpu.memory_space<vmem>>) attributes {dimension_semantics = [#tpu.dimension_semantics<parallel>], iteration_bounds = array<i64: 1>, scalar_prefetch = 0 : i64, scratch_operands = 0 : i64, tpu.core_type = #tpu.core_type<tc>, window_params = [{transform_indices = @transform_0, window_bounds = array<i64: 128, 224>}, {pipeline_mode = #tpu.pipeline_mode<synchronous>, transform_indices = @transform_1, window_bounds = array<i64: 224, 768>}, {pipeline_mode = #tpu.pipeline_mode<synchronous>, transform_indices = @transform_2, window_bounds = array<i64: 1, 768>}, {pipeline_mode = #tpu.pipeline_mode<synchronous>, transform_indices = @transform_3, window_bounds = array<i64: 768, 768>}, {pipeline_mode = #tpu.pipeline_mode<synchronous>, transform_indices = @transform_4, window_bounds = array<i64: 1, 768>}, {pipeline_mode = #tpu.pipeline_mode<synchronous>, transform_indices = @transform_5, window_bounds = array<i64: 768, 128>}, {pipeline_mode = #tpu.pipeline_mode<synchronous>, transform_indices = @transform_6, window_bounds = array<i64: 1, 128>}, {transform_indices = @transform_7, window_bounds = array<i64: 1, 1, 128>}]} {
    %c0 = arith.constant 0 : index
    %c0_0 = arith.constant 0 : index
    %0 = vector.load %arg1[%c0, %c0_0] : memref<128x224xf32, #tpu.memory_space<vmem>>, vector<128x224xf32>
    %1 = arith.truncf %0 : vector<128x224xf32> to vector<128x224xbf16>
    %c0_1 = arith.constant 0 : index
    %c0_2 = arith.constant 0 : index
    %2 = vector.load %arg2[%c0_1, %c0_2] : memref<224x768xbf16, #tpu.memory_space<vmem>>, vector<224x768xbf16>
    %cst = arith.constant dense<0.000000e+00> : vector<128x768xf32>
    %3 = tpu.matmul %1, %2, %cst {dimension_numbers = #tpu.dot_dimension_numbers<[1], [0], [0], [1], [0, 0, 1, 1], [], []>} : vector<128x224xbf16>, vector<224x768xbf16>, vector<128x768xf32> -> vector<128x768xf32>
    %c0_3 = arith.constant 0 : index
    %c0_4 = arith.constant 0 : index
    %4 = vector.load %arg3[%c0_3, %c0_4] : memref<1x768xf32, #tpu.memory_space<vmem>>, vector<1x768xf32>
    %5 = vector.broadcast %4 : vector<1x768xf32> to vector<128x768xf32>
    %6 = arith.addf %3, %5 : vector<128x768xf32>
    %cst_5 = arith.constant 0.000000e+00 : f32
    %7 = vector.broadcast %cst_5 : f32 to vector<128x768xf32>
    %8 = arith.maximumf %6, %7 : vector<128x768xf32>
    %9 = arith.truncf %8 : vector<128x768xf32> to vector<128x768xbf16>
    %c0_6 = arith.constant 0 : index
    %c0_7 = arith.constant 0 : index
    %10 = vector.load %arg4[%c0_6, %c0_7] : memref<768x768xbf16, #tpu.memory_space<vmem>>, vector<768x768xbf16>
    %cst_8 = arith.constant dense<0.000000e+00> : vector<128x768xf32>
    %11 = tpu.matmul %9, %10, %cst_8 {dimension_numbers = #tpu.dot_dimension_numbers<[1], [0], [0], [1], [0, 0, 1, 1], [], []>} : vector<128x768xbf16>, vector<768x768xbf16>, vector<128x768xf32> -> vector<128x768xf32>
    %c0_9 = arith.constant 0 : index
    %c0_10 = arith.constant 0 : index
    %12 = vector.load %arg5[%c0_9, %c0_10] : memref<1x768xf32, #tpu.memory_space<vmem>>, vector<1x768xf32>
    %13 = vector.broadcast %12 : vector<1x768xf32> to vector<128x768xf32>
    %14 = arith.addf %11, %13 : vector<128x768xf32>
    %cst_11 = arith.constant 0.000000e+00 : f32
    %15 = vector.broadcast %cst_11 : f32 to vector<128x768xf32>
    %16 = arith.maximumf %14, %15 : vector<128x768xf32>
    %17 = arith.truncf %16 : vector<128x768xf32> to vector<128x768xbf16>
    %c0_12 = arith.constant 0 : index
    %c0_13 = arith.constant 0 : index
    %18 = vector.load %arg6[%c0_12, %c0_13] : memref<768x128xbf16, #tpu.memory_space<vmem>>, vector<768x128xbf16>
    %cst_14 = arith.constant dense<0.000000e+00> : vector<128x128xf32>
    %19 = tpu.matmul %17, %18, %cst_14 {dimension_numbers = #tpu.dot_dimension_numbers<[1], [0], [0], [1], [0, 0, 1, 1], [], []>} : vector<128x768xbf16>, vector<768x128xbf16>, vector<128x128xf32> -> vector<128x128xf32>
    %c0_15 = arith.constant 0 : index
    %c0_16 = arith.constant 0 : index
    %20 = vector.load %arg7[%c0_15, %c0_16] : memref<1x128xf32, #tpu.memory_space<vmem>>, vector<1x128xf32>
    %21 = vector.broadcast %20 : vector<1x128xf32> to vector<128x128xf32>
    %22 = arith.addf %19, %21 : vector<128x128xf32>
    %23 = tpu.iota {dimensions = array<i32: 0>} : vector<128x128xi32>
    %24 = tpu.iota {dimensions = array<i32: 1>} : vector<128x128xi32>
    %25 = arith.cmpi eq, %23, %24 : vector<128x128xi32>
    %26 = arith.extui %25 : vector<128x128xi1> to vector<128x128xi32>
    %27 = arith.sitofp %26 : vector<128x128xi32> to vector<128x128xf32>
    %28 = arith.mulf %22, %27 : vector<128x128xf32>
    %cst_17 = arith.constant dense<0.000000e+00> : vector<128xf32>
    %29 = vector.multi_reduction <add>, %28, %cst_17 [0] : vector<128x128xf32> to vector<128xf32>
    %30 = vector.shape_cast %29 : vector<128xf32> to vector<1x128xf32>
    %31 = arith.negf %30 : vector<1x128xf32>
    %32 = math.exp %31 : vector<1x128xf32>
    %cst_18 = arith.constant 1.000000e+00 : f32
    %33 = vector.broadcast %cst_18 : f32 to vector<1x128xf32>
    %34 = arith.addf %33, %32 : vector<1x128xf32>
    %35 = arith.divf %33, %34 : vector<1x128xf32>
    %c0_19 = arith.constant 0 : index
    %c0_20 = arith.constant 0 : index
    %c0_21 = arith.constant 0 : index
    %36 = vector.load %arg8[%c0_19, %c0_20, %c0_21] : memref<1x1x128xf32, #tpu.memory_space<vmem>>, vector<1x1x128xf32>
    %37 = vector.shape_cast %36 : vector<1x1x128xf32> to vector<1x128xf32>
    %38 = vector.shape_cast %35 : vector<1x128xf32> to vector<1x1x128xf32>
    tpu.vector_store %arg8[%c0_19, %c0_20, %c0_21], %38 {strides = array<i32>} : memref<1x1x128xf32, #tpu.memory_space<vmem>>, vector<1x1x128xf32>,
    return
  }
  func.func @transform_0(%arg0: i32) -> (i32, i32) {
    %c0_i32 = arith.constant 0 : i32
    %c0_i32_0 = arith.constant 0 : i32
    return %arg0, %c0_i32 : i32, i32
  }
  func.func @transform_1(%arg0: i32) -> (i32, i32) {
    %c0_i32 = arith.constant 0 : i32
    %c0_i32_0 = arith.constant 0 : i32
    %c0_i32_1 = arith.constant 0 : i32
    return %c0_i32, %c0_i32_0 : i32, i32
  }
  func.func @transform_2(%arg0: i32) -> (i32, i32) {
    %c0_i32 = arith.constant 0 : i32
    %c0_i32_0 = arith.constant 0 : i32
    %c0_i32_1 = arith.constant 0 : i32
    return %c0_i32, %c0_i32_0 : i32, i32
  }
  func.func @transform_3(%arg0: i32) -> (i32, i32) {
    %c0_i32 = arith.constant 0 : i32
    %c0_i32_0 = arith.constant 0 : i32
    %c0_i32_1 = arith.constant 0 : i32
    return %c0_i32, %c0_i32_0 : i32, i32
  }
  func.func @transform_4(%arg0: i32) -> (i32, i32) {
    %c0_i32 = arith.constant 0 : i32
    %c0_i32_0 = arith.constant 0 : i32
    %c0_i32_1 = arith.constant 0 : i32
    return %c0_i32, %c0_i32_0 : i32, i32
  }
  func.func @transform_5(%arg0: i32) -> (i32, i32) {
    %c0_i32 = arith.constant 0 : i32
    %c0_i32_0 = arith.constant 0 : i32
    %c0_i32_1 = arith.constant 0 : i32
    return %c0_i32, %c0_i32_0 : i32, i32
  }
  func.func @transform_6(%arg0: i32) -> (i32, i32) {
    %c0_i32 = arith.constant 0 : i32
    %c0_i32_0 = arith.constant 0 : i32
    %c0_i32_1 = arith.constant 0 : i32
    return %c0_i32, %c0_i32_0 : i32, i32
  }
  func.func @transform_7(%arg0: i32) -> (i32, i32, i32) {
    %c0_i32 = arith.constant 0 : i32
    %c0_i32_0 = arith.constant 0 : i32
    %c0_i32_1 = arith.constant 0 : i32
    return %arg0, %c0_i32, %c0_i32_0 : i32, i32, i32
  }
}

</mosaic_0001>

<bundles_post_ra>
// kernel: net_forward.1
= control target key start
LH: loop header
LB: loop body
LE: loop exit
PB: predicated region body
PF: predicated region fallthrough
CT: control target
= control target key end

     0   :  { %vm611_vm0 = vcmask 785408   ;;  %s8823_s1 = inlined_call_operand.vmem [shape: bf16[224,768], index: 1, kind: input, shape index: {}]   ;;  %s8824_s0 = inlined_call_operand.vmem [shape: f32[128,224], index: 0, kind: input, shape index: {}]   ;;  %s8825_s3 = inlined_call_operand.vmem [shape: bf16[768,768], index: 3, kind: input, shape index: {}]   ;;  %s8826_s2 = inlined_call_operand.vmem [shape: f32[1,768], index: 2, kind: input, shape index: {}]   ;;  %s8827_s5 = inlined_call_operand.vmem [shape: bf16[768,128], index: 5, kind: input, shape index: {}]   ;;  %s8828_s4 = inlined_call_operand.vmem [shape: f32[1,768], index: 4, kind: input, shape index: {}]   ;;  %s8829_s6 = inlined_call_operand.vmem [shape: f32[1,128], index: 6, kind: input, shape index: {}]   ;;  %s8830_s7 = inlined_call_operand.vmem [shape: f32[1,1,128], index: 7, kind: output, shape index: {}]  }
   0x1   :  { %v5508_v0 = vld [vmem:[%s8823_s1 + $0x154] ss:$24 sps:$4 sm:$0xff]   ;;  %v5512_v2 = vld [vmem:[%s8823_s1 + $0x150] ss:$24 sps:$4 sm:$0xff]   ;;  %v5514_v4 = vld [vmem:[%s8823_s1 + $0x124] ss:$24 sps:$4 sm:$0xff]  }
   0x2   :  { %v5510_v1 = vld [vmem:[%s8823_s1 + $0x15c] ss:$24 sps:$4 sm:$0xff]   ;;  %636 = vmatprep.subr.bf16.mxu0 %v5508_v0  ;;  %v5513_v3 = vld [vmem:[%s8823_s1 + $0x158] ss:$24 sps:$4 sm:$0xff]   ;;  %v5516_v5 = vld [vmem:[%s8823_s1 + $0x12c] ss:$24 sps:$4 sm:$0xff]  }
   0x3   :  { %749 = vmatprep.subr.bf16.mxu1 %v5510_v1  ;;  %637 = vmatpush1.bf16.msra.mxu0 %v5512_v2  ;;  %v5518_v6 = vld [vmem:[%s8823_s1 + $0x120] ss:$24 sps:$4 sm:$0xff]   ;;  %v5520_v8 = vld [vmem:[%s8823_s1 + $0xf4] ss:$24 sps:$4 sm:$0xff]   ;;  %v5524_v10 = vld [vmem:[%s8823_s1 + $0xf0] ss:$24 sps:$4 sm:$0xff]  }
   0x4   :  { %750 = vmatpush1.bf16.msra.mxu1 %v5513_v3  ;;  %638 = vmatprep.subr.bf16.mxu0 %v5514_v4  ;;  %v5519_v7 = vld [vmem:[%s8823_s1 + $0x128] ss:$24 sps:$4 sm:$0xff]   ;;  %v5522_v9 = vld [vmem:[%s8823_s1 + $0xfc] ss:$24 sps:$4 sm:$0xff]   ;;  %v5525_v11 = vld [vmem:[%s8823_s1 + $0xf8] ss:$24 sps:$4 sm:$0xff]  }
   0x5   :  { %751 = vmatprep.subr.bf16.mxu1 %v5516_v5  ;;  %v5526_v12 = vld [vmem:[%s8823_s1 + $0xc4] ss:$24 sps:$4 sm:$0xff]   ;;  %v5530_v14 = vld [vmem:[%s8823_s1 + $0xc0] ss:$24 sps:$4 sm:$0xff]   ;;  %v5532_v16 = vld [vmem:[%s8823_s1 + $0x94] ss:$24 sps:$4 sm:$0xff]  }
   0x6   :  { %v5528_v13 = vld [vmem:[%s8823_s1 + $0xcc] ss:$24 sps:$4 sm:$0xff]   ;;  %v5531_v15 = vld [vmem:[%s8823_s1 + $0xc8] ss:$24 sps:$4 sm:$0xff]   ;;  %v5534_v17 = vld [vmem:[%s8823_s1 + $0x9c] ss:$24 sps:$4 sm:$0xff]  }
   0x7   :  { %639 = vmatpush1.bf16.msra.mxu0 %v5518_v6  ;;  %v5536_v18 = vld [vmem:[%s8823_s1 + $0x90] ss:$24 sps:$4 sm:$0xff]   ;;  %v5538_v20 = vld [vmem:[%s8823_s1 + $0x64] ss:$24 sps:$4 sm:$0xff]   ;;  %v5542_v22 = vld [vmem:[%s8823_s1 + $0x60] ss:$24 sps:$4 sm:$0xff]  }
   0x8   :  { %752 = vmatpush1.bf16.msra.mxu1 %v5519_v7  ;;  %640 = vmatprep.subr.bf16.mxu0 %v5520_v8  ;;  %v5537_v19 = vld [vmem:[%s8823_s1 + $0x98] ss:$24 sps:$4 sm:$0xff]   ;;  %v5540_v21 = vld [vmem:[%s8823_s1 + $0x6c] ss:$24 sps:$4 sm:$0xff]   ;;  %v5543_v23 = vld [vmem:[%s8823_s1 + $0x68] ss:$24 sps:$4 sm:$0xff]  }
   0x9   :  { %753 = vmatprep.subr.bf16.mxu1 %v5522_v9  ;;  %v5544_v24 = vld [vmem:[%s8823_s1 + $0x34] ss:$24 sps:$4 sm:$0xff]   ;;  %v5548_v26 = vld [vmem:[%s8823_s1 + $0x30] ss:$24 sps:$4 sm:$0xff]   ;;  %v5550_v28 = vld [vmem:[%s8823_s1 + $0x4] ss:$24 sps:$4 sm:$0xff]  }
   0xa   :  { %v5546_v25 = vld [vmem:[%s8823_s1 + $0x3c] ss:$24 sps:$4 sm:$0xff]   ;;  %v5549_v27 = vld [vmem:[%s8823_s1 + $0x38] ss:$24 sps:$4 sm:$0xff]   ;;  %v5552_v29 = vld [vmem:[%s8823_s1 + $0xc] ss:$24 sps:$4 sm:$0xff]  }
   0xb   :  { %641 = vmatpush1.bf16.msra.mxu0 %v5524_v10  ;;  %v5554_v30 = vld [vmem:[%s8823_s1] ss:$24 sps:$4 sm:$0xff]   ;;  %v5556_v32 = vld [vmem:[%s8823_s1 + $0x274] ss:$24 sps:$4 sm:$0xff]   ;;  %v5560_v34 = vld [vmem:[%s8823_s1 + $0x270] ss:$24 sps:$4 sm:$0xff]  }
   0xc   :  { %754 = vmatpush1.bf16.msra.mxu1 %v5525_v11  ;;  %642 = vmatprep.subr.bf16.mxu0 %v5526_v12  ;;  %v5555_v31 = vld [vmem:[%s8823_s1 + $0x8] ss:$24 sps:$4 sm:$0xff]   ;;  %v5558_v33 = vld [vmem:[%s8823_s1 + $0x27c] ss:$24 sps:$4 sm:$0xff]   ;;  %v5561_v35 = vld [vmem:[%s8823_s1 + $0x278] ss:$24 sps:$4 sm:$0xff]  }
   0xd   :  { %755 = vmatprep.subr.bf16.mxu1 %v5528_v13  ;;  %v5562_v36 = vld [vmem:[%s8823_s1 + $0x244] ss:$24 sps:$4 sm:$0xff]   ;;  %v5566_v38 = vld [vmem:[%s8823_s1 + $0x240] ss:$24 sps:$4 sm:$0xff]   ;;  %v5568_v40 = vld [vmem:[%s8823_s1 + $0x214] ss:$24 sps:$4 sm:$0xff]  }
   0xe   :  { %v5564_v37 = vld [vmem:[%s8823_s1 + $0x24c] ss:$24 sps:$4 sm:$0xff]   ;;  %v5567_v39 = vld [vmem:[%s8823_s1 + $0x248] ss:$24 sps:$4 sm:$0xff]   ;;  %v5570_v41 = vld [vmem:[%s8823_s1 + $0x21c] ss:$24 sps:$4 sm:$0xff]  }
   0xf   :  { %643 = vmatpush1.bf16.msra.mxu0 %v5530_v14  ;;  %v28_v42 = vld [vmem:[%s8824_s0 + $0x8] sm:$0xff]  ;;  %v30_v43 = vld [vmem:[%s8824_s0 + $0x18] sm:$0xff]  ;;  %v27_v59 = vld [vmem:[%s8824_s0] sm:$0xff] }
  0x10   :  { %756 = vmatpush1.bf16.msra.mxu1 %v5531_v15  ;;  %644 = vmatprep.subr.bf16.mxu0 %v5532_v16  ;;  %v6292_v44 = vpack.c.bf16 %v30_v43, %v28_v42  ;;  %v5572_v45 = vld [vmem:[%s8823_s1 + $0x210] ss:$24 sps:$4 sm:$0xff]   ;;  %v5574_v47 = vld [vmem:[%s8823_s1 + $0x1e4] ss:$24 sps:$4 sm:$0xff]   ;;  %v5578_v49 = vld [vmem:[%s8823_s1 + $0x1e0] ss:$24 sps:$4 sm:$0xff]  }
  0x11   :  { %757 = vmatprep.subr.bf16.mxu1 %v5534_v17  ;;  %v5573_v46 = vld [vmem:[%s8823_s1 + $0x218] ss:$24 sps:$4 sm:$0xff]   ;;  %v5576_v48 = vld [vmem:[%s8823_s1 + $0x1ec] ss:$24 sps:$4 sm:$0xff]   ;;  %v5579_v50 = vld [vmem:[%s8823_s1 + $0x1e8] ss:$24 sps:$4 sm:$0xff]  }
  0x12   :  { %4921 = vmatprep.mubr.msk.bf16.mxu0 %vm611_vm0, %v6292_v44  ;;  %4929 = vmatprep.mubr.msk.bf16.mxu1 %vm611_vm0, %v6292_v44  ;;  %v5580_v51 = vld [vmem:[%s8823_s1 + $0x1b4] ss:$24 sps:$4 sm:$0xff]   ;;  %v5584_v53 = vld [vmem:[%s8823_s1 + $0x1b0] ss:$24 sps:$4 sm:$0xff]   ;;  %v5586_v55 = vld [vmem:[%s8823_s1 + $0x184] ss:$24 sps:$4 sm:$0xff]  }
  0x13   :  { %645 = vmatpush1.bf16.msra.mxu0 %v5536_v18  ;;  %v5582_v52 = vld [vmem:[%s8823_s1 + $0x1bc] ss:$24 sps:$4 sm:$0xff]   ;;  %v5585_v54 = vld [vmem:[%s8823_s1 + $0x1b8] ss:$24 sps:$4 sm:$0xff]   ;;  %v5588_v56 = vld [vmem:[%s8823_s1 + $0x18c] ss:$24 sps:$4 sm:$0xff]  }
  0x14   :  { %758 = vmatpush1.bf16.msra.mxu1 %v5537_v19  ;;  %646 = vmatprep.subr.bf16.mxu0 %v5538_v20  ;;  %v5590_v57 = vld [vmem:[%s8823_s1 + $0x180] ss:$24 sps:$4 sm:$0xff]   ;;  %v29_v60 = vld [vmem:[%s8824_s0 + $0x10] sm:$0xff]  ;;  %v5594_v61 = vld [vmem:[%s8823_s1 + $0x164] ss:$24 sps:$4 sm:$0xff]  }
  0x15   :  { %759 = vmatprep.subr.bf16.mxu1 %v5540_v21  ;;  %v5591_v58 = vld [vmem:[%s8823_s1 + $0x188] ss:$24 sps:$4 sm:$0xff]   ;;  %v34_v63 = vld [vmem:[%s8824_s0 + $0x38] sm:$0xff]  ;;  %v6355_v0 = vpack.c.bf16 %v29_v60, %v27_v59  ;;  %v5597_v3 = vld [vmem:[%s8823_s1 + $0x134] ss:$24 sps:$4 sm:$0xff]  }
  0x16   :  { %v32_v62 = vld [vmem:[%s8824_s0 + $0x28] sm:$0xff]  ;;  %v5592_v1 = vld [vmem:[%s8823_s1 + $0x160] ss:$24 sps:$4 sm:$0xff]   ;;  %v33_v6 = vld [vmem:[%s8824_s0 + $0x30] sm:$0xff] }
  0x17   :  { %647 = vmatpush1.bf16.msra.mxu0 %v5542_v22  ;;  %v6360_v2 = vpack.c.bf16 %v34_v63, %v32_v62  ;;  %v5595_v4 = vld [vmem:[%s8823_s1 + $0x130] ss:$24 sps:$4 sm:$0xff]   ;;  %v31_v5 = vld [vmem:[%s8824_s0 + $0x20] sm:$0xff]  ;;  %v38_v9 = vld [vmem:[%s8824_s0 + $0x58] sm:$0xff] }
  0x18   :  { %760 = vmatpush1.bf16.msra.mxu1 %v5543_v23  ;;  %648 = vmatprep.subr.bf16.mxu0 %v5544_v24  ;;  %v5600_v7 = vld [vmem:[%s8823_s1 + $0x104] ss:$24 sps:$4 sm:$0xff]   ;;  %v36_v8 = vld [vmem:[%s8824_s0 + $0x48] sm:$0xff]  ;;  %v6389_v10 = vpack.c.bf16 %v33_v6, %v31_v5  ;;  %v5598_v11 = vld [vmem:[%s8823_s1 + $0x100] ss:$24 sps:$4 sm:$0xff]  }
  0x19   :  { %761 = vmatprep.subr.bf16.mxu1 %v5546_v25  ;;  %v6394_v12 = vpack.c.bf16 %v38_v9, %v36_v8  ;;  %v5603_v13 = vld [vmem:[%s8823_s1 + $0xd4] ss:$24 sps:$4 sm:$0xff]   ;;  %v5601_v14 = vld [vmem:[%s8823_s1 + $0xd0] ss:$24 sps:$4 sm:$0xff]   ;;  %v35_v15 = vld [vmem:[%s8824_s0 + $0x40] sm:$0xff] }
  0x1a   :  { %v37_v16 = vld [vmem:[%s8824_s0 + $0x50] sm:$0xff]  ;;  %v5606_v17 = vld [vmem:[%s8823_s1 + $0xa4] ss:$24 sps:$4 sm:$0xff]   ;;  %v40_v20 = vld [vmem:[%s8824_s0 + $0x68] sm:$0xff] }
  0x1b   :  { %649 = vmatpush1.bf16.msra.mxu0 %v5548_v26  ;;  %v5634_v18 = vld [vmem:[%s8825_s3 + $0x150] ss:$24 sps:$4 sm:$0xff]   ;;  %v5636_v19 = vld [vmem:[%s8825_s3 + $0x154] ss:$24 sps:$4 sm:$0xff]   ;;  %v42_v21 = vld [vmem:[%s8824_s0 + $0x78] sm:$0xff]  ;;  %v6432_v23 = vpack.c.bf16 %v37_v16, %v35_v15 }
  0x1c   :  { %762 = vmatpush1.bf16.msra.mxu1 %v5549_v27  ;;  %650 = vmatprep.subr.bf16.mxu0 %v5550_v28  ;;  %v5642_v22 = vld [vmem:[%s8825_s3 + $0x124] ss:$24 sps:$4 sm:$0xff]   ;;  %v5604_v24 = vld [vmem:[%s8823_s1 + $0xa0] ss:$24 sps:$4 sm:$0xff]   ;;  %v6437_v25 = vpack.c.bf16 %v42_v21, %v40_v20  ;;  %v5609_v26 = vld [vmem:[%s8823_s1 + $0x74] ss:$24 sps:$4 sm:$0xff]  }
  0x1d   :  { %763 = vmatprep.subr.bf16.mxu1 %v5552_v29  ;;  %v5607_v27 = vld [vmem:[%s8823_s1 + $0x70] ss:$24 sps:$4 sm:$0xff]   ;;  %v39_v28 = vld [vmem:[%s8824_s0 + $0x60] sm:$0xff]  ;;  %v5633_v21 = vld [vmem:[%s8823_s1 + $0x194] ss:$24 sps:$4 sm:$0xff]  }
  0x1e   :  { %v41_v29 = vld [vmem:[%s8824_s0 + $0x70] sm:$0xff]  ;;  %v5654_v43 = vld [vmem:[%s8825_s3 + $0xc4] ss:$24 sps:$4 sm:$0xff]   ;;  %v52_v60 = vld [vmem:[%s8824_s0 + $0xc8] sm:$0xff] }
  0x1f   :  { %651 = vmatpush1.bf16.msra.mxu0 %v5554_v30  ;;  %v5640_v30 = vld [vmem:[%s8825_s3 + $0x120] ss:$24 sps:$4 sm:$0xff]   ;;  %v5613_v42 = vld [vmem:[%s8823_s1 + $0x10] ss:$24 sps:$4 sm:$0xff]   ;;  %v5666_v59 = vld [vmem:[%s8825_s3 + $0x64] ss:$24 sps:$4 sm:$0xff]  }
  0x20   :  { %764 = vmatpush1.bf16.msra.mxu1 %v5555_v31  ;;  %656 = vmatprep.subr.bf16.mxu0 %v5556_v32  ;;  %v5612_v31 = vld [vmem:[%s8823_s1 + $0x44] ss:$24 sps:$4 sm:$0xff]   ;;  %v5648_v32 = vld [vmem:[%s8825_s3 + $0xf4] ss:$24 sps:$4 sm:$0xff]   ;;  %v5664_v62 = vld [vmem:[%s8825_s3 + $0x60] ss:$24 sps:$4 sm:$0xff]  }
  0x21   :  { %769 = vmatprep.subr.bf16.mxu1 %v5558_v33  ;;  %v44_v33 = vld [vmem:[%s8824_s0 + $0x88] sm:$0xff]  ;;  %v51_v5 = vld [vmem:[%s8824_s0 + $0xc0] sm:$0xff]  ;;  %v53_v6 = vld [vmem:[%s8824_s0 + $0xd0] sm:$0xff] }
  0x22   :  { %v5670_v8 = vld [vmem:[%s8825_s3 + $0x30] ss:$24 sps:$4 sm:$0xff]   ;;  %v5630_v15 = vld [vmem:[%s8823_s1 + $0x1c4] ss:$24 sps:$4 sm:$0xff]   ;;  %v5676_v16 = vld [vmem:[%s8825_s3] ss:$24 sps:$4 sm:$0xff]  }
  0x23   :  { %657 = vmatpush2.bf16.msra.mxu0 %v5560_v34  ;;  %v46_v34 = vld [vmem:[%s8824_s0 + $0x98] sm:$0xff]  ;;  %v5625_v9 = vld [vmem:[%s8823_s1 + $0x1f0] ss:$24 sps:$4 sm:$0xff]  }
  0x24   :  { %770 = vmatpush2.bf16.msra.mxu1 %v5561_v35  ;;  %658 = vmatprep.subr.bf16.mxu0 %v5562_v36  ;;  %v5646_v35 = vld [vmem:[%s8825_s3 + $0xf0] ss:$24 sps:$4 sm:$0xff]   ;;  %v6475_v36 = vpack.c.bf16 %v41_v29, %v39_v28  ;;  %v5639_v29 = vld [vmem:[%s8825_s3 + $0x454] ss:$24 sps:$4 sm:$0xff]  }
  0x25   :  { %771 = vmatprep.subr.bf16.mxu1 %v5564_v37  ;;  %v5610_v37 = vld [vmem:[%s8823_s1 + $0x40] ss:$24 sps:$4 sm:$0xff]   ;;  %v5631_v28 = vld [vmem:[%s8823_s1 + $0x190] ss:$24 sps:$4 sm:$0xff]  }
  0x27   :  { %659 = vmatpush2.bf16.msra.mxu0 %v5566_v38  ;;  %v6480_v38 = vpack.c.bf16 %v46_v34, %v44_v33  ;;  %v5694_v33 = vld [vmem:[%s8825_s3 + $0x270] ss:$24 sps:$4 sm:$0xff]   ;;  %v5702_v34 = vld [vmem:[%s8825_s3 + $0x244] ss:$24 sps:$4 sm:$0xff]  }
  0x28   :  { %772 = vmatpush2.bf16.msra.mxu1 %v5567_v39  ;;  %660 = vmatprep.subr.bf16.mxu0 %v5568_v40  ;;  %v5615_v39 = vld [vmem:[%s8823_s1 + $0x14] ss:$24 sps:$4 sm:$0xff]   ;;  %v43_v40 = vld [vmem:[%s8824_s0 + $0x80] sm:$0xff] }
  0x29   :  { %773 = vmatprep.subr.bf16.mxu1 %v5570_v41  ;;  %v45_v41 = vld [vmem:[%s8824_s0 + $0x90] sm:$0xff] }
  0x2b   :  { %661 = vmatpush2.bf16.msra.mxu0 %v5572_v45  ;;  %v5618_v45 = vld [vmem:[%s8823_s1 + $0x284] ss:$24 sps:$4 sm:$0xff]  }
  0x2c   :  { %774 = vmatpush2.bf16.msra.mxu1 %v5573_v46  ;;  %662 = vmatprep.subr.bf16.mxu0 %v5574_v47  ;;  %v48_v46 = vld [vmem:[%s8824_s0 + $0xa8] sm:$0xff]  ;;  %v5652_v47 = vld [vmem:[%s8825_s3 + $0xc0] ss:$24 sps:$4 sm:$0xff]  }
  0x2d   :  { %775 = vmatprep.subr.bf16.mxu1 %v5576_v48  ;;  %v5660_v48 = vld [vmem:[%s8825_s3 + $0x94] ss:$24 sps:$4 sm:$0xff]  }
  0x2f   :  { %663 = vmatpush2.bf16.msra.mxu0 %v5578_v49  ;;  %v50_v49 = vld [vmem:[%s8824_s0 + $0xb8] sm:$0xff] }
  0x30   :  { %776 = vmatpush2.bf16.msra.mxu1 %v5579_v50  ;;  %664 = vmatprep.subr.bf16.mxu0 %v5580_v51  ;;  %v6518_v50 = vpack.c.bf16 %v45_v41, %v43_v40  ;;  %v5616_v51 = vld [vmem:[%s8823_s1 + $0x280] ss:$24 sps:$4 sm:$0xff]   ;;  %v5645_v40 = vld [vmem:[%s8825_s3 + $0x424] ss:$24 sps:$4 sm:$0xff]  }
  0x31   :  { %777 = vmatprep.subr.bf16.mxu1 %v5582_v52  ;;  %v6523_v52 = vpack.c.bf16 %v50_v49, %v48_v46  ;;  %v5643_v41 = vld [vmem:[%s8825_s3 + $0x420] ss:$24 sps:$4 sm:$0xff]   ;;  %v5657_v46 = vld [vmem:[%s8825_s3 + $0x3c4] ss:$24 sps:$4 sm:$0xff]  }
  0x32   :  { %v5726_v49 = vld [vmem:[%s8825_s3 + $0x184] ss:$24 sps:$4 sm:$0xff]  }
  0x33   :  { %665 = vmatpush2.bf16.msra.mxu0 %v5584_v53  ;;  %v5621_v53 = vld [vmem:[%s8823_s1 + $0x254] ss:$24 sps:$4 sm:$0xff]  }
  0x34   :  { %778 = vmatpush2.bf16.msra.mxu1 %v5585_v54  ;;  %666 = vmatprep.subr.bf16.mxu0 %v5586_v55  ;;  %v47_v54 = vld [vmem:[%s8824_s0 + $0xa0] sm:$0xff]  ;;  %v49_v55 = vld [vmem:[%s8824_s0 + $0xb0] sm:$0xff] }
  0x35   :  { %779 = vmatprep.subr.bf16.mxu1 %v5588_v56  ;;  %v5619_v56 = vld [vmem:[%s8823_s1 + $0x250] ss:$24 sps:$4 sm:$0xff]   ;;  %v6561_v63 = vpack.c.bf16 %v49_v55, %v47_v54  ;;  %v5669_v54 = vld [vmem:[%s8825_s3 + $0x364] ss:$24 sps:$4 sm:$0xff]   ;;  %v5667_v55 = vld [vmem:[%s8825_s3 + $0x360] ss:$24 sps:$4 sm:$0xff]  }
  0x37   :  { %667 = vmatpush2.bf16.msra.mxu0 %v5590_v57  ;;  %v5658_v57 = vld [vmem:[%s8825_s3 + $0x90] ss:$24 sps:$4 sm:$0xff]  }
  0x38   :  { %780 = vmatpush2.bf16.msra.mxu1 %v5591_v58  ;;  %862 = vmatprep.subr.bf16.mxu0 %v5594_v61  ;;  %v5624_v58 = vld [vmem:[%s8823_s1 + $0x224] ss:$24 sps:$4 sm:$0xff]  }
  0x39   :  { %2879 = vmatprep.subr.bf16.mxu1 %v5636_v19  ;;  %v54_v61 = vld [vmem:[%s8824_s0 + $0xd8] sm:$0xff]  ;;  %v5684_v19 = vld [vmem:[%s8825_s3 + $0x2d4] ss:$24 sps:$4 sm:$0xff]  }
  0x3a   :  { %669 = vmatmul.mubr.bf16.vlgmr.msra.gmra.mxu0 %v6355_v0 }
  0x3b   :  { %782 = vmatmul.mubr.bf16.vlgmr.msra.gmra.mxu1 %v6355_v0  ;;  %863 = vmatpush1.bf16.msra.mxu0 %v5592_v1  ;;  %v5622_v1 = vld [vmem:[%s8823_s1 + $0x220] ss:$24 sps:$4 sm:$0xff]  }
  0x3c   :  { %4922 = vmatprep.mubr.msk.bf16.mxu0 %vm611_vm0, %v6360_v2  ;;  %864 = vmatprep.subr.bf16.mxu0 %v5597_v3  ;;  %v6566_v3 = vpack.c.bf16 %v54_v61, %v52_v60  ;;  %v5699_v60 = vld [vmem:[%s8825_s3 + $0x574] ss:$24 sps:$4 sm:$0xff]   ;;  %v5697_v61 = vld [vmem:[%s8825_s3 + $0x570] ss:$24 sps:$4 sm:$0xff]  }
  0x3d   :  { %4930 = vmatprep.mubr.msk.bf16.mxu1 %vm611_vm0, %v6360_v2  ;;  %2880 = vmatpush1.bf16.msra.mxu1 %v5634_v18  ;;  %v5628_v18 = vld [vmem:[%s8823_s1 + $0x1c0] ss:$24 sps:$4 sm:$0xff]  }
  0x3e   :  { %2881 = vmatprep.subr.bf16.mxu1 %v5642_v22  ;;  %v5682_v22 = vld [vmem:[%s8825_s3 + $0x2d0] ss:$24 sps:$4 sm:$0xff]  }
  0x3f   :  { %865 = vmatpush1.bf16.msra.mxu0 %v5595_v4  ;;  %v5672_v4 = vld [vmem:[%s8825_s3 + $0x34] ss:$24 sps:$4 sm:$0xff]  }
  0x40   :  { %866 = vmatprep.subr.bf16.mxu0 %v5600_v7  ;;  %v5627_v7 = vld [vmem:[%s8823_s1 + $0x1f4] ss:$24 sps:$4 sm:$0xff]  }
  0x41   :  { %2882 = vmatpush1.bf16.msra.mxu1 %v5640_v30  ;;  %v5688_v30 = vld [vmem:[%s8825_s3 + $0x2a0] ss:$24 sps:$4 sm:$0xff]  }
  0x42   :  { %679 = vmatmul.mubr.bf16.gmra.mxu0 %v6389_v10  ;;  %2883 = vmatprep.subr.bf16.mxu1 %v5648_v32 }
  0x43   :  { %792 = vmatmul.mubr.bf16.gmra.mxu1 %v6389_v10  ;;  %867 = vmatpush1.bf16.msra.mxu0 %v5598_v11  ;;  %v56_v11 = vld [vmem:[%s8824_s0 + $0xe8] sm:$0xff] }
  0x44   :  { %4923 = vmatprep.mubr.msk.bf16.mxu0 %vm611_vm0, %v6394_v12  ;;  %868 = vmatprep.subr.bf16.mxu0 %v5603_v13  ;;  %v5678_v13 = vld [vmem:[%s8825_s3 + $0x4] ss:$24 sps:$4 sm:$0xff]  }
  0x45   :  { %4931 = vmatprep.mubr.msk.bf16.mxu1 %vm611_vm0, %v6394_v12  ;;  %2884 = vmatpush1.bf16.msra.mxu1 %v5646_v35  ;;  %v5700_v35 = vld [vmem:[%s8825_s3 + $0x240] ss:$24 sps:$4 sm:$0xff]  }
  0x46   :  { %2885 = vmatprep.subr.bf16.mxu1 %v5654_v43  ;;  %v5651_v43 = vld [vmem:[%s8825_s3 + $0x3f4] ss:$24 sps:$4 sm:$0xff]  }
  0x47   :  { %869 = vmatpush1.bf16.msra.mxu0 %v5601_v14  ;;  %v58_v14 = vld [vmem:[%s8824_s0 + $0xf8] sm:$0xff] }
  0x48   :  { %870 = vmatprep.subr.bf16.mxu0 %v5606_v17  ;;  %v6607_v17 = vpack.c.bf16 %v53_v6, %v51_v5  ;;  %v6615_v20 = vpack.c.bf16 %v58_v14, %v56_v11  ;;  %v5721_v5 = vld [vmem:[%s8825_s3 + $0x4b0] ss:$24 sps:$4 sm:$0xff]   ;;  %v5729_v6 = vld [vmem:[%s8825_s3 + $0x484] ss:$24 sps:$4 sm:$0xff]  }
  0x49   :  { %2886 = vmatpush1.bf16.msra.mxu1 %v5652_v47  ;;  %v5718_v47 = vld [vmem:[%s8825_s3 + $0x1b0] ss:$24 sps:$4 sm:$0xff]  }
  0x4a   :  { %689 = vmatmul.mubr.bf16.gmra.mxu0 %v6432_v23  ;;  %2887 = vmatprep.subr.bf16.mxu1 %v5660_v48  ;;  %v5655_v48 = vld [vmem:[%s8825_s3 + $0x3c0] ss:$24 sps:$4 sm:$0xff]  }
  0x4b   :  { %802 = vmatmul.mubr.bf16.gmra.mxu1 %v6432_v23  ;;  %871 = vmatpush1.bf16.msra.mxu0 %v5604_v24  ;;  %v5690_v24 = vld [vmem:[%s8825_s3 + $0x2a4] ss:$24 sps:$4 sm:$0xff]  }
  0x4c   :  { %4924 = vmatprep.mubr.msk.bf16.mxu0 %vm611_vm0, %v6437_v25  ;;  %4932 = vmatprep.mubr.msk.bf16.mxu1 %vm611_vm0, %v6437_v25 }
  0x4d   :  { %872 = vmatprep.subr.bf16.mxu0 %v5609_v26  ;;  %2888 = vmatpush1.bf16.msra.mxu1 %v5658_v57  ;;  %v55_v26 = vld [vmem:[%s8824_s0 + $0xe0] sm:$0xff]  ;;  %v5673_v57 = vld [vmem:[%s8825_s3 + $0x330] ss:$24 sps:$4 sm:$0xff]  }
  0x4e   :  { %2889 = vmatprep.subr.bf16.mxu1 %v5666_v59  ;;  %v5685_v59 = vld [vmem:[%s8825_s3 + $0x5d0] ss:$24 sps:$4 sm:$0xff]  }
  0x4f   :  { %873 = vmatpush1.bf16.msra.mxu0 %v5607_v27  ;;  %v57_v27 = vld [vmem:[%s8824_s0 + $0xf0] sm:$0xff] }
  0x50   :  { %874 = vmatprep.subr.bf16.mxu0 %v5612_v31  ;;  %v5696_v31 = vld [vmem:[%s8825_s3 + $0x274] ss:$24 sps:$4 sm:$0xff]   ;;  %v6650_v32 = vpack.c.bf16 %v57_v27, %v55_v26 }
  0x51   :  { %2890 = vmatpush1.bf16.msra.mxu1 %v5664_v62  ;;  %v5711_v62 = vld [vmem:[%s8825_s3 + $0x514] ss:$24 sps:$4 sm:$0xff]  }
  0x52   :  { %699 = vmatmul.mubr.bf16.gmra.mxu0 %v6475_v36  ;;  %2891 = vmatprep.subr.bf16.mxu1 %v5672_v4  ;;  %v5723_v4 = vld [vmem:[%s8825_s3 + $0x4b4] ss:$24 sps:$4 sm:$0xff]  }
  0x53   :  { %812 = vmatmul.mubr.bf16.gmra.mxu1 %v6475_v36  ;;  %875 = vmatpush1.bf16.msra.mxu0 %v5610_v37  ;;  %v5708_v37 = vld [vmem:[%s8825_s3 + $0x214] ss:$24 sps:$4 sm:$0xff]  }
  0x54   :  { %4925 = vmatprep.mubr.msk.bf16.mxu0 %vm611_vm0, %v6480_v38  ;;  %4933 = vmatprep.mubr.msk.bf16.mxu1 %vm611_vm0, %v6480_v38 }
  0x55   :  { %876 = vmatprep.subr.bf16.mxu0 %v5615_v39  ;;  %2892 = vmatpush1.bf16.msra.mxu1 %v5670_v8  ;;  %v5637_v39 = vld [vmem:[%s8825_s3 + $0x450] ss:$24 sps:$4 sm:$0xff]   ;;  %v5735_v8 = vld [vmem:[%s8825_s3 + $0x15c] ss:$24 sps:$4 sm:$0xff]  }
  0x56   :  { %2893 = vmatprep.subr.bf16.mxu1 %v5678_v13 }
  0x57   :  { %877 = vmatpush1.bf16.msra.mxu0 %v5613_v42  ;;  %v5714_v42 = vld [vmem:[%s8825_s3 + $0x1e4] ss:$24 sps:$4 sm:$0xff]  }
  0x58   :  { %882 = vmatprep.subr.bf16.mxu0 %v5618_v45  ;;  %v5649_v45 = vld [vmem:[%s8825_s3 + $0x3f0] ss:$24 sps:$4 sm:$0xff]  }
  0x59   :  { %2894 = vmatpush1.bf16.msra.mxu1 %v5676_v16 }
  0x5a   :  { %709 = vmatmul.mubr.bf16.gmra.mxu0 %v6518_v50  ;;  %2895 = vmatprep.subr.bf16.mxu1 %v5684_v19 }
  0x5b   :  { %822 = vmatmul.mubr.bf16.gmra.mxu1 %v6518_v50  ;;  %883 = vmatpush2.bf16.msra.mxu0 %v5616_v51  ;;  %v5663_v51 = vld [vmem:[%s8825_s3 + $0x394] ss:$24 sps:$4 sm:$0xff]  }
  0x5c   :  { %4926 = vmatprep.mubr.msk.bf16.mxu0 %vm611_vm0, %v6523_v52  ;;  %4934 = vmatprep.mubr.msk.bf16.mxu1 %vm611_vm0, %v6523_v52 }
  0x5d   :  { %884 = vmatprep.subr.bf16.mxu0 %v5621_v53  ;;  %2896 = vmatpush2.bf16.msra.mxu1 %v5682_v22  ;;  %v5732_v53 = vld [vmem:[%s8825_s3 + $0x754] ss:$24 sps:$4 sm:$0xff]  }
  0x5e   :  { %2897 = vmatprep.subr.bf16.mxu1 %v5690_v24 }
  0x5f   :  { %885 = vmatpush2.bf16.msra.mxu0 %v5619_v56  ;;  %v5675_v56 = vld [vmem:[%s8825_s3 + $0x334] ss:$24 sps:$4 sm:$0xff]  }
  0x60   :  { %886 = vmatprep.subr.bf16.mxu0 %v5624_v58  ;;  %v5687_v58 = vld [vmem:[%s8825_s3 + $0x5d4] ss:$24 sps:$4 sm:$0xff]  }
  0x61   :  { %2898 = vmatpush2.bf16.msra.mxu1 %v5688_v30 }
  0x62   :  { %719 = vmatmul.mubr.bf16.gmra.mxu0 %v6561_v63  ;;  %2899 = vmatprep.subr.bf16.mxu1 %v5696_v31 }
  0x63   :  { %832 = vmatmul.mubr.bf16.gmra.mxu1 %v6561_v63  ;;  %4927 = vmatprep.mubr.msk.bf16.mxu0 %vm611_vm0, %v6566_v3 }
  0x64   :  { %4935 = vmatprep.mubr.msk.bf16.mxu1 %vm611_vm0, %v6566_v3  ;;  %887 = vmatpush2.bf16.msra.mxu0 %v5622_v1  ;;  %v5709_v1 = vld [vmem:[%s8825_s3 + $0x510] ss:$24 sps:$4 sm:$0xff]  }
  0x65   :  { %888 = vmatprep.subr.bf16.mxu0 %v5627_v7  ;;  %2900 = vmatpush2.bf16.msra.mxu1 %v5694_v33  ;;  %v5727_v7 = vld [vmem:[%s8825_s3 + $0x480] ss:$24 sps:$4 sm:$0xff]  }
  0x66   :  { %2901 = vmatprep.subr.bf16.mxu1 %v5702_v34 }
  0x68   :  { %889 = vmatpush2.bf16.msra.mxu0 %v5625_v9  ;;  %v8831_v9 = vlaneseq }
  0x69   :  { %890 = vmatprep.subr.bf16.mxu0 %v5630_v15  ;;  %2902 = vmatpush2.bf16.msra.mxu1 %v5700_v35  ;;  %v6818_v15 = vld [vmem:[%s8826_s2] sm:$0x3f] }
  0x6a   :  { %729 = vmatmul.mubr.bf16.gmra.mxu0 %v6607_v17  ;;  %2903 = vmatprep.subr.bf16.mxu1 %v5708_v37  ;;  %v6811_v11 = vshrl.u32 %v8831_v9, 7  ;;  %v5862_v9 = vld [vmem:[%s8825_s3 + $0x338] ss:$24 sps:$4 sm:$0xff]  }
  0x6b   :  { %842 = vmatmul.mubr.bf16.gmra.mxu1 %v6607_v17  ;;  %4928 = vmatprep.mubr.msk.bf16.mxu0 %vm611_vm0, %v6615_v20 }
  0x6c   :  { %4936 = vmatprep.mubr.msk.bf16.mxu1 %vm611_vm0, %v6615_v20  ;;  %891 = vmatpush2.bf16.msra.mxu0 %v5628_v18  ;;  %8861 = vst [vmem:[#allocation2_spill] sm:$0xff] %v6811_v11  ;;  %v8835_v13 = vsub.s32 2, %v6811_v11  ;;  %v8834_v14 = vsub.s32 3, %v6811_v11  ;;  %v8836_v16 = vsub.s32 1, %v6811_v11 }
  0x6d   :  { %892 = vmatprep.subr.bf16.mxu0 %v5633_v21 }
  0x6e   :  { %v6825_v18 = vrot.slane %v6818_v15, %v8835_v13  ;;  %v6830_v19 = vrot.slane %v6818_v15, %v8834_v14  ;;  %v6835_v22 = vrot.slane %v6818_v15, %v8836_v16  ;;  %v5886_v13 = vld [vmem:[%s8825_s3 + $0x578] ss:$24 sps:$4 sm:$0xff]  }
  0x70   :  { %893 = vmatpush2.bf16.msra.mxu0 %v5631_v28 }
  0x71   :  { %2992 = vmatprep.subr.bf16.mxu0 %v5639_v29 }
  0x72   :  { %739 = vmatmul.mubr.bf16.gmra.mxu0 %v6650_v32 }
  0x73   :  { %852 = vmatmul.mubr.bf16.gmra.mxu1 %v6650_v32  ;;  %4937 = vmatprep.mubr.msk.bf16.mxu0 %vm611_vm0, %v6292_v44  ;;  %v5706_v44 = vld [vmem:[%s8825_s3 + $0x210] ss:$24 sps:$4 sm:$0xff]  }
  0x74   :  { %2904 = vmatpush2.bf16.msra.mxu1 %v5706_v44 }
  0x75   :  { %2905 = vmatprep.subr.bf16.mxu1 %v5714_v42 }
  0x7a   :  { %895 = vmatmul.mubr.bf16.vlgmr.msra.gmra.mxu0 %v6355_v0  ;;  %v5712_v0 = vld [vmem:[%s8825_s3 + $0x1e0] ss:$24 sps:$4 sm:$0xff]  }
  0x7b   :  { %4938 = vmatprep.mubr.msk.bf16.mxu0 %vm611_vm0, %v6360_v2  ;;  %2993 = vmatpush1.bf16.msra.mxu0 %v5637_v39  ;;  %v5720_v2 = vld [vmem:[%s8825_s3 + $0x1b4] ss:$24 sps:$4 sm:$0xff]  }
  0x7c   :  { %2994 = vmatprep.subr.bf16.mxu0 %v5645_v40  ;;  %2906 = vmatpush2.bf16.msra.mxu1 %v5712_v0 }
  0x7d   :  { %2907 = vmatprep.subr.bf16.mxu1 %v5720_v2 }
  0x7f   :  { %2995 = vmatpush1.bf16.msra.mxu0 %v5643_v41 }
  0x80   :  { %2996 = vmatprep.subr.bf16.mxu0 %v5651_v43  ;;  %2908 = vmatpush2.bf16.msra.mxu1 %v5718_v47 }
  0x81   :  { %2909 = vmatprep.subr.bf16.mxu1 %v5726_v49 }
  0x82   :  { %905 = vmatmul.mubr.bf16.gmra.mxu0 %v6389_v10  ;;  %v5724_v10 = vld [vmem:[%s8825_s3 + $0x180] ss:$24 sps:$4 sm:$0xff]  }
  0x83   :  { %4939 = vmatprep.mubr.msk.bf16.mxu0 %vm611_vm0, %v6394_v12  ;;  %2997 = vmatpush1.bf16.msra.mxu0 %v5649_v45  ;;  %v5661_v12 = vld [vmem:[%s8825_s3 + $0x390] ss:$24 sps:$4 sm:$0xff]  }
  0x84   :  { %2998 = vmatprep.subr.bf16.mxu0 %v5657_v46  ;;  %2910 = vmatpush2.bf16.msra.mxu1 %v5724_v10 }
  0x85   :  { %3105 = vmatprep.subr.bf16.mxu1 %v5732_v53 }
  0x87   :  { %2999 = vmatpush1.bf16.msra.mxu0 %v5655_v48 }
  0x88   :  { %3000 = vmatprep.subr.bf16.mxu0 %v5663_v51 }
  0x8a   :  { %915 = vmatmul.mubr.bf16.gmra.mxu0 %v6432_v23  ;;  %v5681_v23 = vld [vmem:[%s8825_s3 + $0x304] ss:$24 sps:$4 sm:$0xff]  }
  0x8b   :  { %4940 = vmatprep.mubr.msk.bf16.mxu0 %vm611_vm0, %v6437_v25  ;;  %3001 = vmatpush1.bf16.msra.mxu0 %v5661_v12  ;;  %v5679_v25 = vld [vmem:[%s8825_s3 + $0x300] ss:$24 sps:$4 sm:$0xff]  }
  0x8c   :  { %3002 = vmatprep.subr.bf16.mxu0 %v5669_v54 }
  0x8f   :  { %3003 = vmatpush1.bf16.msra.mxu0 %v5667_v55 }
  0x90   :  { %3004 = vmatprep.subr.bf16.mxu0 %v5675_v56  ;;  %v5730_v56 = vld [vmem:[%s8825_s3 + $0x750] ss:$24 sps:$4 sm:$0xff]  }
  0x92   :  { %925 = vmatmul.mubr.bf16.gmra.mxu0 %v6475_v36  ;;  %v5693_v36 = vld [vmem:[%s8825_s3 + $0x5a4] ss:$24 sps:$4 sm:$0xff]  }
  0x93   :  { %4941 = vmatprep.mubr.msk.bf16.mxu0 %vm611_vm0, %v6480_v38  ;;  %3005 = vmatpush1.bf16.msra.mxu0 %v5673_v57  ;;  %v5691_v38 = vld [vmem:[%s8825_s3 + $0x5a0] ss:$24 sps:$4 sm:$0xff]  }
  0x94   :  { %3006 = vmatprep.subr.bf16.mxu0 %v5681_v23  ;;  %v5733_v57 = vld [vmem:[%s8825_s3 + $0x158] ss:$24 sps:$4 sm:$0xff]  }
  0x97   :  { %3007 = vmatpush1.bf16.msra.mxu0 %v5679_v25 }
  0x98   :  { %3008 = vmatprep.subr.bf16.mxu0 %v5687_v58 }
  0x9a   :  { %935 = vmatmul.mubr.bf16.gmra.mxu0 %v6518_v50  ;;  %v5705_v50 = vld [vmem:[%s8825_s3 + $0x544] ss:$24 sps:$4 sm:$0xff]  }
  0x9b   :  { %4942 = vmatprep.mubr.msk.bf16.mxu0 %vm611_vm0, %v6523_v52  ;;  %3009 = vmatpush2.bf16.msra.mxu0 %v5685_v59  ;;  %v5703_v52 = vld [vmem:[%s8825_s3 + $0x540] ss:$24 sps:$4 sm:$0xff]  }
  0x9c   :  { %3010 = vmatprep.subr.bf16.mxu0 %v5693_v36  ;;  %v5738_v36 = vld [vmem:[%s8825_s3 + $0x724] ss:$24 sps:$4 sm:$0xff]  }
  0x9f   :  { %3011 = vmatpush2.bf16.msra.mxu0 %v5691_v38  ;;  %v5741_v38 = vld [vmem:[%s8825_s3 + $0x12c] ss:$24 sps:$4 sm:$0xff]  }
  0xa0   :  { %3012 = vmatprep.subr.bf16.mxu0 %v5699_v60 }
  0xa2   :  { %945 = vmatmul.mubr.bf16.gmra.mxu0 %v6561_v63  ;;  %v5717_v63 = vld [vmem:[%s8825_s3 + $0x4e4] ss:$24 sps:$4 sm:$0xff]  }
  0xa3   :  { %4943 = vmatprep.mubr.msk.bf16.mxu0 %vm611_vm0, %v6566_v3  ;;  %3013 = vmatpush2.bf16.msra.mxu0 %v5697_v61  ;;  %v5715_v3 = vld [vmem:[%s8825_s3 + $0x4e0] ss:$24 sps:$4 sm:$0xff]  }
  0xa4   :  { %3014 = vmatprep.subr.bf16.mxu0 %v5705_v50 }
  0xa7   :  { %3015 = vmatpush2.bf16.msra.mxu0 %v5703_v52 }
  0xa8   :  { %3016 = vmatprep.subr.bf16.mxu0 %v5711_v62 }
  0xaa   :  { %955 = vmatmul.mubr.bf16.gmra.mxu0 %v6607_v17  ;;  %v8837_v17 = vsub.s32 0, %v6811_v11 }
  0xab   :  { %4944 = vmatprep.mubr.msk.bf16.mxu0 %vm611_vm0, %v6615_v20  ;;  %3017 = vmatpush2.bf16.msra.mxu0 %v5709_v1 }
  0xac   :  { %3018 = vmatprep.subr.bf16.mxu0 %v5717_v63  ;;  %v6840_v24 = vrot.slane %v6818_v15, %v8837_v17  ;;  %v5898_v17 = vld [vmem:[%s8825_s3 + $0x518] ss:$24 sps:$4 sm:$0xff]  }
  0xaf   :  { %3019 = vmatpush2.bf16.msra.mxu0 %v5715_v3 }
  0xb0   :  { %3020 = vmatprep.subr.bf16.mxu0 %v5723_v4 }
  0xb2   :  { %965 = vmatmul.mubr.bf16.gmra.mxu0 %v6650_v32 }
  0xb3   :  { %3021 = vmatpush2.bf16.msra.mxu0 %v5721_v5 }
  0xb4   :  { %3022 = vmatprep.subr.bf16.mxu0 %v5729_v6  ;;  %v5736_v6 = vld [vmem:[%s8825_s3 + $0x720] ss:$24 sps:$4 sm:$0xff]  }
  0xb7   :  { %3023 = vmatpush2.bf16.msra.mxu0 %v5727_v7  ;;  %v5739_v7 = vld [vmem:[%s8825_s3 + $0x128] ss:$24 sps:$4 sm:$0xff]  }
  0xb8   :  { %3218 = vmatprep.subr.bf16.mxu0 %v5735_v8 }
  0xfa   :  { %v670_v20 = vpop.f32.mrf.mxu0 }
  0xfb   :  { %v783_v21 = vpop.f32.mrf.mxu1  ;;  %v671_v35 = vadd.f32 %v670_v20, %v6840_v24 }
  0xfc   :  { %v784_v26 = vadd.f32 %v783_v21, %v6825_v18  ;;  %v672_v27 = vpop.f32.mrf.mxu0 }
  0xfd   :  { %v785_v28 = vpop.f32.mrf.mxu1  ;;  %v673_v32 = vadd.f32 %v672_v27, %v6835_v22  ;;  %v975_v49 = vmax.f32 %v671_v35, 0.0  ;;  %v5744_v27 = vld [vmem:[%s8825_s3 + $0x6f4] ss:$24 sps:$4 sm:$0xff]  }
  0xfe   :  { %v786_v29 = vadd.f32 %v785_v28, %v6830_v19  ;;  %v674_v30 = vpop.f32.mrf.mxu0  ;;  %v977_v37 = vmax.f32 %v784_v26, 0.0  ;;  %v5747_v28 = vld [vmem:[%s8825_s3 + $0xfc] ss:$24 sps:$4 sm:$0xff]  }
  0xff   :  { %v787_v31 = vpop.f32.mrf.mxu1  ;;  %v675_v33 = vadd.f32 %v674_v30, %v6840_v24  ;;  %v976_v46 = vmax.f32 %v673_v32, 0.0 }
 0x100   :  { %v788_v34 = vadd.f32 %v787_v31, %v6825_v18  ;;  %v676_v39 = vpop.f32.mrf.mxu0  ;;  %v978_v44 = vmax.f32 %v786_v29, 0.0 }
 0x101   :  { %v789_v40 = vpop.f32.mrf.mxu1  ;;  %v677_v42 = vadd.f32 %v676_v39, %v6835_v22  ;;  %v981_v0 = vmax.f32 %v675_v33, 0.0 }
 0x102   :  { %v983_v41 = vmax.f32 %v788_v34, 0.0  ;;  %v790_v43 = vadd.f32 %v789_v40, %v6830_v19  ;;  %v680_v45 = vpop.f32.mrf.mxu0 }
 0x103   :  { %v793_v2 = vpop.f32.mrf.mxu1  ;;  %v982_v47 = vmax.f32 %v677_v42, 0.0  ;;  %v6863_v23 = vpack.c.bf16 %v981_v0, %v975_v49  ;;  %v681_v52 = vadd.f32 %v680_v45, %v6840_v24  ;;  %v5745_v45 = vld [vmem:[%s8825_s3 + $0xf8] ss:$24 sps:$4 sm:$0xff]   ;;  %v5753_v49 = vld [vmem:[%s8825_s3 + $0xcc] ss:$24 sps:$4 sm:$0xff]  }
 0x104   :  { %v984_v48 = vmax.f32 %v790_v43, 0.0  ;;  %v6850_v51 = vpack.c.bf16 %v983_v41, %v977_v37  ;;  %v682_v10 = vpop.f32.mrf.mxu0  ;;  %v794_v53 = vadd.f32 %v793_v2, %v6825_v18  ;;  %v5750_v2 = vld [vmem:[%s8825_s3 + $0x6c4] ss:$24 sps:$4 sm:$0xff]  }
 0x105   :  { %v795_v12 = vpop.f32.mrf.mxu1  ;;  %v6853_v54 = vpack.c.bf16 %v982_v47, %v976_v46  ;;  %v683_v60 = vadd.f32 %v682_v10, %v6835_v22  ;;  %v987_v32 = vmax.f32 %v681_v52, 0.0  ;;  %v5756_v52 = vld [vmem:[%s8825_s3 + $0x694] ss:$24 sps:$4 sm:$0xff]  }
 0x106   :  { %v6855_v55 = vpack.c.bf16 %v984_v48, %v978_v44  ;;  %v796_v25 = vadd.f32 %v795_v12, %v6830_v19  ;;  %v684_v58 = vpop.f32.mrf.mxu0  ;;  %v989_v63 = vmax.f32 %v794_v53, 0.0  ;;  %v5742_v44 = vld [vmem:[%s8825_s3 + $0x6f0] ss:$24 sps:$4 sm:$0xff]  }
 0x107   :  { %v797_v59 = vpop.f32.mrf.mxu1  ;;  %v685_v61 = vadd.f32 %v684_v58, %v6840_v24  ;;  %2911 = vmatprep.mubr.bf16.mxu1 %v6853_v54  ;;  %v988_v29 = vmax.f32 %v683_v60, 0.0 }
 0x108   :  { %v798_v50 = vadd.f32 %v797_v59, %v6825_v18  ;;  %3024 = vmatprep.mubr.bf16.mxu0 %v6855_v55  ;;  %v686_v62 = vpop.f32.mrf.mxu0  ;;  %2912 = vmatmul.mubr.bf16.vlgmr.msra.gmra.mxu1 %v6863_v23  ;;  %v990_v8 = vmax.f32 %v796_v25, 0.0 }
 0x109   :  { %v799_v1 = vpop.f32.mrf.mxu1  ;;  %3025 = vmatmul.mubr.bf16.vlgmr.msra.gmra.mxu0 %v6850_v51  ;;  %v687_v4 = vadd.f32 %v686_v62, %v6835_v22  ;;  %3106 = vmatpush1.bf16.msra.mxu1 %v5730_v56  ;;  %v993_v20 = vmax.f32 %v685_v61, 0.0 }
 0x10a   :  { %v995_v3 = vmax.f32 %v798_v50, 0.0  ;;  %v800_v5 = vadd.f32 %v799_v1, %v6830_v19  ;;  %3219 = vmatpush1.bf16.msra.mxu0 %v5733_v57  ;;  %v690_v21 = vpop.f32.mrf.mxu0  ;;  %3107 = vmatprep.subr.bf16.mxu1 %v5738_v36  ;;  %v5748_v36 = vld [vmem:[%s8825_s3 + $0x6c0] ss:$24 sps:$4 sm:$0xff]  }
 0x10b   :  { %v803_v26 = vpop.f32.mrf.mxu1  ;;  %3220 = vmatprep.subr.bf16.mxu0 %v5741_v38  ;;  %v994_v30 = vmax.f32 %v687_v4, 0.0  ;;  %v6903_v41 = vpack.c.bf16 %v993_v20, %v987_v32  ;;  %v691_v10 = vadd.f32 %v690_v21, %v6840_v24  ;;  %v5751_v50 = vld [vmem:[%s8825_s3 + $0xc8] ss:$24 sps:$4 sm:$0xff]   ;;  %v5762_v32 = vld [vmem:[%s8825_s3 + $0x664] ss:$24 sps:$4 sm:$0xff]  }
 0x10c   :  { %v996_v31 = vmax.f32 %v800_v5, 0.0  ;;  %v804_v33 = vadd.f32 %v803_v26, %v6825_v18  ;;  %v692_v34 = vpop.f32.mrf.mxu0  ;;  %v6895_v37 = vpack.c.bf16 %v995_v3, %v989_v63 }
 0x10d   :  { %v805_v35 = vpop.f32.mrf.mxu1  ;;  %3108 = vmatpush1.bf16.msra.mxu1 %v5736_v6  ;;  %v6898_v40 = vpack.c.bf16 %v994_v30, %v988_v29  ;;  %v693_v46 = vadd.f32 %v692_v34, %v6835_v22  ;;  %v999_v3 = vmax.f32 %v691_v10, 0.0 }
 0x10e   :  { %v806_v39 = vadd.f32 %v805_v35, %v6830_v19  ;;  %3221 = vmatpush1.bf16.msra.mxu0 %v5739_v7  ;;  %v694_v42 = vpop.f32.mrf.mxu0  ;;  %v6905_v0 = vpack.c.bf16 %v996_v31, %v990_v8  ;;  %3109 = vmatprep.subr.bf16.mxu1 %v5744_v27  ;;  %v1001_v12 = vmax.f32 %v804_v33, 0.0  ;;  %v5759_v7 = vld [vmem:[%s8825_s3 + $0x9c] ss:$24 sps:$4 sm:$0xff]   ;;  %v5754_v27 = vld [vmem:[%s8825_s3 + $0x690] ss:$24 sps:$4 sm:$0xff]  }
 0x10f   :  { %v807_v43 = vpop.f32.mrf.mxu1  ;;  %3222 = vmatprep.subr.bf16.mxu0 %v5747_v28  ;;  %v695_v47 = vadd.f32 %v694_v42, %v6840_v24  ;;  %2921 = vmatprep.mubr.bf16.mxu1 %v6898_v40  ;;  %v1000_v62 = vmax.f32 %v693_v46, 0.0  ;;  %v5757_v31 = vld [vmem:[%s8825_s3 + $0x98] ss:$24 sps:$4 sm:$0xff]  }
 0x110   :  { %v808_v48 = vadd.f32 %v807_v43, %v6825_v18  ;;  %3034 = vmatprep.mubr.bf16.mxu0 %v6905_v0  ;;  %v696_v53 = vpop.f32.mrf.mxu0  ;;  %2922 = vmatmul.mubr.bf16.gmra.mxu1 %v6903_v41  ;;  %v1002_v57 = vmax.f32 %v806_v39, 0.0  ;;  %v5765_v39 = vld [vmem:[%s8825_s3 + $0x6c] ss:$24 sps:$4 sm:$0xff]  }
 0x111   :  { %v809_v56 = vpop.f32.mrf.mxu1  ;;  %v697_v58 = vadd.f32 %v696_v53, %v6835_v22  ;;  %3035 = vmatmul.mubr.bf16.gmra.mxu0 %v6895_v37  ;;  %3110 = vmatpush1.bf16.msra.mxu1 %v5742_v44  ;;  %v1005_v38 = vmax.f32 %v695_v47, 0.0 }
 0x112   :  { %v1007_v25 = vmax.f32 %v808_v48, 0.0  ;;  %v810_v59 = vadd.f32 %v809_v56, %v6830_v19  ;;  %3223 = vmatpush1.bf16.msra.mxu0 %v5745_v45  ;;  %v700_v60 = vpop.f32.mrf.mxu0  ;;  %3111 = vmatprep.subr.bf16.mxu1 %v5750_v2  ;;  %v5763_v56 = vld [vmem:[%s8825_s3 + $0x68] ss:$24 sps:$4 sm:$0xff]  }
 0x113   :  { %v813_v61 = vpop.f32.mrf.mxu1  ;;  %v1006_v1 = vmax.f32 %v697_v58, 0.0  ;;  %3224 = vmatprep.subr.bf16.mxu0 %v5753_v49  ;;  %v6949_v28 = vpack.c.bf16 %v1005_v38, %v999_v3  ;;  %v701_v44 = vadd.f32 %v700_v60, %v6840_v24  ;;  %v5760_v49 = vld [vmem:[%s8825_s3 + $0x660] ss:$24 sps:$4 sm:$0xff]   ;;  %v5766_v3 = vld [vmem:[%s8825_s3 + $0x630] ss:$24 sps:$4 sm:$0xff]  }
 0x114   :  { %v1008_v63 = vmax.f32 %v810_v59, 0.0  ;;  %v814_v4 = vadd.f32 %v813_v61, %v6825_v18  ;;  %v702_v5 = vpop.f32.mrf.mxu0  ;;  %v6939_v8 = vpack.c.bf16 %v1007_v25, %v1001_v12 }
 0x115   :  { %v815_v6 = vpop.f32.mrf.mxu1  ;;  %3112 = vmatpush1.bf16.msra.mxu1 %v5748_v36  ;;  %v6942_v21 = vpack.c.bf16 %v1006_v1, %v1000_v62  ;;  %v703_v33 = vadd.f32 %v702_v5, %v6835_v22  ;;  %v1011_v36 = vmax.f32 %v701_v44, 0.0 }
 0x116   :  { %v816_v20 = vadd.f32 %v815_v6, %v6830_v19  ;;  %v6944_v26 = vpack.c.bf16 %v1008_v63, %v1002_v57  ;;  %3225 = vmatpush1.bf16.msra.mxu0 %v5751_v50  ;;  %v704_v29 = vpop.f32.mrf.mxu0  ;;  %3113 = vmatprep.subr.bf16.mxu1 %v5756_v52  ;;  %v1013_v42 = vmax.f32 %v814_v4, 0.0  ;;  %v5768_v57 = vld [vmem:[%s8825_s3 + $0x634] ss:$24 sps:$4 sm:$0xff]  }
 0x117   :  { %v817_v30 = vpop.f32.mrf.mxu1  ;;  %v705_v34 = vadd.f32 %v704_v29, %v6840_v24  ;;  %2931 = vmatprep.mubr.bf16.mxu1 %v6942_v21  ;;  %3226 = vmatprep.subr.bf16.mxu0 %v5759_v7  ;;  %v1012_v25 = vmax.f32 %v703_v33, 0.0  ;;  %v5771_v50 = vld [vmem:[%s8825_s3 + $0x3c] ss:$24 sps:$4 sm:$0xff]   ;;  %v5769_v7 = vld [vmem:[%s8825_s3 + $0x38] ss:$24 sps:$4 sm:$0xff]  }
 0x118   :  { %v818_v35 = vadd.f32 %v817_v30, %v6825_v18  ;;  %3044 = vmatprep.mubr.bf16.mxu0 %v6944_v26  ;;  %v706_v43 = vpop.f32.mrf.mxu0  ;;  %2932 = vmatmul.mubr.bf16.gmra.mxu1 %v6949_v28  ;;  %v1014_v2 = vmax.f32 %v816_v20, 0.0  ;;  %v5774_v20 = vld [vmem:[%s8825_s3 + $0x604] ss:$24 sps:$4 sm:$0xff]  }
 0x119   :  { %v819_v45 = vpop.f32.mrf.mxu1  ;;  %v707_v47 = vadd.f32 %v706_v43, %v6835_v22  ;;  %3045 = vmatmul.mubr.bf16.gmra.mxu0 %v6939_v8  ;;  %3114 = vmatpush1.bf16.msra.mxu1 %v5754_v27  ;;  %v1017_v10 = vmax.f32 %v705_v34, 0.0 }
 0x11a   :  { %v1019_v46 = vmax.f32 %v818_v35, 0.0  ;;  %v820_v48 = vadd.f32 %v819_v45, %v6830_v19  ;;  %3227 = vmatpush1.bf16.msra.mxu0 %v5757_v31  ;;  %v710_v12 = vpop.f32.mrf.mxu0  ;;  %3115 = vmatprep.subr.bf16.mxu1 %v5762_v32  ;;  %v5777_v31 = vld [vmem:[%s8825_s3 + $0xc] ss:$24 sps:$4 sm:$0xff]   ;;  %v5772_v45 = vld [vmem:[%s8825_s3 + $0x600] ss:$24 sps:$4 sm:$0xff]  }
 0x11b   :  { %v823_v53 = vpop.f32.mrf.mxu1  ;;  %v1018_v58 = vmax.f32 %v707_v47, 0.0  ;;  %3228 = vmatprep.subr.bf16.mxu0 %v5765_v39  ;;  %v6993_v4 = vpack.c.bf16 %v1017_v10, %v1011_v36  ;;  %v711_v32 = vadd.f32 %v710_v12, %v6840_v24 }
 0x11c   :  { %v1020_v59 = vmax.f32 %v820_v48, 0.0  ;;  %v824_v38 = vadd.f32 %v823_v53, %v6825_v18  ;;  %v712_v60 = vpop.f32.mrf.mxu0  ;;  %v6983_v52 = vpack.c.bf16 %v1019_v46, %v1013_v42  ;;  %v5775_v48 = vld [vmem:[%s8825_s3 + $0x8] ss:$24 sps:$4 sm:$0xff]  }
 0x11d   :  { %v825_v61 = vpop.f32.mrf.mxu1  ;;  %3116 = vmatpush1.bf16.msra.mxu1 %v5760_v49  ;;  %v6986_v1 = vpack.c.bf16 %v1018_v58, %v1012_v25  ;;  %v713_v27 = vadd.f32 %v712_v60, %v6835_v22  ;;  %v5780_v49 = vld [vmem:[%s8825_s3 + $0x8d4] ss:$24 sps:$4 sm:$0xff]  }
 0x11e   :  { %v826_v62 = vadd.f32 %v825_v61, %v6830_v19  ;;  %v6988_v63 = vpack.c.bf16 %v1020_v59, %v1014_v2  ;;  %3229 = vmatpush1.bf16.msra.mxu0 %v5763_v56  ;;  %v714_v5 = vpop.f32.mrf.mxu0  ;;  %3117 = vmatprep.subr.bf16.mxu1 %v5768_v57  ;;  %v1025_v33 = vmax.f32 %v824_v38, 0.0  ;;  %v1023_v56 = vmax.f32 %v711_v32, 0.0  ;;  %v5783_v59 = vld [vmem:[%s8825_s3 + $0x2dc] ss:$24 sps:$4 sm:$0xff]  }
 0x11f   :  { %v827_v6 = vpop.f32.mrf.mxu1  ;;  %v715_v29 = vadd.f32 %v714_v5, %v6840_v24  ;;  %2941 = vmatprep.mubr.bf16.mxu1 %v6986_v1  ;;  %3230 = vmatprep.subr.bf16.mxu0 %v5771_v50  ;;  %v1024_v10 = vmax.f32 %v713_v27, 0.0  ;;  %v5778_v50 = vld [vmem:[%s8825_s3 + $0x8d0] ss:$24 sps:$4 sm:$0xff]  }
 0x120   :  { %v828_v30 = vadd.f32 %v827_v6, %v6825_v18  ;;  %3054 = vmatprep.mubr.bf16.mxu0 %v6988_v63  ;;  %v716_v34 = vpop.f32.mrf.mxu0  ;;  %2942 = vmatmul.mubr.bf16.gmra.mxu1 %v6993_v4  ;;  %v1026_v39 = vmax.f32 %v826_v62, 0.0  ;;  %v5781_v6 = vld [vmem:[%s8825_s3 + $0x2d8] ss:$24 sps:$4 sm:$0xff]  }
 0x121   :  { %v829_v35 = vpop.f32.mrf.mxu1  ;;  %v717_v42 = vadd.f32 %v716_v34, %v6835_v22  ;;  %3055 = vmatmul.mubr.bf16.gmra.mxu0 %v6983_v52  ;;  %3118 = vmatpush1.bf16.msra.mxu1 %v5766_v3  ;;  %v1029_v2 = vmax.f32 %v715_v29, 0.0 }
 0x122   :  { %v1031_v44 = vmax.f32 %v828_v30, 0.0  ;;  %v830_v43 = vadd.f32 %v829_v35, %v6830_v19  ;;  %3231 = vmatpush1.bf16.msra.mxu0 %v5769_v7  ;;  %v720_v46 = vpop.f32.mrf.mxu0  ;;  %3119 = vmatprep.subr.bf16.mxu1 %v5774_v20  ;;  %v5786_v7 = vld [vmem:[%s8825_s3 + $0x8a4] ss:$24 sps:$4 sm:$0xff]  }
 0x123   :  { %v833_v47 = vpop.f32.mrf.mxu1  ;;  %v1030_v12 = vmax.f32 %v717_v42, 0.0  ;;  %3232 = vmatprep.subr.bf16.mxu0 %v5777_v31  ;;  %v7037_v62 = vpack.c.bf16 %v1029_v2, %v1023_v56  ;;  %v5789_v30 = vld [vmem:[%s8825_s3 + $0x2ac] ss:$24 sps:$4 sm:$0xff]   ;;  %v721_v31 = vadd.f32 %v720_v46, %v6840_v24 }
 0x124   :  { %v1032_v53 = vmax.f32 %v830_v43, 0.0  ;;  %v834_v57 = vadd.f32 %v833_v47, %v6825_v18  ;;  %v722_v25 = vpop.f32.mrf.mxu0  ;;  %v7027_v36 = vpack.c.bf16 %v1031_v44, %v1025_v33  ;;  %v5784_v43 = vld [vmem:[%s8825_s3 + $0x8a0] ss:$24 sps:$4 sm:$0xff]  }
 0x125   :  { %v835_v58 = vpop.f32.mrf.mxu1  ;;  %3120 = vmatpush1.bf16.msra.mxu1 %v5772_v45  ;;  %v7030_v60 = vpack.c.bf16 %v1030_v12, %v1024_v10  ;;  %v723_v20 = vadd.f32 %v722_v25, %v6835_v22  ;;  %v5787_v47 = vld [vmem:[%s8825_s3 + $0x2a8] ss:$24 sps:$4 sm:$0xff]  }
 0x126   :  { %v836_v38 = vadd.f32 %v835_v58, %v6830_v19  ;;  %v7032_v61 = vpack.c.bf16 %v1032_v53, %v1026_v39  ;;  %3233 = vmatpush1.bf16.msra.mxu0 %v5775_v48  ;;  %v724_v3 = vpop.f32.mrf.mxu0  ;;  %3121 = vmatprep.subr.bf16.mxu1 %v5780_v49  ;;  %v1037_v32 = vmax.f32 %v834_v57, 0.0  ;;  %v5792_v48 = vld [vmem:[%s8825_s3 + $0x874] ss:$24 sps:$4 sm:$0xff]   ;;  %v1035_v53 = vmax.f32 %v721_v31, 0.0 }
 0x127   :  { %v837_v5 = vpop.f32.mrf.mxu1  ;;  %v725_v27 = vadd.f32 %v724_v3, %v6840_v24  ;;  %2951 = vmatprep.mubr.bf16.mxu1 %v7030_v60  ;;  %3234 = vmatprep.subr.bf16.mxu0 %v5783_v59  ;;  %v1036_v49 = vmax.f32 %v723_v20, 0.0  ;;  %v5795_v58 = vld [vmem:[%s8825_s3 + $0x27c] ss:$24 sps:$4 sm:$0xff]  }
 0x128   :  { %v838_v29 = vadd.f32 %v837_v5, %v6825_v18  ;;  %3064 = vmatprep.mubr.bf16.mxu0 %v7032_v61  ;;  %v726_v33 = vpop.f32.mrf.mxu0  ;;  %2952 = vmatmul.mubr.bf16.gmra.mxu1 %v7037_v62  ;;  %v1038_v35 = vmax.f32 %v836_v38, 0.0  ;;  %v5790_v5 = vld [vmem:[%s8825_s3 + $0x870] ss:$24 sps:$4 sm:$0xff]  }
 0x129   :  { %v839_v34 = vpop.f32.mrf.mxu1  ;;  %v727_v44 = vadd.f32 %v726_v33, %v6835_v22  ;;  %3065 = vmatmul.mubr.bf16.gmra.mxu0 %v7027_v36  ;;  %3122 = vmatpush2.bf16.msra.mxu1 %v5778_v50  ;;  %v1041_v45 = vmax.f32 %v725_v27, 0.0  ;;  %v5793_v27 = vld [vmem:[%s8825_s3 + $0x278] ss:$24 sps:$4 sm:$0xff]   ;;  %v5801_v33 = vld [vmem:[%s8825_s3 + $0x24c] ss:$24 sps:$4 sm:$0xff]  }
 0x12a   :  { %v1043_v39 = vmax.f32 %v838_v29, 0.0  ;;  %v840_v42 = vadd.f32 %v839_v34, %v6830_v19  ;;  %3235 = vmatpush2.bf16.msra.mxu0 %v5781_v6  ;;  %v730_v2 = vpop.f32.mrf.mxu0  ;;  %3123 = vmatprep.subr.bf16.mxu1 %v5786_v7  ;;  %v5798_v29 = vld [vmem:[%s8825_s3 + $0x844] ss:$24 sps:$4 sm:$0xff]  }
 0x12b   :  { %v843_v46 = vpop.f32.mrf.mxu1  ;;  %v1042_v10 = vmax.f32 %v727_v44, 0.0  ;;  %3236 = vmatprep.subr.bf16.mxu0 %v5789_v30  ;;  %v7081_v6 = vpack.c.bf16 %v1041_v45, %v1035_v53  ;;  %v731_v34 = vadd.f32 %v730_v2, %v6840_v24 }
 0x12c   :  { %v1044_v12 = vmax.f32 %v840_v42, 0.0  ;;  %v844_v56 = vadd.f32 %v843_v46, %v6825_v18  ;;  %v732_v57 = vpop.f32.mrf.mxu0  ;;  %v7071_v59 = vpack.c.bf16 %v1043_v39, %v1037_v32 }
 0x12d   :  { %v845_v25 = vpop.f32.mrf.mxu1  ;;  %3124 = vmatpush2.bf16.msra.mxu1 %v5784_v43  ;;  %v7074_v50 = vpack.c.bf16 %v1042_v10, %v1036_v49  ;;  %v733_v30 = vadd.f32 %v732_v57, %v6835_v22  ;;  %v5799_v10 = vld [vmem:[%s8825_s3 + $0x248] ss:$24 sps:$4 sm:$0xff]  }
 0x12e   :  { %v846_v38 = vadd.f32 %v845_v25, %v6830_v19  ;;  %v7076_v3 = vpack.c.bf16 %v1044_v12, %v1038_v35  ;;  %3237 = vmatpush2.bf16.msra.mxu0 %v5787_v47  ;;  %v734_v7 = vpop.f32.mrf.mxu0  ;;  %3125 = vmatprep.subr.bf16.mxu1 %v5792_v48  ;;  %v1049_v35 = vmax.f32 %v844_v56, 0.0  ;;  %v5796_v47 = vld [vmem:[%s8825_s3 + $0x840] ss:$24 sps:$4 sm:$0xff]   ;;  %v5804_v12 = vld [vmem:[%s8825_s3 + $0x814] ss:$24 sps:$4 sm:$0xff]   ;;  %v1047_v25 = vmax.f32 %v731_v34, 0.0 }
 0x12f   :  { %v847_v20 = vpop.f32.mrf.mxu1  ;;  %v735_v31 = vadd.f32 %v734_v7, %v6840_v24  ;;  %2961 = vmatprep.mubr.bf16.mxu1 %v7074_v50  ;;  %3238 = vmatprep.subr.bf16.mxu0 %v5795_v58  ;;  %v1048_v53 = vmax.f32 %v733_v30, 0.0  ;;  %v5807_v7 = vld [vmem:[%s8825_s3 + $0x21c] ss:$24 sps:$4 sm:$0xff]  }
 0x130   :  { %v848_v32 = vadd.f32 %v847_v20, %v6825_v18  ;;  %3074 = vmatprep.mubr.bf16.mxu0 %v7076_v3  ;;  %v736_v39 = vpop.f32.mrf.mxu0  ;;  %2962 = vmatmul.mubr.bf16.gmra.mxu1 %v7081_v6  ;;  %v1050_v42 = vmax.f32 %v846_v38, 0.0 }
 0x131   :  { %v849_v44 = vpop.f32.mrf.mxu1  ;;  %v737_v45 = vadd.f32 %v736_v39, %v6835_v22  ;;  %3075 = vmatmul.mubr.bf16.gmra.mxu0 %v7071_v59  ;;  %3126 = vmatpush2.bf16.msra.mxu1 %v5790_v5  ;;  %v1053_v2 = vmax.f32 %v735_v31, 0.0  ;;  %v5802_v31 = vld [vmem:[%s8825_s3 + $0x810] ss:$24 sps:$4 sm:$0xff]   ;;  %v5810_v39 = vld [vmem:[%s8825_s3 + $0x7e4] ss:$24 sps:$4 sm:$0xff]  }
 0x132   :  { %v1055_v43 = vmax.f32 %v848_v32, 0.0  ;;  %v850_v46 = vadd.f32 %v849_v44, %v6830_v19  ;;  %3239 = vmatpush2.bf16.msra.mxu0 %v5793_v27  ;;  %v740_v48 = vpop.f32.mrf.mxu0  ;;  %3127 = vmatprep.subr.bf16.mxu1 %v5798_v29 }
 0x133   :  { %v853_v49 = vpop.f32.mrf.mxu1  ;;  %v1054_v56 = vmax.f32 %v737_v45, 0.0  ;;  %3240 = vmatprep.subr.bf16.mxu0 %v5801_v33  ;;  %v7125_v32 = vpack.c.bf16 %v1053_v2, %v1047_v25  ;;  %v8833_v45 = vsub.s32 5, %v6811_v11 }
 0x134   :  { %v1056_v57 = vmax.f32 %v850_v46, 0.0  ;;  %v854_v58 = vadd.f32 %v853_v49, %v6825_v18  ;;  %v742_v38 = vpop.f32.mrf.mxu0  ;;  %v7115_v20 = vpack.c.bf16 %v1055_v43, %v1049_v35  ;;  %v5805_v35 = vld [vmem:[%s8825_s3 + $0x218] ss:$24 sps:$4 sm:$0xff]   ;;  %v5813_v46 = vld [vmem:[%s8825_s3 + $0x1ec] ss:$24 sps:$4 sm:$0xff]  }
 0x135   :  { %v855_v5 = vpop.f32.mrf.mxu1  ;;  %3128 = vmatpush2.bf16.msra.mxu1 %v5796_v47  ;;  %v7118_v29 = vpack.c.bf16 %v1054_v56, %v1048_v53  ;;  %8862 = vst [vmem:[#allocation3_spill] sm:$0xff] %v7125_v32  ;;  %v743_v44 = vadd.f32 %v742_v38, %v6835_v22  ;;  %v741_v47 = vadd.f32 %v740_v48, %v6840_v24 }
 0x136   :  { %v856_v27 = vadd.f32 %v855_v5, %v6830_v19  ;;  %v7120_v30 = vpack.c.bf16 %v1056_v57, %v1050_v42  ;;  %3241 = vmatpush2.bf16.msra.mxu0 %v5799_v10  ;;  %v744_v33 = vpop.f32.mrf.mxu0  ;;  %3129 = vmatprep.subr.bf16.mxu1 %v5804_v12  ;;  %v1061_v2 = vmax.f32 %v854_v58, 0.0  ;;  %v5811_v58 = vld [vmem:[%s8825_s3 + $0x1e8] ss:$24 sps:$4 sm:$0xff]  }
 0x137   :  { %v857_v34 = vpop.f32.mrf.mxu1  ;;  %v745_v42 = vadd.f32 %v744_v33, %v6840_v24  ;;  %2971 = vmatprep.mubr.bf16.mxu1 %v7118_v29  ;;  %3242 = vmatprep.subr.bf16.mxu0 %v5807_v7  ;;  %v5808_v24 = vld [vmem:[%s8825_s3 + $0x7e0] ss:$24 sps:$4 sm:$0xff]   ;;  %v7160_v7 = vrot.slane %v6818_v15, %v8833_v45 }
 0x138   :  { %v858_v43 = vadd.f32 %v857_v34, %v6825_v18  ;;  %3084 = vmatprep.mubr.bf16.mxu0 %v7120_v30  ;;  %v746_v49 = vpop.f32.mrf.mxu0  ;;  %2972 = vmatmul.mubr.bf16.gmra.mxu1 %v7125_v32  ;;  %v8832_v18 = vsub.s32 4, %v6811_v11  ;;  %v1062_v12 = vmax.f32 %v856_v27, 0.0  ;;  %v1059_v27 = vmax.f32 %v741_v47, 0.0  ;;  %v5819_v34 = vld [vmem:[%s8825_s3 + $0x1bc] ss:$24 sps:$4 sm:$0xff]  }
 0x139   :  { %v859_v10 = vpop.f32.mrf.mxu1  ;;  %v747_v56 = vadd.f32 %v746_v49, %v6835_v22  ;;  %3085 = vmatmul.mubr.bf16.gmra.mxu0 %v7115_v20  ;;  %3130 = vmatpush2.bf16.msra.mxu1 %v5802_v31  ;;  %v1065_v48 = vmax.f32 %v745_v42, 0.0  ;;  %v5816_v22 = vld [vmem:[%s8825_s3 + $0x7b4] ss:$24 sps:$4 sm:$0xff]   ;;  %v5814_v42 = vld [vmem:[%s8825_s3 + $0x7b0] ss:$24 sps:$4 sm:$0xff]  }
 0x13a   :  { %v1067_v53 = vmax.f32 %v858_v43, 0.0  ;;  %v860_v57 = vadd.f32 %v859_v10, %v6830_v19  ;;  %3243 = vmatpush2.bf16.msra.mxu0 %v5805_v35  ;;  %v896_v25 = vpop.f32.mrf.mxu0  ;;  %3131 = vmatprep.subr.bf16.mxu1 %v5810_v39  ;;  %v1060_v19 = vmax.f32 %v743_v44, 0.0  ;;  %v7165_v31 = vrot.slane %v6818_v15, %v8832_v18  ;;  %v5822_v49 = vld [vmem:[%s8825_s3 + $0x784] ss:$24 sps:$4 sm:$0xff]   ;;  %v5874_v45 = vld [vmem:[%s8825_s3 + $0x5d8] ss:$24 sps:$4 sm:$0xff]  }
 0x13b   :  { %v1066_v38 = vmax.f32 %v747_v56, 0.0  ;;  %3244 = vmatprep.subr.bf16.mxu0 %v5813_v46  ;;  %v7179_v43 = vpack.c.bf16 %v1065_v48, %v1059_v27  ;;  %v5817_v46 = vld [vmem:[%s8825_s3 + $0x1b8] ss:$24 sps:$4 sm:$0xff]   ;;  %v5825_v10 = vld [vmem:[%s8825_s3 + $0x18c] ss:$24 sps:$4 sm:$0xff]  }
 0x13c   :  { %v1068_v5 = vmax.f32 %v860_v57, 0.0  ;;  %v898_v33 = vpop.f32.mrf.mxu0  ;;  %v7170_v35 = vpack.c.bf16 %v1067_v53, %v1061_v2  ;;  %v5820_v57 = vld [vmem:[%s8825_s3 + $0x780] ss:$24 sps:$4 sm:$0xff]  }
 0x13d   :  { %3132 = vmatpush2.bf16.msra.mxu1 %v5808_v24  ;;  %v7172_v39 = vpack.c.bf16 %v1066_v38, %v1060_v19  ;;  %v899_v47 = vadd.f32 %v898_v33, %v7160_v7  ;;  %v5831_v38 = vld [vmem:[%s8825_s3 + $0x75c] ss:$24 sps:$4 sm:$0xff]  }
 0x13e   :  { %v7174_v44 = vpack.c.bf16 %v1068_v5, %v1062_v12  ;;  %3245 = vmatpush2.bf16.msra.mxu0 %v5811_v58  ;;  %v900_v15 = vpop.f32.mrf.mxu0  ;;  %3133 = vmatprep.subr.bf16.mxu1 %v5816_v22  ;;  %v897_v12 = vadd.f32 %v896_v25, %v7165_v31  ;;  %v5823_v25 = vld [vmem:[%s8825_s3 + $0x188] ss:$24 sps:$4 sm:$0xff]   ;;  %v5828_v58 = vld [vmem:[%s8825_s3 + $0x45c] ss:$24 sps:$4 sm:$0xff]  }
 0x13f   :  { %v901_v2 = vadd.f32 %v900_v15, %v7165_v31  ;;  %2981 = vmatprep.mubr.bf16.mxu1 %v7172_v39  ;;  %3246 = vmatprep.subr.bf16.mxu0 %v5819_v34  ;;  %v980_v22 = vmax.f32 %v899_v47, 0.0  ;;  %v5826_v34 = vld [vmem:[%s8825_s3 + $0x458] ss:$24 sps:$4 sm:$0xff]  }
 0x140   :  { %3094 = vmatprep.mubr.bf16.mxu0 %v7174_v44  ;;  %v902_v53 = vpop.f32.mrf.mxu0  ;;  %2982 = vmatmul.mubr.bf16.gmra.mxu1 %v7179_v43  ;;  %v979_v5 = vmax.f32 %v897_v12, 0.0 }
 0x141   :  { %v903_v56 = vadd.f32 %v902_v53, %v7160_v7  ;;  %3095 = vmatmul.mubr.bf16.gmra.mxu0 %v7170_v35  ;;  %3134 = vmatpush2.bf16.msra.mxu1 %v5814_v42  ;;  %v985_v24 = vmax.f32 %v901_v2, 0.0 }
 0x142   :  { %3247 = vmatpush2.bf16.msra.mxu0 %v5817_v46  ;;  %3250 = vmatprep.mubr.bf16.mxu0 %v6853_v54  ;;  %v906_v48 = vpop.f32.mrf.mxu0  ;;  %v5829_v46 = vld [vmem:[%s8825_s3 + $0x758] ss:$24 sps:$4 sm:$0xff]  }
 0x143   :  { %v986_v19 = vmax.f32 %v903_v56, 0.0  ;;  %3135 = vmatprep.subr.bf16.mxu1 %v5822_v49  ;;  %3248 = vmatprep.subr.bf16.mxu0 %v5825_v10  ;;  %v7216_v42 = vpack.c.bf16 %v985_v24, %v979_v5  ;;  %v5834_v49 = vld [vmem:[%s8825_s3 + $0x42c] ss:$24 sps:$4 sm:$0xff]   ;;  %v907_v12 = vadd.f32 %v906_v48, %v7165_v31  ;;  %v5835_v48 = vld [vmem:[%s8825_s3 + $0x728] ss:$24 sps:$4 sm:$0xff]  }
 0x144   :  { %v908_v27 = vpop.f32.mrf.mxu0  ;;  %v5837_v10 = vld [vmem:[%s8825_s3 + $0x72c] ss:$24 sps:$4 sm:$0xff]  }
 0x145   :  { %3136 = vmatpush2.bf16.msra.mxu1 %v5820_v57  ;;  %v7211_v33 = vpack.c.bf16 %v986_v19, %v980_v22  ;;  %v909_v47 = vadd.f32 %v908_v27, %v7160_v7  ;;  %v5832_v57 = vld [vmem:[%s8825_s3 + $0x428] ss:$24 sps:$4 sm:$0xff]   ;;  %v991_v5 = vmax.f32 %v907_v12, 0.0  ;;  %v5846_v12 = vld [vmem:[%s8825_s3 + $0x3cc] ss:$24 sps:$4 sm:$0xff]  }
 0x146   :  { %3249 = vmatpush2.bf16.msra.mxu0 %v5823_v25  ;;  %v910_v15 = vpop.f32.mrf.mxu0  ;;  %3331 = vmatprep.subr.bf16.mxu1 %v5828_v58  ;;  %v5840_v58 = vld [vmem:[%s8825_s3 + $0x3fc] ss:$24 sps:$4 sm:$0xff]  }
 0x147   :  { %v911_v2 = vadd.f32 %v910_v15, %v7165_v31  ;;  %3137 = vmatprep.mubr.bf16.mxu1 %v7211_v33  ;;  %3444 = vmatprep.subr.bf16.mxu0 %v5831_v38  ;;  %v992_v22 = vmax.f32 %v909_v47, 0.0  ;;  %v5843_v38 = vld [vmem:[%s8825_s3 + $0x6fc] ss:$24 sps:$4 sm:$0xff]   ;;  %v5838_v15 = vld [vmem:[%s8825_s3 + $0x3f8] ss:$24 sps:$4 sm:$0xff]  }
 0x148   :  { %v912_v53 = vpop.f32.mrf.mxu0  ;;  %3138 = vmatmul.mubr.bf16.vlgmr.msra.gmra.mxu1 %v7216_v42 }
 0x149   :  { %v913_v56 = vadd.f32 %v912_v53, %v7160_v7  ;;  %3251 = vmatmul.mubr.bf16.vlgmr.msra.gmra.mxu0 %v6863_v23  ;;  %3332 = vmatpush1.bf16.msra.mxu1 %v5826_v34  ;;  %v997_v24 = vmax.f32 %v911_v2, 0.0  ;;  %v5841_v2 = vld [vmem:[%s8825_s3 + $0x6f8] ss:$24 sps:$4 sm:$0xff]   ;;  %v5849_v53 = vld [vmem:[%s8825_s3 + $0x6cc] ss:$24 sps:$4 sm:$0xff]  }
 0x14a   :  { %3260 = vmatprep.mubr.bf16.mxu0 %v6898_v40  ;;  %3445 = vmatpush1.bf16.msra.mxu0 %v5829_v46  ;;  %v916_v25 = vpop.f32.mrf.mxu0 }
 0x14b   :  { %v998_v19 = vmax.f32 %v913_v56, 0.0  ;;  %3333 = vmatprep.subr.bf16.mxu1 %v5834_v49  ;;  %3446 = vmatprep.subr.bf16.mxu0 %v5837_v10  ;;  %v7252_v46 = vpack.c.bf16 %v997_v24, %v991_v5  ;;  %v917_v56 = vadd.f32 %v916_v25, %v7165_v31  ;;  %v5847_v25 = vld [vmem:[%s8825_s3 + $0x6c8] ss:$24 sps:$4 sm:$0xff]  }
 0x14c   :  { %v918_v27 = vpop.f32.mrf.mxu0 }
 0x14d   :  { %3334 = vmatpush1.bf16.msra.mxu1 %v5832_v57  ;;  %v7247_v34 = vpack.c.bf16 %v998_v19, %v992_v22  ;;  %v919_v49 = vadd.f32 %v918_v27, %v7160_v7  ;;  %v5852_v19 = vld [vmem:[%s8825_s3 + $0x39c] ss:$24 sps:$4 sm:$0xff]  }
 0x14e   :  { %3447 = vmatpush1.bf16.msra.mxu0 %v5835_v48  ;;  %v920_v47 = vpop.f32.mrf.mxu0  ;;  %3335 = vmatprep.subr.bf16.mxu1 %v5840_v58  ;;  %v5844_v48 = vld [vmem:[%s8825_s3 + $0x3c8] ss:$24 sps:$4 sm:$0xff]   ;;  %v5855_v27 = vld [vmem:[%s8825_s3 + $0x69c] ss:$24 sps:$4 sm:$0xff]  }
 0x14f   :  { %v921_v10 = vadd.f32 %v920_v47, %v7165_v31  ;;  %3147 = vmatprep.mubr.bf16.mxu1 %v7247_v34  ;;  %3448 = vmatprep.subr.bf16.mxu0 %v5843_v38  ;;  %v1004_v38 = vmax.f32 %v919_v49, 0.0 }
 0x150   :  { %v922_v57 = vpop.f32.mrf.mxu0  ;;  %3148 = vmatmul.mubr.bf16.gmra.mxu1 %v7252_v46 }
 0x151   :  { %v923_v24 = vadd.f32 %v922_v57, %v7160_v7  ;;  %3261 = vmatmul.mubr.bf16.gmra.mxu0 %v6903_v41  ;;  %3336 = vmatpush1.bf16.msra.mxu1 %v5838_v15  ;;  %v1009_v58 = vmax.f32 %v921_v10, 0.0  ;;  %v1003_v15 = vmax.f32 %v917_v56, 0.0  ;;  %v5850_v10 = vld [vmem:[%s8825_s3 + $0x398] ss:$24 sps:$4 sm:$0xff]  }
 0x152   :  { %3270 = vmatprep.mubr.bf16.mxu0 %v6942_v21  ;;  %3449 = vmatpush1.bf16.msra.mxu0 %v5841_v2  ;;  %v926_v22 = vpop.f32.mrf.mxu0 }
 0x153   :  { %v1010_v5 = vmax.f32 %v923_v24, 0.0  ;;  %3337 = vmatprep.subr.bf16.mxu1 %v5846_v12  ;;  %3450 = vmatprep.subr.bf16.mxu0 %v5849_v53  ;;  %v7288_v57 = vpack.c.bf16 %v1009_v58, %v1003_v15  ;;  %v5853_v12 = vld [vmem:[%s8825_s3 + $0x698] ss:$24 sps:$4 sm:$0xff]   ;;  %v5858_v24 = vld [vmem:[%s8825_s3 + $0x36c] ss:$24 sps:$4 sm:$0xff]   ;;  %v927_v58 = vadd.f32 %v926_v22, %v7165_v31 }
 0x154   :  { %v928_v47 = vpop.f32.mrf.mxu0  ;;  %v5859_v22 = vld [vmem:[%s8825_s3 + $0x668] ss:$24 sps:$4 sm:$0xff]   ;;  %v5864_v15 = vld [vmem:[%s8825_s3 + $0x33c] ss:$24 sps:$4 sm:$0xff]  }
 0x155   :  { %3338 = vmatpush1.bf16.msra.mxu1 %v5844_v48  ;;  %v7283_v2 = vpack.c.bf16 %v1010_v5, %v1004_v38  ;;  %v929_v53 = vadd.f32 %v928_v47, %v7160_v7  ;;  %v5861_v48 = vld [vmem:[%s8825_s3 + $0x66c] ss:$24 sps:$4 sm:$0xff]   ;;  %v5856_v38 = vld [vmem:[%s8825_s3 + $0x368] ss:$24 sps:$4 sm:$0xff]  }
 0x156   :  { %3451 = vmatpush1.bf16.msra.mxu0 %v5847_v25  ;;  %v930_v49 = vpop.f32.mrf.mxu0  ;;  %3339 = vmatprep.subr.bf16.mxu1 %v5852_v19 }
 0x157   :  { %v931_v56 = vadd.f32 %v930_v49, %v7165_v31  ;;  %3157 = vmatprep.mubr.bf16.mxu1 %v7283_v2  ;;  %3452 = vmatprep.subr.bf16.mxu0 %v5855_v27  ;;  %v1016_v47 = vmax.f32 %v929_v53, 0.0 }
 0x158   :  { %v932_v25 = vpop.f32.mrf.mxu0  ;;  %3158 = vmatmul.mubr.bf16.gmra.mxu1 %v7288_v57 }
 0x159   :  { %v933_v19 = vadd.f32 %v932_v25, %v7160_v7  ;;  %3271 = vmatmul.mubr.bf16.gmra.mxu0 %v6949_v28  ;;  %3340 = vmatpush1.bf16.msra.mxu1 %v5850_v10  ;;  %v1021_v5 = vmax.f32 %v931_v56, 0.0  ;;  %v5867_v10 = vld [vmem:[%s8825_s3 + $0x63c] ss:$24 sps:$4 sm:$0xff]   ;;  %v1015_v56 = vmax.f32 %v927_v58, 0.0 }
 0x15a   :  { %3280 = vmatprep.mubr.bf16.mxu0 %v6986_v1  ;;  %3453 = vmatpush1.bf16.msra.mxu0 %v5853_v12  ;;  %v936_v27 = vpop.f32.mrf.mxu0 }
 0x15b   :  { %v1022_v49 = vmax.f32 %v933_v19, 0.0  ;;  %3341 = vmatprep.subr.bf16.mxu1 %v5858_v24  ;;  %3454 = vmatprep.subr.bf16.mxu0 %v5861_v48  ;;  %v7324_v18 = vpack.c.bf16 %v1021_v5, %v1015_v56  ;;  %v5865_v24 = vld [vmem:[%s8825_s3 + $0x638] ss:$24 sps:$4 sm:$0xff]   ;;  %v5870_v19 = vld [vmem:[%s8825_s3 + $0x30c] ss:$24 sps:$4 sm:$0xff]   ;;  %v937_v5 = vadd.f32 %v936_v27, %v7165_v31 }
 0x15c   :  { %v938_v25 = vpop.f32.mrf.mxu0  ;;  %v5871_v27 = vld [vmem:[%s8825_s3 + $0x608] ss:$24 sps:$4 sm:$0xff]   ;;  %v5876_v56 = vld [vmem:[%s8825_s3 + $0x5dc] ss:$24 sps:$4 sm:$0xff]  }
 0x15d   :  { %3342 = vmatpush1.bf16.msra.mxu1 %v5856_v38  ;;  %v7319_v12 = vpack.c.bf16 %v1022_v49, %v1016_v47  ;;  %8864 = vst [vmem:[#allocation5_spill] sm:$0xff] %v7324_v18  ;;  %v939_v48 = vadd.f32 %v938_v25, %v7160_v7  ;;  %v5873_v38 = vld [vmem:[%s8825_s3 + $0x60c] ss:$24 sps:$4 sm:$0xff]   ;;  %v5868_v47 = vld [vmem:[%s8825_s3 + $0x308] ss:$24 sps:$4 sm:$0xff]  }
 0x15e   :  { %3455 = vmatpush1.bf16.msra.mxu0 %v5859_v22  ;;  %v940_v53 = vpop.f32.mrf.mxu0  ;;  %3343 = vmatprep.subr.bf16.mxu1 %v5864_v15 }
 0x15f   :  { %8863 = vst [vmem:[#allocation4_spill] sm:$0xff] %v7319_v12  ;;  %v941_v58 = vadd.f32 %v940_v53, %v7165_v31  ;;  %3167 = vmatprep.mubr.bf16.mxu1 %v7319_v12  ;;  %3456 = vmatprep.subr.bf16.mxu0 %v5867_v10  ;;  %v1028_v25 = vmax.f32 %v939_v48, 0.0 }
 0x160   :  { %v942_v22 = vpop.f32.mrf.mxu0  ;;  %3168 = vmatmul.mubr.bf16.gmra.mxu1 %v7324_v18 }
 0x161   :  { %v943_v15 = vadd.f32 %v942_v22, %v7160_v7  ;;  %3281 = vmatmul.mubr.bf16.gmra.mxu0 %v6993_v4  ;;  %3344 = vmatpush1.bf16.msra.mxu1 %v5862_v9  ;;  %v1033_v49 = vmax.f32 %v941_v58, 0.0  ;;  %v5879_v9 = vld [vmem:[%s8825_s3 + $0x8dc] ss:$24 sps:$4 sm:$0xff]   ;;  %v1027_v58 = vmax.f32 %v937_v5, 0.0 }
 0x162   :  { %3290 = vmatprep.mubr.bf16.mxu0 %v7030_v60  ;;  %3457 = vmatpush1.bf16.msra.mxu0 %v5865_v24  ;;  %v946_v10 = vpop.f32.mrf.mxu0 }
 0x163   :  { %v1034_v53 = vmax.f32 %v943_v15, 0.0  ;;  %3345 = vmatprep.subr.bf16.mxu1 %v5870_v19  ;;  %3458 = vmatprep.subr.bf16.mxu0 %v5873_v38  ;;  %v7360_v14 = vpack.c.bf16 %v1033_v49, %v1027_v58  ;;  %v5877_v19 = vld [vmem:[%s8825_s3 + $0x8d8] ss:$24 sps:$4 sm:$0xff]   ;;  %v5882_v15 = vld [vmem:[%s8825_s3 + $0x5ac] ss:$24 sps:$4 sm:$0xff]   ;;  %v947_v49 = vadd.f32 %v946_v10, %v7165_v31 }
 0x164   :  { %v948_v22 = vpop.f32.mrf.mxu0  ;;  %v5883_v10 = vld [vmem:[%s8825_s3 + $0x8a8] ss:$24 sps:$4 sm:$0xff]   ;;  %v5888_v58 = vld [vmem:[%s8825_s3 + $0x57c] ss:$24 sps:$4 sm:$0xff]  }
 0x165   :  { %3346 = vmatpush1.bf16.msra.mxu1 %v5868_v47  ;;  %v7355_v24 = vpack.c.bf16 %v1034_v53, %v1028_v25  ;;  %8866 = vst [vmem:[#allocation7_spill] sm:$0xff] %v7360_v14  ;;  %v949_v38 = vadd.f32 %v948_v22, %v7160_v7  ;;  %v5885_v47 = vld [vmem:[%s8825_s3 + $0x8ac] ss:$24 sps:$4 sm:$0xff]   ;;  %v5880_v25 = vld [vmem:[%s8825_s3 + $0x5a8] ss:$24 sps:$4 sm:$0xff]  }
 0x166   :  { %3459 = vmatpush1.bf16.msra.mxu0 %v5871_v27  ;;  %v950_v48 = vpop.f32.mrf.mxu0  ;;  %3347 = vmatprep.subr.bf16.mxu1 %v5876_v56 }
 0x167   :  { %8865 = vst [vmem:[#allocation6_spill] sm:$0xff] %v7355_v24  ;;  %v951_v5 = vadd.f32 %v950_v48, %v7165_v31  ;;  %3177 = vmatprep.mubr.bf16.mxu1 %v7355_v24  ;;  %3460 = vmatprep.subr.bf16.mxu0 %v5879_v9  ;;  %v1040_v22 = vmax.f32 %v949_v38, 0.0 }
 0x168   :  { %v952_v27 = vpop.f32.mrf.mxu0  ;;  %3178 = vmatmul.mubr.bf16.gmra.mxu1 %v7360_v14 }
 0x169   :  { %v953_v56 = vadd.f32 %v952_v27, %v7160_v7  ;;  %3291 = vmatmul.mubr.bf16.gmra.mxu0 %v7037_v62  ;;  %3348 = vmatpush2.bf16.msra.mxu1 %v5874_v45  ;;  %v1045_v53 = vmax.f32 %v951_v5, 0.0  ;;  %v5891_v45 = vld [vmem:[%s8825_s3 + $0x87c] ss:$24 sps:$4 sm:$0xff]   ;;  %v1039_v5 = vmax.f32 %v947_v49, 0.0 }
 0x16a   :  { %3300 = vmatprep.mubr.bf16.mxu0 %v7074_v50  ;;  %3461 = vmatpush2.bf16.msra.mxu0 %v5877_v19  ;;  %v956_v9 = vpop.f32.mrf.mxu0 }
 0x16b   :  { %v1046_v48 = vmax.f32 %v953_v56, 0.0  ;;  %3349 = vmatprep.subr.bf16.mxu1 %v5882_v15  ;;  %3462 = vmatprep.subr.bf16.mxu0 %v5885_v47  ;;  %v7396_v16 = vpack.c.bf16 %v1045_v53, %v1039_v5  ;;  %v5889_v15 = vld [vmem:[%s8825_s3 + $0x878] ss:$24 sps:$4 sm:$0xff]   ;;  %v5894_v56 = vld [vmem:[%s8825_s3 + $0x54c] ss:$24 sps:$4 sm:$0xff]   ;;  %v957_v53 = vadd.f32 %v956_v9, %v7165_v31 }
 0x16c   :  { %v958_v27 = vpop.f32.mrf.mxu0  ;;  %v5895_v9 = vld [vmem:[%s8825_s3 + $0x848] ss:$24 sps:$4 sm:$0xff]   ;;  %v5900_v5 = vld [vmem:[%s8825_s3 + $0x51c] ss:$24 sps:$4 sm:$0xff]  }
 0x16d   :  { %3350 = vmatpush2.bf16.msra.mxu1 %v5880_v25  ;;  %v7391_v19 = vpack.c.bf16 %v1046_v48, %v1040_v22  ;;  %8868 = vst [vmem:[#allocation9_spill] sm:$0xff] %v7396_v16  ;;  %v959_v47 = vadd.f32 %v958_v27, %v7160_v7  ;;  %v5897_v25 = vld [vmem:[%s8825_s3 + $0x84c] ss:$24 sps:$4 sm:$0xff]   ;;  %v5892_v22 = vld [vmem:[%s8825_s3 + $0x548] ss:$24 sps:$4 sm:$0xff]  }
 0x16e   :  { %3463 = vmatpush2.bf16.msra.mxu0 %v5883_v10  ;;  %v960_v38 = vpop.f32.mrf.mxu0  ;;  %3351 = vmatprep.subr.bf16.mxu1 %v5888_v58 }
 0x16f   :  { %8867 = vst [vmem:[#allocation8_spill] sm:$0xff] %v7391_v19  ;;  %v961_v49 = vadd.f32 %v960_v38, %v7165_v31  ;;  %3187 = vmatprep.mubr.bf16.mxu1 %v7391_v19  ;;  %3464 = vmatprep.subr.bf16.mxu0 %v5891_v45  ;;  %v1052_v27 = vmax.f32 %v959_v47, 0.0  ;;  %v5901_v47 = vld [vmem:[%s8825_s3 + $0x818] ss:$24 sps:$4 sm:$0xff]  }
 0x170   :  { %v962_v10 = vpop.f32.mrf.mxu0  ;;  %3188 = vmatmul.mubr.bf16.gmra.mxu1 %v7396_v16 }
 0x171   :  { %v963_v58 = vadd.f32 %v962_v10, %v7160_v7  ;;  %3301 = vmatmul.mubr.bf16.gmra.mxu0 %v7081_v6  ;;  %3352 = vmatpush2.bf16.msra.mxu1 %v5886_v13  ;;  %v1057_v48 = vmax.f32 %v961_v49, 0.0  ;;  %v5903_v13 = vld [vmem:[%s8825_s3 + $0x81c] ss:$24 sps:$4 sm:$0xff]   ;;  %v1051_v49 = vmax.f32 %v957_v53, 0.0 }
 0x172   :  { %3310 = vmatprep.mubr.bf16.mxu0 %v7118_v29  ;;  %3465 = vmatpush2.bf16.msra.mxu0 %v5889_v15  ;;  %v966_v45 = vpop.f32.mrf.mxu0 }
 0x173   :  { %v1058_v38 = vmax.f32 %v963_v58, 0.0  ;;  %3353 = vmatprep.subr.bf16.mxu1 %v5894_v56  ;;  %3466 = vmatprep.subr.bf16.mxu0 %v5897_v25  ;;  %v7435_v58 = vpack.c.bf16 %v1057_v48, %v1051_v49  ;;  %v5906_v25 = vld [vmem:[%s8825_s3 + $0x4ec] ss:$24 sps:$4 sm:$0xff]  }
 0x174   :  { %v968_v10 = vpop.f32.mrf.mxu0  ;;  %v5909_v48 = vld [vmem:[%s8825_s3 + $0x7ec] ss:$24 sps:$4 sm:$0xff]  }
 0x175   :  { %3354 = vmatpush2.bf16.msra.mxu1 %v5892_v22  ;;  %v7427_v15 = vpack.c.bf16 %v1058_v38, %v1052_v27  ;;  %8870 = vst [vmem:[#allocation11_spill] sm:$0xff] %v7435_v58  ;;  %v969_v53 = vadd.f32 %v968_v10, %v7160_v7  ;;  %v5904_v27 = vld [vmem:[%s8825_s3 + $0x4e8] ss:$24 sps:$4 sm:$0xff]  }
 0x176   :  { %3467 = vmatpush2.bf16.msra.mxu0 %v5895_v9  ;;  %v970_v56 = vpop.f32.mrf.mxu0  ;;  %3355 = vmatprep.subr.bf16.mxu1 %v5900_v5  ;;  %v967_v9 = vadd.f32 %v966_v45, %v7165_v31  ;;  %v5907_v38 = vld [vmem:[%s8825_s3 + $0x7e8] ss:$24 sps:$4 sm:$0xff]  }
 0x177   :  { %8869 = vst [vmem:[#allocation10_spill] sm:$0xff] %v7427_v15  ;;  %v971_v22 = vadd.f32 %v970_v56, %v7165_v31  ;;  %3197 = vmatprep.mubr.bf16.mxu1 %v7427_v15  ;;  %3468 = vmatprep.subr.bf16.mxu0 %v5903_v13  ;;  %v5912_v13 = vld [vmem:[%s8825_s3 + $0x4bc] ss:$24 sps:$4 sm:$0xff]   ;;  %v1064_v10 = vmax.f32 %v969_v53, 0.0  ;;  %v5918_v53 = vld [vmem:[%s8825_s3 + $0x48c] ss:$24 sps:$4 sm:$0xff]  }
 0x178   :  { %v972_v5 = vpop.f32.mrf.mxu0  ;;  %3198 = vmatmul.mubr.bf16.gmra.mxu1 %v7435_v58  ;;  %v5915_v31 = vld [vmem:[%s8825_s3 + $0x7bc] ss:$24 sps:$4 sm:$0xff]  }
 0x179   :  { %v973_v49 = vadd.f32 %v972_v5, %v7160_v7  ;;  %3311 = vmatmul.mubr.bf16.gmra.mxu0 %v7125_v32  ;;  %3356 = vmatpush2.bf16.msra.mxu1 %v5898_v17  ;;  %v1069_v45 = vmax.f32 %v971_v22, 0.0  ;;  %v1063_v7 = vmax.f32 %v967_v9, 0.0  ;;  %v5910_v17 = vld [vmem:[%s8825_s3 + $0x4b8] ss:$24 sps:$4 sm:$0xff]   ;;  %v5921_v22 = vld [vmem:[%s8825_s3 + $0x78c] ss:$24 sps:$4 sm:$0xff]  }
 0x17a   :  { %3320 = vmatprep.mubr.bf16.mxu0 %v7172_v39  ;;  %3469 = vmatpush2.bf16.msra.mxu0 %v5901_v47  ;;  %v5913_v47 = vld [vmem:[%s8825_s3 + $0x7b8] ss:$24 sps:$4 sm:$0xff]   ;;  %v5927_v9 = vld [vmem:[%s8825_s3 + $0x464] ss:$24 sps:$4 sm:$0xff]  }
 0x17b   :  { %v1070_v56 = vmax.f32 %v973_v49, 0.0  ;;  %3357 = vmatprep.subr.bf16.mxu1 %v5906_v25  ;;  %3470 = vmatprep.subr.bf16.mxu0 %v5909_v48  ;;  %v7468_v32 = vpack.c.bf16 %v1069_v45, %v1063_v7  ;;  %v5916_v25 = vld [vmem:[%s8825_s3 + $0x488] ss:$24 sps:$4 sm:$0xff]   ;;  %v5924_v48 = vld [vmem:[%s8825_s3 + $0x164] ss:$24 sps:$4 sm:$0xff]  }
 0x17c   :  { %v5925_v49 = vld [vmem:[%s8825_s3 + $0x460] ss:$24 sps:$4 sm:$0xff]   ;;  %v5928_v45 = vld [vmem:[%s8825_s3 + $0x130] ss:$24 sps:$4 sm:$0xff]   ;;  %v5939_v7 = vld [vmem:[%s8825_s3 + $0x404] ss:$24 sps:$4 sm:$0xff]  }
 0x17d   :  { %3358 = vmatpush2.bf16.msra.mxu1 %v5904_v27  ;;  %v7463_v5 = vpack.c.bf16 %v1070_v56, %v1064_v10  ;;  %8872 = vst [vmem:[#allocation13_spill] sm:$0xff] %v7468_v32  ;;  %v5919_v27 = vld [vmem:[%s8825_s3 + $0x788] ss:$24 sps:$4 sm:$0xff]   ;;  %v5936_v56 = vld [vmem:[%s8825_s3 + $0x104] ss:$24 sps:$4 sm:$0xff]  }
 0x17e   :  { %3471 = vmatpush2.bf16.msra.mxu0 %v5907_v38  ;;  %3359 = vmatprep.subr.bf16.mxu1 %v5912_v13  ;;  %v5922_v38 = vld [vmem:[%s8825_s3 + $0x160] ss:$24 sps:$4 sm:$0xff]   ;;  %v5930_v13 = vld [vmem:[%s8825_s3 + $0x134] ss:$24 sps:$4 sm:$0xff]   ;;  %v5931_v10 = vld [vmem:[%s8825_s3 + $0x430] ss:$24 sps:$4 sm:$0xff]  }
 0x17f   :  { %8871 = vst [vmem:[#allocation12_spill] sm:$0xff] %v7463_v5  ;;  %3207 = vmatprep.mubr.bf16.mxu1 %v7463_v5  ;;  %3472 = vmatprep.subr.bf16.mxu0 %v5915_v31  ;;  %v5933_v31 = vld [vmem:[%s8825_s3 + $0x434] ss:$24 sps:$4 sm:$0xff]  }
 0x180   :  { %3208 = vmatmul.mubr.bf16.gmra.mxu1 %v7468_v32 }
 0x181   :  { %3321 = vmatmul.mubr.bf16.gmra.mxu0 %v7179_v43  ;;  %3360 = vmatpush2.bf16.msra.mxu1 %v5910_v17  ;;  %v5934_v17 = vld [vmem:[%s8825_s3 + $0x100] ss:$24 sps:$4 sm:$0xff]  }
 0x182   :  { %3363 = vmatprep.mubr.bf16.mxu1 %v6855_v55  ;;  %3473 = vmatpush2.bf16.msra.mxu0 %v5913_v47  ;;  %v5937_v47 = vld [vmem:[%s8825_s3 + $0x400] ss:$24 sps:$4 sm:$0xff]  }
 0x183   :  { %3476 = vmatprep.mubr.bf16.mxu0 %v7211_v33  ;;  %3361 = vmatprep.subr.bf16.mxu1 %v5918_v53  ;;  %v5945_v53 = vld [vmem:[%s8825_s3 + $0x3d4] ss:$24 sps:$4 sm:$0xff]  }
 0x184   :  { %3474 = vmatprep.subr.bf16.mxu0 %v5921_v22  ;;  %v5940_v22 = vld [vmem:[%s8825_s3 + $0xd0] ss:$24 sps:$4 sm:$0xff]  }
 0x185   :  { %3362 = vmatpush2.bf16.msra.mxu1 %v5916_v25  ;;  %v5942_v25 = vld [vmem:[%s8825_s3 + $0xd4] ss:$24 sps:$4 sm:$0xff]  }
 0x186   :  { %3475 = vmatpush2.bf16.msra.mxu0 %v5919_v27  ;;  %3557 = vmatprep.subr.bf16.mxu1 %v5924_v48  ;;  %v5943_v27 = vld [vmem:[%s8825_s3 + $0x3d0] ss:$24 sps:$4 sm:$0xff]   ;;  %v5948_v48 = vld [vmem:[%s8825_s3 + $0xa4] ss:$24 sps:$4 sm:$0xff]  }
 0x187   :  { %3670 = vmatprep.subr.bf16.mxu0 %v5927_v9  ;;  %v5951_v9 = vld [vmem:[%s8825_s3 + $0x3a4] ss:$24 sps:$4 sm:$0xff]  }
 0x188   :  { %3364 = vmatmul.mubr.bf16.vlgmr.msra.gmra.mxu1 %v6850_v51 }
 0x189   :  { %3477 = vmatmul.mubr.bf16.vlgmr.msra.gmra.mxu0 %v7216_v42  ;;  %3373 = vmatprep.mubr.bf16.mxu1 %v6905_v0 }
 0x18a   :  { %3486 = vmatprep.mubr.bf16.mxu0 %v7247_v34  ;;  %3558 = vmatpush1.bf16.msra.mxu1 %v5922_v38  ;;  %v5946_v38 = vld [vmem:[%s8825_s3 + $0xa0] ss:$24 sps:$4 sm:$0xff]  }
 0x18b   :  { %3671 = vmatpush1.bf16.msra.mxu0 %v5925_v49  ;;  %3559 = vmatprep.subr.bf16.mxu1 %v5930_v13  ;;  %v5949_v49 = vld [vmem:[%s8825_s3 + $0x3a0] ss:$24 sps:$4 sm:$0xff]   ;;  %v5954_v13 = vld [vmem:[%s8825_s3 + $0x74] ss:$24 sps:$4 sm:$0xff]  }
 0x18c   :  { %3672 = vmatprep.subr.bf16.mxu0 %v5933_v31  ;;  %v5957_v31 = vld [vmem:[%s8825_s3 + $0x374] ss:$24 sps:$4 sm:$0xff]  }
 0x18e   :  { %3560 = vmatpush1.bf16.msra.mxu1 %v5928_v45  ;;  %v5952_v45 = vld [vmem:[%s8825_s3 + $0x70] ss:$24 sps:$4 sm:$0xff]  }
 0x18f   :  { %3673 = vmatpush1.bf16.msra.mxu0 %v5931_v10  ;;  %3561 = vmatprep.subr.bf16.mxu1 %v5936_v56  ;;  %v5955_v10 = vld [vmem:[%s8825_s3 + $0x370] ss:$24 sps:$4 sm:$0xff]   ;;  %v5960_v56 = vld [vmem:[%s8825_s3 + $0x44] ss:$24 sps:$4 sm:$0xff]  }
 0x190   :  { %3374 = vmatmul.mubr.bf16.gmra.mxu1 %v6895_v37  ;;  %3674 = vmatprep.subr.bf16.mxu0 %v5939_v7  ;;  %v5963_v7 = vld [vmem:[%s8825_s3 + $0x344] ss:$24 sps:$4 sm:$0xff]  }
 0x191   :  { %3487 = vmatmul.mubr.bf16.gmra.mxu0 %v7252_v46  ;;  %3383 = vmatprep.mubr.bf16.mxu1 %v6944_v26 }
 0x192   :  { %3496 = vmatprep.mubr.bf16.mxu0 %v7283_v2  ;;  %3562 = vmatpush1.bf16.msra.mxu1 %v5934_v17  ;;  %v5958_v17 = vld [vmem:[%s8825_s3 + $0x40] ss:$24 sps:$4 sm:$0xff]  }
 0x193   :  { %3675 = vmatpush1.bf16.msra.mxu0 %v5937_v47  ;;  %3563 = vmatprep.subr.bf16.mxu1 %v5942_v25  ;;  %v5961_v47 = vld [vmem:[%s8825_s3 + $0x340] ss:$24 sps:$4 sm:$0xff]   ;;  %v5966_v25 = vld [vmem:[%s8825_s3 + $0x14] ss:$24 sps:$4 sm:$0xff]  }
 0x194   :  { %3676 = vmatprep.subr.bf16.mxu0 %v5945_v53  ;;  %v5969_v53 = vld [vmem:[%s8825_s3 + $0x314] ss:$24 sps:$4 sm:$0xff]  }
 0x196   :  { %3564 = vmatpush1.bf16.msra.mxu1 %v5940_v22  ;;  %v5964_v22 = vld [vmem:[%s8825_s3 + $0x10] ss:$24 sps:$4 sm:$0xff]  }
 0x197   :  { %3677 = vmatpush1.bf16.msra.mxu0 %v5943_v27  ;;  %3565 = vmatprep.subr.bf16.mxu1 %v5948_v48  ;;  %v5967_v27 = vld [vmem:[%s8825_s3 + $0x310] ss:$24 sps:$4 sm:$0xff]   ;;  %v5972_v48 = vld [vmem:[%s8825_s3 + $0x2e4] ss:$24 sps:$4 sm:$0xff]  }
 0x198   :  { %3384 = vmatmul.mubr.bf16.gmra.mxu1 %v6939_v8  ;;  %3678 = vmatprep.subr.bf16.mxu0 %v5951_v9  ;;  %v5975_v9 = vld [vmem:[%s8825_s3 + $0x5e4] ss:$24 sps:$4 sm:$0xff]  }
 0x199   :  { %3497 = vmatmul.mubr.bf16.gmra.mxu0 %v7288_v57  ;;  %3393 = vmatprep.mubr.bf16.mxu1 %v6988_v63 }
 0x19a   :  { %3506 = vmatprep.mubr.bf16.mxu0 %v7319_v12  ;;  %3566 = vmatpush1.bf16.msra.mxu1 %v5946_v38  ;;  %v5970_v38 = vld [vmem:[%s8825_s3 + $0x2e0] ss:$24 sps:$4 sm:$0xff]   ;;  %v7901_v12 = vld [vmem:[%s8827_s5 + $0x8] sm:$0xff]  }
 0x19b   :  { %3679 = vmatpush1.bf16.msra.mxu0 %v5949_v49  ;;  %3567 = vmatprep.subr.bf16.mxu1 %v5954_v13  ;;  %v5973_v49 = vld [vmem:[%s8825_s3 + $0x5e0] ss:$24 sps:$4 sm:$0xff]   ;;  %v5978_v13 = vld [vmem:[%s8825_s3 + $0x2b4] ss:$24 sps:$4 sm:$0xff]   ;;  %8879 = vst [vmem:[#allocation20_spill] sm:$0xff] %v7901_v12 }
 0x19c   :  { %3680 = vmatprep.subr.bf16.mxu0 %v5957_v31  ;;  %v5981_v31 = vld [vmem:[%s8825_s3 + $0x5b4] ss:$24 sps:$4 sm:$0xff]  }
 0x19e   :  { %3568 = vmatpush1.bf16.msra.mxu1 %v5952_v45  ;;  %v5976_v45 = vld [vmem:[%s8825_s3 + $0x2b0] ss:$24 sps:$4 sm:$0xff]  }
 0x19f   :  { %3681 = vmatpush1.bf16.msra.mxu0 %v5955_v10  ;;  %3569 = vmatprep.subr.bf16.mxu1 %v5960_v56  ;;  %v5979_v10 = vld [vmem:[%s8825_s3 + $0x5b0] ss:$24 sps:$4 sm:$0xff]   ;;  %v5984_v56 = vld [vmem:[%s8825_s3 + $0x284] ss:$24 sps:$4 sm:$0xff]  }
 0x1a0   :  { %3394 = vmatmul.mubr.bf16.gmra.mxu1 %v6983_v52  ;;  %3682 = vmatprep.subr.bf16.mxu0 %v5963_v7  ;;  %v5987_v7 = vld [vmem:[%s8825_s3 + $0x584] ss:$24 sps:$4 sm:$0xff]  }
 0x1a1   :  { %3507 = vmatmul.mubr.bf16.gmra.mxu0 %v7324_v18  ;;  %3403 = vmatprep.mubr.bf16.mxu1 %v7032_v61 }
 0x1a2   :  { %3516 = vmatprep.mubr.bf16.mxu0 %v7355_v24  ;;  %3570 = vmatpush1.bf16.msra.mxu1 %v5958_v17  ;;  %v5982_v17 = vld [vmem:[%s8825_s3 + $0x280] ss:$24 sps:$4 sm:$0xff]  }
 0x1a3   :  { %3683 = vmatpush1.bf16.msra.mxu0 %v5961_v47  ;;  %3571 = vmatprep.subr.bf16.mxu1 %v5966_v25  ;;  %v5985_v47 = vld [vmem:[%s8825_s3 + $0x580] ss:$24 sps:$4 sm:$0xff]   ;;  %v5990_v25 = vld [vmem:[%s8825_s3 + $0x254] ss:$24 sps:$4 sm:$0xff]  }
 0x1a4   :  { %3684 = vmatprep.subr.bf16.mxu0 %v5969_v53  ;;  %v5993_v53 = vld [vmem:[%s8825_s3 + $0x554] ss:$24 sps:$4 sm:$0xff]  }
 0x1a6   :  { %3572 = vmatpush1.bf16.msra.mxu1 %v5964_v22  ;;  %v5988_v22 = vld [vmem:[%s8825_s3 + $0x250] ss:$24 sps:$4 sm:$0xff]  }
 0x1a7   :  { %3685 = vmatpush1.bf16.msra.mxu0 %v5967_v27  ;;  %3573 = vmatprep.subr.bf16.mxu1 %v5972_v48  ;;  %v5991_v27 = vld [vmem:[%s8825_s3 + $0x550] ss:$24 sps:$4 sm:$0xff]   ;;  %v5996_v48 = vld [vmem:[%s8825_s3 + $0x224] ss:$24 sps:$4 sm:$0xff]  }
 0x1a8   :  { %3404 = vmatmul.mubr.bf16.gmra.mxu1 %v7027_v36  ;;  %3686 = vmatprep.subr.bf16.mxu0 %v5975_v9  ;;  %v5999_v9 = vld [vmem:[%s8825_s3 + $0x524] ss:$24 sps:$4 sm:$0xff]  }
 0x1a9   :  { %3517 = vmatmul.mubr.bf16.gmra.mxu0 %v7360_v14  ;;  %3413 = vmatprep.mubr.bf16.mxu1 %v7076_v3 }
 0x1aa   :  { %3526 = vmatprep.mubr.bf16.mxu0 %v7391_v19  ;;  %3574 = vmatpush2.bf16.msra.mxu1 %v5970_v38  ;;  %v5994_v38 = vld [vmem:[%s8825_s3 + $0x220] ss:$24 sps:$4 sm:$0xff]  }
 0x1ab   :  { %3687 = vmatpush2.bf16.msra.mxu0 %v5973_v49  ;;  %3575 = vmatprep.subr.bf16.mxu1 %v5978_v13  ;;  %v5997_v49 = vld [vmem:[%s8825_s3 + $0x520] ss:$24 sps:$4 sm:$0xff]   ;;  %v6002_v13 = vld [vmem:[%s8825_s3 + $0x1f4] ss:$24 sps:$4 sm:$0xff]  }
 0x1ac   :  { %3688 = vmatprep.subr.bf16.mxu0 %v5981_v31  ;;  %v6005_v31 = vld [vmem:[%s8825_s3 + $0x4f4] ss:$24 sps:$4 sm:$0xff]  }
 0x1ae   :  { %3576 = vmatpush2.bf16.msra.mxu1 %v5976_v45  ;;  %v6000_v45 = vld [vmem:[%s8825_s3 + $0x1f0] ss:$24 sps:$4 sm:$0xff]  }
 0x1af   :  { %3689 = vmatpush2.bf16.msra.mxu0 %v5979_v10  ;;  %3577 = vmatprep.subr.bf16.mxu1 %v5984_v56  ;;  %v6003_v10 = vld [vmem:[%s8825_s3 + $0x4f0] ss:$24 sps:$4 sm:$0xff]   ;;  %v6008_v56 = vld [vmem:[%s8825_s3 + $0x1c4] ss:$24 sps:$4 sm:$0xff]  }
 0x1b0   :  { %3414 = vmatmul.mubr.bf16.gmra.mxu1 %v7071_v59  ;;  %3690 = vmatprep.subr.bf16.mxu0 %v5987_v7  ;;  %v6011_v7 = vld [vmem:[%s8825_s3 + $0x4c4] ss:$24 sps:$4 sm:$0xff]  }
 0x1b1   :  { %3527 = vmatmul.mubr.bf16.gmra.mxu0 %v7396_v16  ;;  %3423 = vmatprep.mubr.bf16.mxu1 %v7120_v30  ;;  %v7845_v16 = vld [vmem:[%s8827_s5 + $0x18] sm:$0xff]  }
 0x1b2   :  { %3536 = vmatprep.mubr.bf16.mxu0 %v7427_v15  ;;  %3578 = vmatpush2.bf16.msra.mxu1 %v5982_v17  ;;  %v6006_v17 = vld [vmem:[%s8825_s3 + $0x1c0] ss:$24 sps:$4 sm:$0xff]   ;;  %v6035_v15 = vld [vmem:[%s8825_s3 + $0x674] ss:$24 sps:$4 sm:$0xff]   ;;  %8873 = vst [vmem:[#allocation14_spill] sm:$0xff] %v7845_v16 }
 0x1b3   :  { %3691 = vmatpush2.bf16.msra.mxu0 %v5985_v47  ;;  %3579 = vmatprep.subr.bf16.mxu1 %v5990_v25  ;;  %v6009_v47 = vld [vmem:[%s8825_s3 + $0x4c0] ss:$24 sps:$4 sm:$0xff]   ;;  %v6014_v25 = vld [vmem:[%s8825_s3 + $0x194] ss:$24 sps:$4 sm:$0xff]  }
 0x1b4   :  { %3692 = vmatprep.subr.bf16.mxu0 %v5993_v53  ;;  %v6017_v53 = vld [vmem:[%s8825_s3 + $0x494] ss:$24 sps:$4 sm:$0xff]  }
 0x1b6   :  { %3580 = vmatpush2.bf16.msra.mxu1 %v5988_v22  ;;  %v6012_v22 = vld [vmem:[%s8825_s3 + $0x190] ss:$24 sps:$4 sm:$0xff]  }
 0x1b7   :  { %3693 = vmatpush2.bf16.msra.mxu0 %v5991_v27  ;;  %3581 = vmatprep.subr.bf16.mxu1 %v5996_v48  ;;  %v6015_v27 = vld [vmem:[%s8825_s3 + $0x490] ss:$24 sps:$4 sm:$0xff]   ;;  %v6020_v48 = vld [vmem:[%s8825_s3 + $0x764] ss:$24 sps:$4 sm:$0xff]  }
 0x1b8   :  { %3424 = vmatmul.mubr.bf16.gmra.mxu1 %v7115_v20  ;;  %3694 = vmatprep.subr.bf16.mxu0 %v5999_v9 }
 0x1b9   :  { %3537 = vmatmul.mubr.bf16.gmra.mxu0 %v7435_v58  ;;  %3433 = vmatprep.mubr.bf16.mxu1 %v7174_v44 }
 0x1ba   :  { %3546 = vmatprep.mubr.bf16.mxu0 %v7463_v5  ;;  %3582 = vmatpush2.bf16.msra.mxu1 %v5994_v38  ;;  %v6030_v5 = vld [vmem:[%s8825_s3 + $0x6a0] ss:$24 sps:$4 sm:$0xff]  }
 0x1bb   :  { %3695 = vmatpush2.bf16.msra.mxu0 %v5997_v49  ;;  %3583 = vmatprep.subr.bf16.mxu1 %v6002_v13  ;;  %v6023_v49 = vld [vmem:[%s8825_s3 + $0x734] ss:$24 sps:$4 sm:$0xff]   ;;  %v7736_v13 = vld [vmem:[%s8827_s5 + $0x38] sm:$0xff]  }
 0x1bc   :  { %3696 = vmatprep.subr.bf16.mxu0 %v6005_v31  ;;  %v7742_v31 = vld [vmem:[%s8827_s5 + $0x70] sm:$0xff]  }
 0x1be   :  { %3584 = vmatpush2.bf16.msra.mxu1 %v6000_v45 }
 0x1bf   :  { %3697 = vmatpush2.bf16.msra.mxu0 %v6003_v10  ;;  %3585 = vmatprep.subr.bf16.mxu1 %v6008_v56 }
 0x1c0   :  { %3434 = vmatmul.mubr.bf16.gmra.mxu1 %v7170_v35  ;;  %3698 = vmatprep.subr.bf16.mxu0 %v6011_v7 }
 0x1c1   :  { %3547 = vmatmul.mubr.bf16.gmra.mxu0 %v7468_v32  ;;  %3589 = vmatprep.mubr.bf16.mxu1 %v6853_v54  ;;  %v7720_v54 = vld [vmem:[%s8827_s5 + $0x78] sm:$0xff]  }
 0x1c2   :  { %3586 = vmatpush2.bf16.msra.mxu1 %v6006_v17  ;;  %3702 = vmatprep.mubr.bf16.mxu0 %v6855_v55  ;;  %v6018_v55 = vld [vmem:[%s8825_s3 + $0x760] ss:$24 sps:$4 sm:$0xff]  }
 0x1c3   :  { %3699 = vmatpush2.bf16.msra.mxu0 %v6009_v47  ;;  %3587 = vmatprep.subr.bf16.mxu1 %v6014_v25  ;;  %v6024_v25 = vld [vmem:[%s8825_s3 + $0x700] ss:$24 sps:$4 sm:$0xff]  }
 0x1c4   :  { %3700 = vmatprep.subr.bf16.mxu0 %v6017_v53 }
 0x1c6   :  { %3588 = vmatpush2.bf16.msra.mxu1 %v6012_v22  ;;  %v6029_v22 = vld [vmem:[%s8825_s3 + $0x6d4] ss:$24 sps:$4 sm:$0xff]  }
 0x1c7   :  { %3701 = vmatpush2.bf16.msra.mxu0 %v6015_v27  ;;  %3783 = vmatprep.subr.bf16.mxu1 %v6020_v48  ;;  %v7789_v27 = vld [vmem:[%s8827_s5 + $0x28] sm:$0xff]  }
 0x1c8   :  { %v7725_v9 = vpop.f32.mrf.mxu1  ;;  %5299 = vmatprep.subr.bf16.mxu0 %v7720_v54 }
 0x1c9   :  { %v7727_v38 = vpop.f32.mrf.mxu0  ;;  %3590 = vmatmul.mubr.bf16.vlgmr.msra.gmra.mxu1 %v6863_v23  ;;  %v6021_v23 = vld [vmem:[%s8825_s3 + $0x730] ss:$24 sps:$4 sm:$0xff]  }
 0x1ca   :  { %3703 = vmatmul.mubr.bf16.vlgmr.msra.gmra.mxu0 %v6850_v51  ;;  %3599 = vmatprep.mubr.bf16.mxu1 %v6898_v40  ;;  %v7746_v45 = vpop.f32.mrf.mxu1  ;;  %v6026_v51 = vld [vmem:[%s8825_s3 + $0x704] ss:$24 sps:$4 sm:$0xff]   ;;  %v7765_v40 = vld [vmem:[%s8827_s5 + $0x30] sm:$0xff]  }
 0x1cb   :  { %v7748_v10 = vpop.f32.mrf.mxu0  ;;  %3712 = vmatprep.mubr.bf16.mxu0 %v6905_v0  ;;  %3784 = vmatpush1.bf16.msra.mxu1 %v6018_v55  ;;  %v7771_v0 = vld [vmem:[%s8827_s5 + $0x68] sm:$0xff]   ;;  %v7798_v55 = vld [vmem:[%s8827_s5 + $0x60] sm:$0xff]  }
 0x1cc   :  { %v7754_v56 = vpop.f32.mrf.mxu1  ;;  %3785 = vmatprep.subr.bf16.mxu1 %v6023_v49  ;;  %5300 = vmatpush3.bf16.msra.mxu0 %v7736_v13 }
 0x1cd   :  { %v7756_v7 = vpop.f32.mrf.mxu0  ;;  %5301 = vmatprep.subr.bf16.mxu0 %v7742_v31 }
 0x1ce   :  { %v7773_v17 = vpop.f32.mrf.mxu1 }
 0x1cf   :  { %v7775_v47 = vpop.f32.mrf.mxu0  ;;  %3786 = vmatpush1.bf16.msra.mxu1 %v6021_v23 }
 0x1d0   :  { %v7780_v53 = vpop.f32.mrf.mxu1  ;;  %3787 = vmatprep.subr.bf16.mxu1 %v6026_v51  ;;  %5302 = vmatpush3.bf16.msra.mxu0 %v7765_v40 }
 0x1d1   :  { %v7791_v48 = vpop.f32.mrf.mxu0  ;;  %3600 = vmatmul.mubr.bf16.gmra.mxu1 %v6903_v41  ;;  %5303 = vmatprep.subr.bf16.mxu0 %v7771_v0  ;;  %v6027_v41 = vld [vmem:[%s8825_s3 + $0x6d0] ss:$24 sps:$4 sm:$0xff]  }
 0x1d2   :  { %3713 = vmatmul.mubr.bf16.gmra.mxu0 %v6895_v37  ;;  %3609 = vmatprep.mubr.bf16.mxu1 %v6942_v21  ;;  %v7802_v49 = vpop.f32.mrf.mxu1  ;;  %v6032_v37 = vld [vmem:[%s8825_s3 + $0x6a4] ss:$24 sps:$4 sm:$0xff]  }
 0x1d3   :  { %3722 = vmatprep.mubr.bf16.mxu0 %v6944_v26  ;;  %3788 = vmatpush1.bf16.msra.mxu1 %v6024_v25  ;;  %v7805_v23 = vpop.f32.mrf.mxu0  ;;  %v7819_v21 = vld [vmem:[%s8827_s5 + $0x20] sm:$0xff]   ;;  %v7827_v25 = vld [vmem:[%s8827_s5 + $0x58] sm:$0xff]  }
 0x1d4   :  { %v7810_v51 = vpop.f32.mrf.mxu1  ;;  %3789 = vmatprep.subr.bf16.mxu1 %v6029_v22  ;;  %5304 = vmatpush3.bf16.msra.mxu0 %v7789_v27 }
 0x1d5   :  { %v7821_v26 = vpop.f32.mrf.mxu0  ;;  %5305 = vmatprep.subr.bf16.mxu0 %v7798_v55 }
 0x1d6   :  { %v7829_v22 = vpop.f32.mrf.mxu1 }
 0x1d7   :  { %3790 = vmatpush1.bf16.msra.mxu1 %v6027_v41  ;;  %v7831_v32 = vpop.f32.mrf.mxu0 }
 0x1d8   :  { %v7836_v58 = vpop.f32.mrf.mxu1  ;;  %3791 = vmatprep.subr.bf16.mxu1 %v6032_v37  ;;  %5306 = vmatpush3.bf16.msra.mxu0 %v7819_v21  ;;  %v7854_v37 = vld [vmem:[%s8827_s5 + $0x50] sm:$0xff]  }
 0x1d9   :  { %v7847_v41 = vpop.f32.mrf.mxu0  ;;  %3610 = vmatmul.mubr.bf16.gmra.mxu1 %v6949_v28  ;;  %5307 = vmatprep.subr.bf16.mxu0 %v7827_v25  ;;  %8875 = vst [vmem:[#allocation16_spill] sm:$0xff] %v7854_v37  ;;  %v6033_v28 = vld [vmem:[%s8825_s3 + $0x670] ss:$24 sps:$4 sm:$0xff]  }
 0x1da   :  { %8874 = vst [vmem:[#allocation15_spill] sm:$0xff] %v7847_v41  ;;  %3723 = vmatmul.mubr.bf16.gmra.mxu0 %v6939_v8  ;;  %3619 = vmatprep.mubr.bf16.mxu1 %v6986_v1  ;;  %v7858_v19 = vpop.f32.mrf.mxu1  ;;  %v6038_v8 = vld [vmem:[%s8825_s3 + $0x644] ss:$24 sps:$4 sm:$0xff]   ;;  %v7875_v1 = vld [vmem:[%s8827_s5 + $0x10] sm:$0xff]   ;;  %v6036_v41 = vld [vmem:[%s8825_s3 + $0x640] ss:$24 sps:$4 sm:$0xff]  }
 0x1db   :  { %3732 = vmatprep.mubr.bf16.mxu0 %v6988_v63  ;;  %3792 = vmatpush1.bf16.msra.mxu1 %v6030_v5  ;;  %v7861_v14 = vpop.f32.mrf.mxu0  ;;  %8876 = vst [vmem:[#allocation17_spill] sm:$0xff] %v7875_v1  ;;  %v7883_v5 = vld [vmem:[%s8827_s5 + $0x48] sm:$0xff]  }
 0x1dc   :  { %v7866_v24 = vpop.f32.mrf.mxu1  ;;  %3793 = vmatprep.subr.bf16.mxu1 %v6035_v15  ;;  %5308 = vmatpush3.bf16.msra.mxu0 %v7845_v16  ;;  %8877 = vst [vmem:[#allocation18_spill] sm:$0xff] %v7883_v5 }
 0x1dd   :  { %v7877_v63 = vpop.f32.mrf.mxu0  ;;  %5309 = vmatprep.subr.bf16.mxu0 %v7854_v37  ;;  %v6041_v37 = vld [vmem:[%s8825_s3 + $0x614] ss:$24 sps:$4 sm:$0xff]  }
 0x1de   :  { %v7885_v15 = vpop.f32.mrf.mxu1 }
 0x1df   :  { %3794 = vmatpush1.bf16.msra.mxu1 %v6033_v28  ;;  %v7887_v18 = vpop.f32.mrf.mxu0 }
 0x1e0   :  { %v7892_v16 = vpop.f32.mrf.mxu1  ;;  %3795 = vmatprep.subr.bf16.mxu1 %v6038_v8  ;;  %5310 = vmatpush3.bf16.msra.mxu0 %v7875_v1  ;;  %v7910_v8 = vld [vmem:[%s8827_s5 + $0x40] sm:$0xff]  }
 0x1e1   :  { %8878 = vst [vmem:[#allocation19_spill] sm:$0xff] %v7892_v16  ;;  %v7903_v28 = vpop.f32.mrf.mxu0  ;;  %3620 = vmatmul.mubr.bf16.gmra.mxu1 %v6993_v4  ;;  %5311 = vmatprep.subr.bf16.mxu0 %v7883_v5  ;;  %8881 = vst [vmem:[#allocation22_spill] sm:$0xff] %v7910_v8  ;;  %v6039_v4 = vld [vmem:[%s8825_s3 + $0x610] ss:$24 sps:$4 sm:$0xff]  }
 0x1e2   :  { %8880 = vst [vmem:[#allocation21_spill] sm:$0xff] %v7903_v28  ;;  %3733 = vmatmul.mubr.bf16.gmra.mxu0 %v6983_v52  ;;  %3629 = vmatprep.mubr.bf16.mxu1 %v7030_v60  ;;  %v7914_v16 = vpop.f32.mrf.mxu1  ;;  %v7925_v28 = vld [vmem:[%s8828_s4] sm:$0x3f] }
 0x1e3   :  { %8882 = vst [vmem:[#allocation23_spill] sm:$0xff] %v7914_v16  ;;  %3742 = vmatprep.mubr.bf16.mxu0 %v7032_v61  ;;  %3796 = vmatpush1.bf16.msra.mxu1 %v6036_v41  ;;  %v7917_v1 = vpop.f32.mrf.mxu0  ;;  %8884 = vst [vmem:[#allocation25_spill] sm:$0xff] %v7925_v28  ;;  %v6044_v52 = vld [vmem:[%s8825_s3 + $0x8e4] ss:$24 sps:$4 sm:$0xff]  }
 0x1e4   :  { %8883 = vst [vmem:[#allocation24_spill] sm:$0xff] %v7917_v1  ;;  %v7927_v5 = vpop.f32.mrf.mxu1  ;;  %3797 = vmatprep.subr.bf16.mxu1 %v6041_v37  ;;  %5312 = vmatpush3.bf16.msra.mxu0 %v7901_v12  ;;  %v7936_v60 = vld [vmem:[%s8827_s5] sm:$0xff]   ;;  %v8889_v1 = vsub.s32 0, %v6811_v11 }
 0x1e5   :  { %8885 = vst [vmem:[#allocation26_spill] sm:$0xff] %v7927_v5  ;;  %8886 = vst [vmem:[#allocation27_spill] sm:$0xff] %v7936_v60  ;;  %v7938_v61 = vpop.f32.mrf.mxu0  ;;  %5313 = vmatprep.subr.bf16.mxu0 %v7910_v8  ;;  %v6042_v12 = vld [vmem:[%s8825_s3 + $0x8e0] ss:$24 sps:$4 sm:$0xff]   ;;  %v6047_v8 = vld [vmem:[%s8825_s3 + $0x8b4] ss:$24 sps:$4 sm:$0xff]  }
 0x1e6   :  { %8887 = vst [vmem:[#allocation28_spill] sm:$0xff] %v7938_v61  ;;  %v7941_v41 = vpop.f32.mrf.mxu1  ;;  %v7946_v37 = vrot.slane %v7925_v28, %v8889_v1  ;;  %v8891_v61 = vsub.s32 1, %v6811_v11 }
 0x1e7   :  { %8888 = vst [vmem:[#allocation29_spill] sm:$0xff] %v7941_v41  ;;  %3798 = vmatpush1.bf16.msra.mxu1 %v6039_v4  ;;  %v7948_v5 = vpop.f32.mrf.mxu0 }
 0x1e8   :  { %8890 = vst [vmem:[#allocation30_spill] sm:$0xff] %v7948_v5  ;;  %v2953_v16 = vpop.f32.mrf.mxu1  ;;  %3799 = vmatprep.subr.bf16.mxu1 %v6044_v52  ;;  %5314 = vmatpush3.bf16.msra.mxu0 %v7936_v60  ;;  %v7960_v1 = vrot.slane %v7925_v28, %v8891_v61 }
 0x1e9   :  { %v2954_v4 = vadd.f32 %v2953_v16, %v7946_v37  ;;  %v3066_v5 = vpop.f32.mrf.mxu0  ;;  %3630 = vmatmul.mubr.bf16.gmra.mxu1 %v7037_v62  ;;  %v6045_v16 = vld [vmem:[%s8825_s3 + $0x8b0] ss:$24 sps:$4 sm:$0xff]  }
 0x1ea   :  { %3743 = vmatmul.mubr.bf16.gmra.mxu0 %v7027_v36  ;;  %3639 = vmatprep.mubr.bf16.mxu1 %v7074_v50  ;;  %v2955_v52 = vpop.f32.mrf.mxu1  ;;  %v6050_v36 = vld [vmem:[%s8825_s3 + $0x884] ss:$24 sps:$4 sm:$0xff]  }
 0x1eb   :  { %v7966_v41 = vadd.f32 %v3066_v5, %v2954_v4  ;;  %3752 = vmatprep.mubr.bf16.mxu0 %v7076_v3  ;;  %3800 = vmatpush2.bf16.msra.mxu1 %v6042_v12  ;;  %v2956_v11 = vadd.f32 %v2955_v52, %v7960_v1  ;;  %v3068_v60 = vpop.f32.mrf.mxu0 }
 0x1ec   :  { %v2957_v61 = vpop.f32.mrf.mxu1  ;;  %3801 = vmatprep.subr.bf16.mxu1 %v6047_v8  ;;  %v6048_v8 = vld [vmem:[%s8825_s3 + $0x880] ss:$24 sps:$4 sm:$0xff]  }
 0x1ed   :  { %v7976_v62 = vadd.f32 %v3068_v60, %v2956_v11  ;;  %v2958_v50 = vadd.f32 %v2957_v61, %v7946_v37  ;;  %v3070_v5 = vpop.f32.mrf.mxu0  ;;  %v6053_v11 = vld [vmem:[%s8825_s3 + $0x854] ss:$24 sps:$4 sm:$0xff]  }
 0x1ee   :  { %v7979_v3 = vpop.f32.mrf.mxu1 }
 0x1ef   :  { %v7981_v12 = vadd.f32 %v3070_v5, %v2958_v50  ;;  %3802 = vmatpush2.bf16.msra.mxu1 %v6045_v16  ;;  %v7983_v4 = vpop.f32.mrf.mxu0 }
 0x1f0   :  { %v2963_v52 = vpop.f32.mrf.mxu1  ;;  %3803 = vmatprep.subr.bf16.mxu1 %v6050_v36 }
 0x1f1   :  { %v2964_v60 = vadd.f32 %v2963_v52, %v7946_v37  ;;  %v3076_v61 = vpop.f32.mrf.mxu0  ;;  %3640 = vmatmul.mubr.bf16.gmra.mxu1 %v7081_v6  ;;  %v6051_v52 = vld [vmem:[%s8825_s3 + $0x850] ss:$24 sps:$4 sm:$0xff]  }
 0x1f2   :  { %3753 = vmatmul.mubr.bf16.gmra.mxu0 %v7071_v59  ;;  %3649 = vmatprep.mubr.bf16.mxu1 %v7118_v29  ;;  %v2965_v16 = vpop.f32.mrf.mxu1  ;;  %v6058_v59 = vld [vmem:[%s8825_s3 + $0x824] ss:$24 sps:$4 sm:$0xff]  }
 0x1f3   :  { %v7995_v50 = vadd.f32 %v3076_v61, %v2964_v60  ;;  %3762 = vmatprep.mubr.bf16.mxu0 %v7120_v30  ;;  %3804 = vmatpush2.bf16.msra.mxu1 %v6048_v8  ;;  %v2966_v36 = vadd.f32 %v2965_v16, %v7960_v1  ;;  %v3078_v5 = vpop.f32.mrf.mxu0 }
 0x1f4   :  { %v2967_v28 = vpop.f32.mrf.mxu1  ;;  %3805 = vmatprep.subr.bf16.mxu1 %v6053_v11  ;;  %v6056_v11 = vld [vmem:[%s8825_s3 + $0x820] ss:$24 sps:$4 sm:$0xff]  }
 0x1f5   :  { %v8005_v6 = vadd.f32 %v3078_v5, %v2966_v36  ;;  %v2968_v29 = vadd.f32 %v2967_v28, %v7946_v37  ;;  %v3080_v60 = vpop.f32.mrf.mxu0  ;;  %v6063_v36 = vld [vmem:[%s8825_s3 + $0x7f4] ss:$24 sps:$4 sm:$0xff]  }
 0x1f6   :  { %v8008_v30 = vpop.f32.mrf.mxu1 }
 0x1f7   :  { %8892 = vst [vmem:[#allocation31_spill] sm:$0xff] %v8005_v6  ;;  %v8010_v8 = vadd.f32 %v3080_v60, %v2968_v29  ;;  %3806 = vmatpush2.bf16.msra.mxu1 %v6051_v52  ;;  %v8012_v61 = vpop.f32.mrf.mxu0  ;;  %v8894_v6 = vld [vmem:[#allocation3_spill] sm:$0xff] }
 0x1f8   :  { %v2973_v16 = vpop.f32.mrf.mxu1  ;;  %3807 = vmatprep.subr.bf16.mxu1 %v6058_v59 }
 0x1f9   :  { %8893 = vst [vmem:[#allocation32_spill] sm:$0xff] %v8010_v8  ;;  %v2974_v28 = vadd.f32 %v2973_v16, %v7946_v37  ;;  %v3086_v5 = vpop.f32.mrf.mxu0  ;;  %3650 = vmatmul.mubr.bf16.gmra.mxu1 %v8894_v6  ;;  %v6061_v16 = vld [vmem:[%s8825_s3 + $0x7f0] ss:$24 sps:$4 sm:$0xff]  }
 0x1fa   :  { %3763 = vmatmul.mubr.bf16.gmra.mxu0 %v7115_v20  ;;  %3659 = vmatprep.mubr.bf16.mxu1 %v7172_v39  ;;  %v2975_v52 = vpop.f32.mrf.mxu1  ;;  %v6068_v20 = vld [vmem:[%s8825_s3 + $0x7c4] ss:$24 sps:$4 sm:$0xff]  }
 0x1fb   :  { %v8024_v29 = vadd.f32 %v3086_v5, %v2974_v28  ;;  %3772 = vmatprep.mubr.bf16.mxu0 %v7174_v44  ;;  %3808 = vmatpush2.bf16.msra.mxu1 %v6056_v11  ;;  %v2976_v59 = vadd.f32 %v2975_v52, %v7960_v1  ;;  %v3088_v60 = vpop.f32.mrf.mxu0 }
 0x1fc   :  { %v2977_v8 = vpop.f32.mrf.mxu1  ;;  %3809 = vmatprep.subr.bf16.mxu1 %v6063_v36  ;;  %v6066_v36 = vld [vmem:[%s8825_s3 + $0x7c0] ss:$24 sps:$4 sm:$0xff]  }
 0x1fd   :  { %v8034_v39 = vadd.f32 %v3088_v60, %v2976_v59  ;;  %v2978_v6 = vadd.f32 %v2977_v8, %v7946_v37  ;;  %v3090_v28 = vpop.f32.mrf.mxu0  ;;  %v6073_v59 = vld [vmem:[%s8825_s3 + $0x794] ss:$24 sps:$4 sm:$0xff]  }
 0x1fe   :  { %v8037_v44 = vpop.f32.mrf.mxu1 }
 0x1ff   :  { %8895 = vst [vmem:[#allocation3_spill] sm:$0xff] %v8034_v39  ;;  %v8039_v11 = vadd.f32 %v3090_v28, %v2978_v6  ;;  %3810 = vmatpush2.bf16.msra.mxu1 %v6061_v16  ;;  %v8041_v5 = vpop.f32.mrf.mxu0 }
 0x200   :  { %8897 = vst [vmem:[#allocation34_spill] sm:$0xff] %v8041_v5  ;;  %v2983_v52 = vpop.f32.mrf.mxu1  ;;  %3811 = vmatprep.subr.bf16.mxu1 %v6068_v20 }
 0x201   :  { %8896 = vst [vmem:[#allocation33_spill] sm:$0xff] %v8039_v11  ;;  %v2984_v8 = vadd.f32 %v2983_v52, %v7946_v37  ;;  %v3096_v60 = vpop.f32.mrf.mxu0  ;;  %3660 = vmatmul.mubr.bf16.gmra.mxu1 %v7179_v43  ;;  %v6071_v11 = vld [vmem:[%s8825_s3 + $0x790] ss:$24 sps:$4 sm:$0xff]  }
 0x202   :  { %3773 = vmatmul.mubr.bf16.gmra.mxu0 %v7170_v35  ;;  %3815 = vmatprep.mubr.bf16.mxu1 %v7211_v33  ;;  %v2985_v16 = vpop.f32.mrf.mxu1  ;;  %v2916_v33 = vadd.f32 %v7746_v45, %v7960_v1  ;;  %v2920_v45 = vadd.f32 %v7773_v17, %v7960_v1 }
 0x203   :  { %v8053_v6 = vadd.f32 %v3096_v60, %v2984_v8  ;;  %3812 = vmatpush2.bf16.msra.mxu1 %v6066_v36  ;;  %v2986_v28 = vadd.f32 %v2985_v16, %v7960_v1  ;;  %v3098_v20 = vpop.f32.mrf.mxu0  ;;  %v2918_v36 = vadd.f32 %v7754_v56, %v7946_v37 }
 0x204   :  { %v2987_v39 = vpop.f32.mrf.mxu1  ;;  %3813 = vmatprep.subr.bf16.mxu1 %v6073_v59  ;;  %v2914_v59 = vadd.f32 %v7725_v9, %v7946_v37  ;;  %v3033_v17 = vadd.f32 %v7775_v47, %v2920_v45 }
 0x205   :  { %v8059_v52 = vadd.f32 %v3098_v20, %v2986_v28  ;;  %v2988_v43 = vadd.f32 %v2987_v39, %v7946_v37  ;;  %v3100_v35 = vpop.f32.mrf.mxu0 }
 0x206   :  { %v2989_v5 = vpop.f32.mrf.mxu1 }
 0x207   :  { %v8066_v8 = vadd.f32 %v3100_v35, %v2988_v43  ;;  %3814 = vmatpush2.bf16.msra.mxu1 %v6071_v11  ;;  %v8069_v60 = vadd.f32 %v2989_v5, %v7960_v1  ;;  %v8071_v16 = vpop.f32.mrf.mxu0  ;;  %v3029_v11 = vadd.f32 %v7748_v10, %v2916_v33  ;;  %v3031_v5 = vadd.f32 %v7756_v7, %v2918_v36 }
 0x208   :  { %v3139_v39 = vpop.f32.mrf.mxu1  ;;  %5491 = vmatprep.subr.bf16.mxu1 %v7720_v54  ;;  %v3027_v54 = vadd.f32 %v7727_v38, %v2914_v59  ;;  %v2928_v7 = vadd.f32 %v7810_v51, %v7946_v37  ;;  %v2924_v38 = vadd.f32 %v7780_v53, %v7946_v37  ;;  %v2930_v59 = vadd.f32 %v7829_v22, %v7960_v1 }
 0x209   :  { %v8078_v28 = vpop.f32.mrf.mxu0 }
 0x20a   :  { %3816 = vmatmul.mubr.bf16.vlgmr.msra.gmra.mxu1 %v7216_v42  ;;  %v3141_v56 = vpop.f32.mrf.mxu1  ;;  %v3140_v10 = vadd.f32 %v3139_v39, %v3027_v54  ;;  %v3037_v22 = vadd.f32 %v7791_v48, %v2924_v38 }
 0x20b   :  { %3825 = vmatprep.mubr.bf16.mxu1 %v7247_v34  ;;  %v8084_v20 = vpop.f32.mrf.mxu0  ;;  %5499 = vmatpush3.bf16.msra.mxu1 %v7736_v13  ;;  %v3142_v43 = vadd.f32 %v3141_v56, %v3029_v11  ;;  %v2926_v34 = vadd.f32 %v7802_v49, %v7960_v1  ;;  %v3041_v11 = vadd.f32 %v7821_v26, %v2928_v7 }
 0x20c   :  { %v3143_v9 = vpop.f32.mrf.mxu1  ;;  %5492 = vmatprep.subr.bf16.mxu1 %v7742_v31  ;;  %v3896_v51 = vmax.f32 %v3140_v10, 0.0 }
 0x20d   :  { %v3144_v42 = vadd.f32 %v3143_v9, %v3031_v5  ;;  %v8090_v35 = vpop.f32.mrf.mxu0  ;;  %v3897_v39 = vmax.f32 %v3142_v43, 0.0  ;;  %v2936_v43 = vadd.f32 %v7858_v19, %v7960_v1 }
 0x20e   :  { %v3145_v33 = vpop.f32.mrf.mxu1 }
 0x20f   :  { %v3146_v13 = vadd.f32 %v3145_v33, %v3033_v17  ;;  %v8096_v36 = vpop.f32.mrf.mxu0  ;;  %5500 = vmatpush3.bf16.msra.mxu1 %v7765_v40  ;;  %v3902_v31 = vmax.f32 %v3144_v42, 0.0  ;;  %v3039_v40 = vadd.f32 %v7805_v23, %v2926_v34  ;;  %v2940_v33 = vadd.f32 %v7885_v15, %v7960_v1  ;;  %v8900_v15 = vld [vmem:[#allocation15_spill] sm:$0xff] }
 0x210   :  { %v3149_v47 = vpop.f32.mrf.mxu1  ;;  %5493 = vmatprep.subr.bf16.mxu1 %v7771_v0 }
 0x211   :  { %v3903_v49 = vmax.f32 %v3146_v13, 0.0  ;;  %v8104_v45 = vpop.f32.mrf.mxu0  ;;  %v3992_v5 = vpack.c.bf16 %v3902_v31, %v3896_v51  ;;  %v3150_v26 = vadd.f32 %v3149_v47, %v3037_v22  ;;  %v8899_v47 = vld [vmem:[#allocation14_spill] sm:$0xff]  ;;  %v8901_v51 = vld [vmem:[#allocation16_spill] sm:$0xff] }
 0x212   :  { %3826 = vmatmul.mubr.bf16.gmra.mxu1 %v7252_v46  ;;  %v3151_v56 = vpop.f32.mrf.mxu1  ;;  %v3043_v46 = vadd.f32 %v7831_v32, %v2930_v59  ;;  %v2934_v32 = vadd.f32 %v7836_v58, %v7946_v37  ;;  %v8898_v58 = vld [vmem:[#allocation4_spill] sm:$0xff] }
 0x213   :  { %3835 = vmatprep.mubr.bf16.mxu1 %v7283_v2  ;;  %v8110_v53 = vpop.f32.mrf.mxu0  ;;  %v3993_v0 = vpack.c.bf16 %v3903_v49, %v3897_v39  ;;  %5501 = vmatpush3.bf16.msra.mxu1 %v7789_v27  ;;  %v3152_v9 = vadd.f32 %v3151_v56, %v3039_v40  ;;  %v2938_v27 = vadd.f32 %v7866_v24, %v7946_v37  ;;  %v3908_v24 = vmax.f32 %v3150_v26, 0.0 }
 0x214   :  { %v3153_v54 = vpop.f32.mrf.mxu1  ;;  %5494 = vmatprep.subr.bf16.mxu1 %v7798_v55  ;;  %v3047_v59 = vadd.f32 %v8900_v15, %v2934_v32  ;;  %v8912_v15 = vld [vmem:[#allocation20_spill] sm:$0xff] }
 0x215   :  { %v3154_v17 = vadd.f32 %v3153_v54, %v3041_v11  ;;  %v8116_v23 = vpop.f32.mrf.mxu0  ;;  %4463 = vmatprep.mubr.bf16.mxu0 %v3993_v0  ;;  %v3909_v34 = vmax.f32 %v3152_v9, 0.0  ;;  %v3051_v38 = vadd.f32 %v7877_v63, %v2938_v27  ;;  %v8902_v0 = vld [vmem:[#allocation23_spill] sm:$0xff]  ;;  %v8906_v27 = vld [vmem:[#allocation18_spill] sm:$0xff] }
 0x216   :  { %v3155_v2 = vpop.f32.mrf.mxu1  ;;  %4464 = vmatmul.mubr.bf16.vlgmr.msra.gmra.mxu0 %v3992_v5  ;;  %v2946_v22 = vadd.f32 %v8902_v0, %v7960_v1  ;;  %v8903_v5 = vld [vmem:[#allocation26_spill] sm:$0xff] }
 0x217   :  { %v3156_v48 = vadd.f32 %v3155_v2, %v3043_v46  ;;  %v8122_v42 = vpop.f32.mrf.mxu0  ;;  %5502 = vmatpush3.bf16.msra.mxu1 %v7819_v21  ;;  %v3914_v55 = vmax.f32 %v3154_v17, 0.0  ;;  %v3049_v21 = vadd.f32 %v7861_v14, %v2936_v43  ;;  %v2948_v54 = vadd.f32 %v8903_v5, %v7946_v37  ;;  %v8904_v17 = vld [vmem:[#allocation17_spill] sm:$0xff] }
 0x218   :  { %v3159_v10 = vpop.f32.mrf.mxu1  ;;  %5495 = vmatprep.subr.bf16.mxu1 %v7827_v25 }
 0x219   :  { %v3915_v19 = vmax.f32 %v3156_v48, 0.0  ;;  %v8130_v7 = vpop.f32.mrf.mxu0  ;;  %v3998_v39 = vpack.c.bf16 %v3914_v55, %v3908_v24  ;;  %v3160_v63 = vadd.f32 %v3159_v10, %v3047_v59  ;;  %v8907_v48 = vld [vmem:[#allocation29_spill] sm:$0xff] }
 0x21a   :  { %3836 = vmatmul.mubr.bf16.gmra.mxu1 %v7288_v57  ;;  %v3161_v13 = vpop.f32.mrf.mxu1  ;;  %v3053_v57 = vadd.f32 %v7887_v18, %v2940_v33  ;;  %v8905_v18 = vld [vmem:[#allocation19_spill] sm:$0xff]  ;;  %v2950_v32 = vadd.f32 %v8907_v48, %v7960_v1  ;;  %v8913_v59 = vld [vmem:[#allocation21_spill] sm:$0xff] }
 0x21b   :  { %3845 = vmatprep.mubr.bf16.mxu1 %v8898_v58  ;;  %v8136_v31 = vpop.f32.mrf.mxu0  ;;  %v3999_v25 = vpack.c.bf16 %v3915_v19, %v3909_v34  ;;  %5503 = vmatpush3.bf16.msra.mxu1 %v8899_v47  ;;  %v3162_v56 = vadd.f32 %v3161_v13, %v3049_v21  ;;  %v2944_v26 = vadd.f32 %v8905_v18, %v7946_v37  ;;  %v3920_v34 = vmax.f32 %v3160_v63, 0.0  ;;  %v8908_v19 = vld [vmem:[#allocation5_spill] sm:$0xff]  ;;  %v8909_v13 = vld [vmem:[#allocation24_spill] sm:$0xff]  ;;  %v8911_v37 = vld [vmem:[#allocation6_spill] sm:$0xff] }
 0x21c   :  { %v3163_v49 = vpop.f32.mrf.mxu1  ;;  %5496 = vmatprep.subr.bf16.mxu1 %v8901_v51  ;;  %v3059_v21 = vadd.f32 %v8909_v13, %v2946_v22  ;;  %v8916_v18 = vld [vmem:[#allocation27_spill] sm:$0xff] }
 0x21d   :  { %v3164_v40 = vadd.f32 %v3163_v49, %v3051_v38  ;;  %v8142_v14 = vpop.f32.mrf.mxu0  ;;  %4471 = vmatprep.mubr.bf16.mxu0 %v3999_v25  ;;  %v3921_v55 = vmax.f32 %v3162_v56, 0.0  ;;  %v8910_v38 = vld [vmem:[#allocation28_spill] sm:$0xff]  ;;  %v6082_v56 = vld [vmem:[%s8827_s5 + $0xf8] sm:$0xff]  }
 0x21e   :  { %v3165_v11 = vpop.f32.mrf.mxu1  ;;  %4472 = vmatmul.mubr.bf16.gmra.mxu0 %v3998_v39  ;;  %v3061_v58 = vadd.f32 %v8910_v38, %v2948_v54  ;;  %v3057_v39 = vadd.f32 %v8913_v59, %v2944_v26 }
 0x21f   :  { %v3166_v46 = vadd.f32 %v3165_v11, %v3053_v57  ;;  %v8148_v9 = vpop.f32.mrf.mxu0  ;;  %5504 = vmatpush3.bf16.msra.mxu1 %v8904_v17  ;;  %v3926_v2 = vmax.f32 %v3164_v40, 0.0  ;;  %v8914_v57 = vld [vmem:[#allocation22_spill] sm:$0xff] }
 0x220   :  { %v3169_v43 = vpop.f32.mrf.mxu1  ;;  %5497 = vmatprep.subr.bf16.mxu1 %v8906_v27  ;;  %v8915_v40 = vld [vmem:[#allocation30_spill] sm:$0xff]  ;;  %v2960_v27 = vadd.f32 %v7979_v3, %v7960_v1 }
 0x221   :  { %v3927_v10 = vmax.f32 %v3166_v46, 0.0  ;;  %v8156_v33 = vpop.f32.mrf.mxu0  ;;  %v4004_v49 = vpack.c.bf16 %v3926_v2, %v3920_v34  ;;  %v3063_v63 = vadd.f32 %v8915_v40, %v2950_v32  ;;  %v3170_v5 = vadd.f32 %v3169_v43, %v3057_v39  ;;  %v8917_v34 = vld [vmem:[#allocation7_spill] sm:$0xff] }
 0x222   :  { %3846 = vmatmul.mubr.bf16.gmra.mxu1 %v8908_v19  ;;  %v3171_v24 = vpop.f32.mrf.mxu1 }
 0x223   :  { %3855 = vmatprep.mubr.bf16.mxu1 %v8911_v37  ;;  %v8162_v25 = vpop.f32.mrf.mxu0  ;;  %v4005_v47 = vpack.c.bf16 %v3927_v10, %v3921_v55  ;;  %5505 = vmatpush3.bf16.msra.mxu1 %v8912_v15  ;;  %v3172_v11 = vadd.f32 %v3171_v24, %v3059_v21  ;;  %v3932_v10 = vmax.f32 %v3170_v5, 0.0  ;;  %v8918_v24 = vld [vmem:[#allocation8_spill] sm:$0xff]  ;;  %v3073_v37 = vadd.f32 %v7983_v4, %v2960_v27  ;;  %v8920_v5 = vld [vmem:[#allocation10_spill] sm:$0xff] }
 0x224   :  { %v3173_v51 = vpop.f32.mrf.mxu1  ;;  %5498 = vmatprep.subr.bf16.mxu1 %v8914_v57  ;;  %v8922_v27 = vld [vmem:[#allocation32_spill] sm:$0xff] }
 0x225   :  { %v3174_v0 = vadd.f32 %v3173_v51, %v3061_v58  ;;  %v8171_v22 = vpop.f32.mrf.mxu0  ;;  %4479 = vmatprep.mubr.bf16.mxu0 %v4005_v47  ;;  %v3933_v48 = vmax.f32 %v3172_v11, 0.0 }
 0x226   :  { %v3175_v54 = vpop.f32.mrf.mxu1  ;;  %4480 = vmatmul.mubr.bf16.gmra.mxu0 %v4004_v49 }
 0x227   :  { %v3176_v46 = vadd.f32 %v3175_v54, %v3063_v63  ;;  %v8173_v17 = vpop.f32.mrf.mxu0  ;;  %5506 = vmatpush3.bf16.msra.mxu1 %v8916_v18  ;;  %v3938_v26 = vmax.f32 %v3174_v0, 0.0 }
 0x228   :  { %v3179_v2 = vpop.f32.mrf.mxu1  ;;  %5363 = vmatprep.subr.bf16.mxu1 %v6082_v56  ;;  %v2970_v56 = vadd.f32 %v8008_v30, %v7960_v1  ;;  %v8921_v30 = vld [vmem:[#allocation31_spill] sm:$0xff] }
 0x229   :  { %v3939_v32 = vmax.f32 %v3176_v46, 0.0  ;;  %v8178_v55 = vpop.f32.mrf.mxu0  ;;  %v3180_v19 = vadd.f32 %v3179_v2, %v7966_v41  ;;  %v4010_v38 = vpack.c.bf16 %v3938_v26, %v3932_v10 }
 0x22a   :  { %3856 = vmatmul.mubr.bf16.gmra.mxu1 %v8917_v34  ;;  %v3181_v43 = vpop.f32.mrf.mxu1  ;;  %v3083_v26 = vadd.f32 %v8012_v61, %v2970_v56  ;;  %v6098_v34 = vld [vmem:[%s8827_s5 + $0x178] sm:$0xff]  }
 0x22b   :  { %3865 = vmatprep.mubr.bf16.mxu1 %v8918_v24  ;;  %v8183_v13 = vpop.f32.mrf.mxu0  ;;  %v4011_v21 = vpack.c.bf16 %v3939_v32, %v3933_v48  ;;  %v3182_v3 = vadd.f32 %v3181_v43, %v7976_v62  ;;  %v3944_v39 = vmax.f32 %v3180_v19, 0.0  ;;  %v6099_v61 = vld [vmem:[%s8827_s5 + $0x138] sm:$0xff]   ;;  %5427 = vmatprep.subr.bf16.mxu0 %v6098_v34  ;;  %v6103_v34 = vld [vmem:[%s8827_s5 + $0x128] sm:$0xff]  }
 0x22c   :  { %v3183_v58 = vpop.f32.mrf.mxu1  ;;  %5428 = vmatpush3.bf16.msra.mxu0 %v6099_v61 }
 0x22d   :  { %v3184_v47 = vadd.f32 %v3183_v58, %v7981_v12  ;;  %v8188_v15 = vpop.f32.mrf.mxu0  ;;  %4487 = vmatprep.mubr.bf16.mxu0 %v4011_v21  ;;  %v3945_v40 = vmax.f32 %v3182_v3, 0.0  ;;  %v8919_v12 = vld [vmem:[#allocation9_spill] sm:$0xff] }
 0x22e   :  { %v3185_v59 = vpop.f32.mrf.mxu1  ;;  %4488 = vmatmul.mubr.bf16.gmra.mxu0 %v4010_v38  ;;  %v2980_v38 = vadd.f32 %v8037_v44, %v7960_v1  ;;  %v6101_v44 = vld [vmem:[%s8827_s5 + $0x130] sm:$0xff]  }
 0x22f   :  { %v3950_v41 = vmax.f32 %v3184_v47, 0.0  ;;  %v3186_v49 = vadd.f32 %v3185_v59, %v3073_v37  ;;  %v8190_v51 = vpop.f32.mrf.mxu0  ;;  %v8923_v59 = vld [vmem:[#allocation11_spill] sm:$0xff] }
 0x230   :  { %v3189_v57 = vpop.f32.mrf.mxu1 }
 0x231   :  { %v8194_v4 = vpack.c.bf16 %v3950_v41, %v3944_v39  ;;  %v3951_v62 = vmax.f32 %v3186_v49, 0.0  ;;  %v8196_v63 = vpop.f32.mrf.mxu0  ;;  %v3190_v0 = vadd.f32 %v3189_v57, %v7995_v50  ;;  %v6100_v41 = vld [vmem:[%s8827_s5 + $0x170] sm:$0xff]  }
 0x232   :  { %3866 = vmatmul.mubr.bf16.gmra.mxu1 %v8919_v12  ;;  %v3191_v11 = vpop.f32.mrf.mxu1  ;;  %v8924_v57 = vld [vmem:[#allocation12_spill] sm:$0xff]  ;;  %5429 = vmatprep.subr.bf16.mxu0 %v6100_v41  ;;  %v8931_v41 = vld [vmem:[#allocation25_spill] sm:$0xff] }
 0x233   :  { %3875 = vmatprep.mubr.bf16.mxu1 %v8920_v5  ;;  %v8201_v54 = vpop.f32.mrf.mxu0  ;;  %v4017_v46 = vpack.c.bf16 %v3951_v62, %v3945_v40  ;;  %v3192_v2 = vadd.f32 %v3191_v11, %v8921_v30  ;;  %v3956_v50 = vmax.f32 %v3190_v0, 0.0  ;;  %v8925_v62 = vld [vmem:[#allocation34_spill] sm:$0xff]  ;;  %v8926_v11 = vld [vmem:[#allocation3_spill] sm:$0xff]  ;;  %v8927_v5 = vld [vmem:[#allocation33_spill] sm:$0xff]  ;;  %5430 = vmatpush3.bf16.msra.mxu0 %v6101_v44 }
 0x234   :  { %v3193_v18 = vpop.f32.mrf.mxu1  ;;  %v3093_v12 = vadd.f32 %v8925_v62, %v2980_v38  ;;  %v6102_v30 = vld [vmem:[%s8827_s5 + $0x168] sm:$0xff]   ;;  %v8928_v38 = vld [vmem:[#allocation13_spill] sm:$0xff]  ;;  %v6105_v62 = vld [vmem:[%s8827_s5 + $0x120] sm:$0xff]  }
 0x235   :  { %v3194_v48 = vadd.f32 %v3193_v18, %v8922_v27  ;;  %v8206_v32 = vpop.f32.mrf.mxu0  ;;  %v3957_v58 = vmax.f32 %v3192_v2, 0.0  ;;  %5431 = vmatprep.subr.bf16.mxu0 %v6102_v30 }
 0x236   :  { %v3195_v10 = vpop.f32.mrf.mxu1 }
 0x237   :  { %v3962_v43 = vmax.f32 %v3194_v48, 0.0  ;;  %v3196_v19 = vadd.f32 %v3195_v10, %v3083_v26  ;;  %v8211_v24 = vpop.f32.mrf.mxu0  ;;  %5432 = vmatpush3.bf16.msra.mxu0 %v6103_v34 }
 0x238   :  { %v3199_v21 = vpop.f32.mrf.mxu1 }
 0x239   :  { %v8218_v37 = vpack.c.bf16 %v3962_v43, %v3956_v50  ;;  %v3963_v3 = vmax.f32 %v3196_v19, 0.0  ;;  %v8220_v47 = vpop.f32.mrf.mxu0  ;;  %v3200_v49 = vadd.f32 %v3199_v21, %v8024_v29 }
 0x23a   :  { %3876 = vmatmul.mubr.bf16.gmra.mxu1 %v8923_v59  ;;  %v3201_v39 = vpop.f32.mrf.mxu1  ;;  %v8929_v59 = vld [vmem:[#allocation2_spill] sm:$0xff] }
 0x23b   :  { %3885 = vmatprep.mubr.bf16.mxu1 %v8924_v57  ;;  %v8228_v56 = vpop.f32.mrf.mxu0  ;;  %v4023_v1 = vpack.c.bf16 %v3963_v3, %v3957_v58  ;;  %v3202_v0 = vadd.f32 %v3201_v39, %v8926_v11  ;;  %v3968_v2 = vmax.f32 %v3200_v49, 0.0  ;;  %v6104_v3 = vld [vmem:[%s8827_s5 + $0x160] sm:$0xff]   ;;  %v8930_v39 = vsub.s32 2, %v8929_v59 }
 0x23c   :  { %v3203_v40 = vpop.f32.mrf.mxu1  ;;  %5433 = vmatprep.subr.bf16.mxu0 %v6104_v3  ;;  %v3103_v11 = vadd.f32 %v8071_v16, %v8069_v60  ;;  %v6084_v16 = vld [vmem:[%s8827_s5 + $0xf0] sm:$0xff]  }
 0x23d   :  { %v3204_v18 = vadd.f32 %v3203_v40, %v8927_v5  ;;  %v8236_v26 = vpop.f32.mrf.mxu0  ;;  %v3969_v43 = vmax.f32 %v3202_v0, 0.0  ;;  %v8257_v49 = vrot.slane %v8931_v41, %v8930_v39  ;;  %5434 = vmatpush3.bf16.msra.mxu0 %v6105_v62 }
 0x23e   :  { %v3205_v29 = vpop.f32.mrf.mxu1 }
 0x23f   :  { %v3974_v27 = vmax.f32 %v3204_v18, 0.0  ;;  %v3206_v48 = vadd.f32 %v3205_v29, %v3093_v12  ;;  %v8241_v10 = vpop.f32.mrf.mxu0  ;;  %v3253_v29 = vadd.f32 %v8078_v28, %v8257_v49  ;;  %v3257_v3 = vadd.f32 %v8090_v35, %v8257_v49  ;;  %v6086_v35 = vld [vmem:[%s8827_s5 + $0xe8] sm:$0xff]  }
 0x240   :  { %v3209_v50 = vpop.f32.mrf.mxu1 }
 0x241   :  { %v8246_v19 = vpack.c.bf16 %v3974_v27, %v3968_v2  ;;  %v3975_v61 = vmax.f32 %v3206_v48, 0.0  ;;  %v8248_v21 = vpop.f32.mrf.mxu0  ;;  %v3210_v57 = vadd.f32 %v3209_v50, %v8053_v6 }
 0x242   :  { %3886 = vmatmul.mubr.bf16.gmra.mxu1 %v8928_v38  ;;  %v3211_v58 = vpop.f32.mrf.mxu1 }
 0x243   :  { %4495 = vmatprep.mubr.bf16.mxu1 %v4017_v46  ;;  %v8260_v44 = vpop.f32.mrf.mxu0  ;;  %v8262_v40 = vpack.c.bf16 %v3975_v61, %v3969_v43  ;;  %v3212_v0 = vadd.f32 %v3211_v58, %v8059_v52  ;;  %v6106_v46 = vld [vmem:[%s8827_s5 + $0x158] sm:$0xff]   ;;  %v3980_v30 = vmax.f32 %v3210_v57, 0.0  ;;  %v6108_v58 = vld [vmem:[%s8827_s5 + $0x150] sm:$0xff]  }
 0x244   :  { %v3213_v12 = vpop.f32.mrf.mxu1  ;;  %v6083_v52 = vld [vmem:[%s8827_s5 + $0xb8] sm:$0xff]   ;;  %5435 = vmatprep.subr.bf16.mxu0 %v6106_v46  ;;  %v6085_v57 = vld [vmem:[%s8827_s5 + $0xb0] sm:$0xff]   ;;  %v3263_v46 = vadd.f32 %v8104_v45, %v8257_v49  ;;  %v6088_v45 = vld [vmem:[%s8827_s5 + $0xe0] sm:$0xff]  }
 0x245   :  { %v3214_v5 = vadd.f32 %v3213_v12, %v8066_v8  ;;  %v8271_v18 = vpop.f32.mrf.mxu0  ;;  %v6107_v8 = vld [vmem:[%s8827_s5 + $0x118] sm:$0xff]   ;;  %v3981_v28 = vmax.f32 %v3212_v0, 0.0 }
 0x246   :  { %v3215_v6 = vpop.f32.mrf.mxu1  ;;  %5436 = vmatpush3.bf16.msra.mxu0 %v6107_v8 }
 0x247   :  { %v3986_v2 = vmax.f32 %v3214_v5, 0.0  ;;  %v3216_v27 = vadd.f32 %v3215_v6, %v3103_v11  ;;  %v8278_v48 = vpop.f32.mrf.mxu0  ;;  %5437 = vmatprep.subr.bf16.mxu0 %v6108_v58  ;;  %v6110_v6 = vld [vmem:[%s8827_s5 + $0x148] sm:$0xff]  }
 0x248   :  { %v3365_v60 = vpop.f32.mrf.mxu1 }
 0x249   :  { %v8289_v34 = vpack.c.bf16 %v3986_v2, %v3980_v30  ;;  %v3987_v50 = vmax.f32 %v3216_v27, 0.0  ;;  %v3366_v43 = vadd.f32 %v3365_v60, %v3253_v29  ;;  %v3478_v61 = vpop.f32.mrf.mxu0  ;;  %v6087_v2 = vld [vmem:[%s8827_s5 + $0xa8] sm:$0xff]  }
 0x24a   :  { %4496 = vmatmul.mubr.bf16.vlgmr.msra.gmra.mxu1 %v8194_v4  ;;  %v3367_v38 = vpop.f32.mrf.mxu1  ;;  %v6109_v4 = vld [vmem:[%s8827_s5 + $0x110] sm:$0xff]   ;;  %v6111_v27 = vld [vmem:[%s8827_s5 + $0x108] sm:$0xff]  }
 0x24b   :  { %4503 = vmatprep.mubr.bf16.mxu1 %v4023_v1  ;;  %5364 = vmatpush3.bf16.msra.mxu1 %v6083_v52  ;;  %v8297_v39 = vpop.f32.mrf.mxu0  ;;  %v8302_v62 = vpack.c.bf16 %v3987_v50, %v3981_v28  ;;  %v3479_v1 = vadd.f32 %v3478_v61, %v3366_v43  ;;  %v8932_v52 = vsub.s32 3, %v8929_v59 }
 0x24c   :  { %v3369_v12 = vpop.f32.mrf.mxu1  ;;  %5365 = vmatprep.subr.bf16.mxu1 %v6084_v16  ;;  %5438 = vmatpush3.bf16.msra.mxu0 %v6109_v4 }
 0x24d   :  { %v3370_v11 = vadd.f32 %v3369_v12, %v3257_v3  ;;  %v3482_v0 = vpop.f32.mrf.mxu0  ;;  %v8324_v8 = vrot.slane %v8931_v41, %v8932_v52  ;;  %5439 = vmatprep.subr.bf16.mxu0 %v6110_v6  ;;  %v3898_v16 = vmax.f32 %v3479_v1, 0.0  ;;  %v6112_v41 = vld [vmem:[%s8827_s5 + $0x140] sm:$0xff]   ;;  %v3267_v3 = vadd.f32 %v8116_v23, %v8257_v49 }
 0x24e   :  { %v3371_v5 = vpop.f32.mrf.mxu1 }
 0x24f   :  { %v3483_v29 = vadd.f32 %v3482_v0, %v3370_v11  ;;  %5366 = vmatpush3.bf16.msra.mxu1 %v6085_v57  ;;  %v3484_v30 = vpop.f32.mrf.mxu0  ;;  %v3259_v61 = vadd.f32 %v8096_v36, %v8324_v8  ;;  %v6089_v36 = vld [vmem:[%s8827_s5 + $0xa0] sm:$0xff]   ;;  %v3255_v12 = vadd.f32 %v8084_v20, %v8324_v8 }
 0x250   :  { %v3375_v60 = vpop.f32.mrf.mxu1  ;;  %5367 = vmatprep.subr.bf16.mxu1 %v6086_v35  ;;  %5440 = vmatpush3.bf16.msra.mxu0 %v6111_v27 }
 0x251   :  { %v3904_v28 = vmax.f32 %v3483_v29, 0.0  ;;  %v3376_v50 = vadd.f32 %v3375_v60, %v3263_v46  ;;  %v3488_v43 = vpop.f32.mrf.mxu0  ;;  %v3372_v35 = vadd.f32 %v3371_v5, %v3259_v61  ;;  %5441 = vmatprep.subr.bf16.mxu0 %v6112_v41  ;;  %v3368_v6 = vadd.f32 %v3367_v38, %v3255_v12  ;;  %v6091_v5 = vld [vmem:[%s8827_s5 + $0x98] sm:$0xff]   ;;  %v6092_v60 = vld [vmem:[%s8827_s5 + $0xd0] sm:$0xff]  }
 0x252   :  { %4504 = vmatmul.mubr.bf16.gmra.mxu1 %v8218_v37  ;;  %v3377_v58 = vpop.f32.mrf.mxu1  ;;  %v6113_v37 = vld [vmem:[%s8827_s5 + $0x100] sm:$0xff]   ;;  %v3273_v29 = vadd.f32 %v8130_v7, %v8257_v49 }
 0x253   :  { %v8337_v57 = vpack.c.bf16 %v3904_v28, %v3898_v16  ;;  %4511 = vmatprep.mubr.bf16.mxu1 %v8262_v40  ;;  %5368 = vmatpush3.bf16.msra.mxu1 %v6087_v2  ;;  %v8340_v4 = vpop.f32.mrf.mxu0  ;;  %v6090_v40 = vld [vmem:[%s8827_s5 + $0xd8] sm:$0xff]   ;;  %v3489_v1 = vadd.f32 %v3488_v43, %v3376_v50  ;;  %v3485_v27 = vadd.f32 %v3484_v30, %v3372_v35 }
 0x254   :  { %v3379_v23 = vpop.f32.mrf.mxu1  ;;  %5369 = vmatprep.subr.bf16.mxu1 %v6088_v45  ;;  %5442 = vmatpush3.bf16.msra.mxu0 %v6113_v37  ;;  %v3481_v7 = vadd.f32 %v8297_v39, %v3368_v6  ;;  %v3269_v43 = vadd.f32 %v8122_v42, %v8324_v8  ;;  %v3277_v30 = vadd.f32 %v8142_v14, %v8257_v49  ;;  %v6094_v42 = vld [vmem:[%s8827_s5 + $0xc8] sm:$0xff]  }
 0x255   :  { %v3380_v11 = vadd.f32 %v3379_v23, %v3267_v3  ;;  %v3492_v0 = vpop.f32.mrf.mxu0  ;;  %v3910_v45 = vmax.f32 %v3489_v1, 0.0  ;;  %v6093_v3 = vld [vmem:[%s8827_s5 + $0x90] sm:$0xff]   ;;  %v3905_v39 = vmax.f32 %v3485_v27, 0.0  ;;  %v3265_v14 = vadd.f32 %v8110_v53, %v8324_v8  ;;  %v6095_v6 = vld [vmem:[%s8827_s5 + $0x88] sm:$0xff]   ;;  %v6096_v53 = vld [vmem:[%s8827_s5 + $0xc0] sm:$0xff]  }
 0x256   :  { %v3381_v46 = vpop.f32.mrf.mxu1  ;;  %v3899_v35 = vmax.f32 %v3481_v7, 0.0 }
 0x257   :  { %v3493_v2 = vadd.f32 %v3492_v0, %v3380_v11  ;;  %5370 = vmatpush3.bf16.msra.mxu1 %v6089_v36  ;;  %v3494_v20 = vpop.f32.mrf.mxu0  ;;  %v3378_v1 = vadd.f32 %v3377_v58, %v3265_v14  ;;  %v3279_v58 = vadd.f32 %v8148_v9, %v8324_v8  ;;  %v3275_v9 = vadd.f32 %v8136_v31, %v8324_v8 }
 0x258   :  { %v3385_v52 = vpop.f32.mrf.mxu1  ;;  %5371 = vmatprep.subr.bf16.mxu1 %v6090_v40  ;;  %v3283_v40 = vadd.f32 %v8156_v33, %v8257_v49 }
 0x259   :  { %v3916_v38 = vmax.f32 %v3493_v2, 0.0  ;;  %v3386_v16 = vadd.f32 %v3385_v52, %v3273_v29  ;;  %v3498_v28 = vpop.f32.mrf.mxu0  ;;  %v3995_v29 = vpack.c.bf16 %v3905_v39, %v3899_v35 }
 0x25a   :  { %4512 = vmatmul.mubr.bf16.gmra.mxu1 %v8246_v19  ;;  %v3387_v50 = vpop.f32.mrf.mxu1  ;;  %v3382_v19 = vadd.f32 %v3381_v46, %v3269_v43 }
 0x25b   :  { %v8367_v61 = vpack.c.bf16 %v3916_v38, %v3910_v45  ;;  %4519 = vmatprep.mubr.bf16.mxu1 %v8302_v62  ;;  %5372 = vmatpush3.bf16.msra.mxu1 %v6091_v5  ;;  %v3500_v41 = vpop.f32.mrf.mxu0  ;;  %v3499_v37 = vadd.f32 %v3498_v28, %v3386_v16  ;;  %v3287_v45 = vadd.f32 %v8171_v22, %v8257_v49  ;;  %v6097_v28 = vld [vmem:[%s8827_s5 + $0x80] sm:$0xff]  }
 0x25c   :  { %v3389_v36 = vpop.f32.mrf.mxu1  ;;  %5373 = vmatprep.subr.bf16.mxu1 %v6092_v60  ;;  %v3495_v46 = vadd.f32 %v3494_v20, %v3382_v19  ;;  %v3491_v38 = vadd.f32 %v8340_v4, %v3378_v1  ;;  %v3388_v4 = vadd.f32 %v3387_v50, %v3275_v9  ;;  %v3289_v50 = vadd.f32 %v8173_v17, %v8324_v8 }
 0x25d   :  { %v3390_v12 = vadd.f32 %v3389_v36, %v3277_v30  ;;  %v3502_v62 = vpop.f32.mrf.mxu0  ;;  %v3922_v5 = vmax.f32 %v3499_v37, 0.0  ;;  %v3293_v36 = vadd.f32 %v8178_v55, %v8257_v49  ;;  %v3297_v55 = vadd.f32 %v8188_v15, %v8257_v49 }
 0x25e   :  { %v3391_v23 = vpop.f32.mrf.mxu1  ;;  %v3917_v43 = vmax.f32 %v3495_v46, 0.0  ;;  %v3501_v1 = vadd.f32 %v3500_v41, %v3388_v4  ;;  %v3303_v17 = vadd.f32 %v8196_v63, %v8257_v49  ;;  %v3295_v4 = vadd.f32 %v8183_v13, %v8324_v8 }
 0x25f   :  { %v3503_v11 = vadd.f32 %v3502_v62, %v3390_v12  ;;  %5374 = vmatpush3.bf16.msra.mxu1 %v6093_v3  ;;  %v3504_v0 = vpop.f32.mrf.mxu0  ;;  %v3392_v7 = vadd.f32 %v3391_v23, %v3279_v58 }
 0x260   :  { %v3395_v2 = vpop.f32.mrf.mxu1  ;;  %5375 = vmatprep.subr.bf16.mxu1 %v6094_v42  ;;  %v3911_v42 = vmax.f32 %v3491_v38, 0.0 }
 0x261   :  { %v3928_v27 = vmax.f32 %v3503_v11, 0.0  ;;  %v3396_v52 = vadd.f32 %v3395_v2, %v3283_v40  ;;  %v3508_v33 = vpop.f32.mrf.mxu0  ;;  %v3505_v37 = vadd.f32 %v3504_v0, %v3392_v7 }
 0x262   :  { %4520 = vmatmul.mubr.bf16.gmra.mxu1 %v8289_v34  ;;  %v3397_v60 = vpop.f32.mrf.mxu1  ;;  %v4001_v62 = vpack.c.bf16 %v3917_v43, %v3911_v42 }
 0x263   :  { %v8392_v16 = vpack.c.bf16 %v3928_v27, %v3922_v5  ;;  %5376 = vmatpush3.bf16.msra.mxu1 %v6095_v6  ;;  %4560 = vmatprep.mubr.bf16.mxu1 %v3995_v29  ;;  %v3510_v20 = vpop.f32.mrf.mxu0  ;;  %v3509_v30 = vadd.f32 %v3508_v33, %v3396_v52  ;;  %v3929_v29 = vmax.f32 %v3505_v37, 0.0  ;;  %v3923_v27 = vmax.f32 %v3501_v1, 0.0 }
 0x264   :  { %v3399_v34 = vpop.f32.mrf.mxu1  ;;  %5377 = vmatprep.subr.bf16.mxu1 %v6096_v53  ;;  %v3285_v53 = vadd.f32 %v8162_v25, %v8324_v8  ;;  %v3299_v25 = vadd.f32 %v8190_v51, %v8324_v8 }
 0x265   :  { %v3400_v22 = vadd.f32 %v3399_v34, %v3287_v45  ;;  %v3512_v3 = vpop.f32.mrf.mxu0  ;;  %v3934_v31 = vmax.f32 %v3509_v30, 0.0  ;;  %v4007_v45 = vpack.c.bf16 %v3929_v29, %v3923_v27 }
 0x266   :  { %v3401_v39 = vpop.f32.mrf.mxu1  ;;  %v3398_v33 = vadd.f32 %v3397_v60, %v3285_v53 }
 0x267   :  { %v3513_v14 = vadd.f32 %v3512_v3, %v3400_v22  ;;  %5378 = vmatpush3.bf16.msra.mxu1 %v6097_v28  ;;  %v3514_v19 = vpop.f32.mrf.mxu0  ;;  %v3402_v46 = vadd.f32 %v3401_v39, %v3289_v50  ;;  %v3307_v22 = vadd.f32 %v8206_v32, %v8257_v49 }
 0x268   :  { %v3405_v12 = vpop.f32.mrf.mxu1  ;;  %v3511_v63 = vadd.f32 %v3510_v20, %v3398_v33 }
 0x269   :  { %v3940_v35 = vmax.f32 %v3513_v14, 0.0  ;;  %v3406_v23 = vadd.f32 %v3405_v12, %v3293_v36  ;;  %v3518_v40 = vpop.f32.mrf.mxu0  ;;  %v3515_v28 = vadd.f32 %v3514_v19, %v3402_v46  ;;  %v3313_v12 = vadd.f32 %v8220_v47, %v8257_v49 }
 0x26a   :  { %4561 = vmatmul.mubr.bf16.vlgmr.msra.gmra.mxu1 %v8337_v57  ;;  %v3407_v11 = vpop.f32.mrf.mxu1  ;;  %v3935_v32 = vmax.f32 %v3511_v63, 0.0  ;;  %v3317_v47 = vadd.f32 %v8236_v26, %v8257_v49  ;;  %v3315_v63 = vadd.f32 %v8228_v56, %v8324_v8  ;;  %v3329_v56 = vadd.f32 %v8278_v48, %v8324_v8 }
 0x26b   :  { %v8406_v6 = vpack.c.bf16 %v3940_v35, %v3934_v31  ;;  %4568 = vmatprep.mubr.bf16.mxu1 %v4001_v62  ;;  %v3520_v0 = vpop.f32.mrf.mxu0  ;;  %v3519_v41 = vadd.f32 %v3518_v40, %v3406_v23  ;;  %v3941_v42 = vmax.f32 %v3515_v28, 0.0  ;;  %v3408_v37 = vadd.f32 %v3407_v11, %v3295_v4 }
 0x26c   :  { %v3409_v2 = vpop.f32.mrf.mxu1  ;;  %v3309_v11 = vadd.f32 %v8211_v24, %v8324_v8  ;;  %v3323_v24 = vadd.f32 %v8248_v21, %v8257_v49 }
 0x26d   :  { %v3410_v5 = vadd.f32 %v3409_v2, %v3297_v55  ;;  %v3522_v57 = vpop.f32.mrf.mxu0  ;;  %v3946_v9 = vmax.f32 %v3519_v41, 0.0  ;;  %v4013_v23 = vpack.c.bf16 %v3941_v42, %v3935_v32  ;;  %v3521_v55 = vadd.f32 %v3520_v0, %v3408_v37 }
 0x26e   :  { %v3411_v52 = vpop.f32.mrf.mxu1 }
 0x26f   :  { %v3523_v15 = vadd.f32 %v3522_v57, %v3410_v5  ;;  %v3524_v58 = vpop.f32.mrf.mxu0  ;;  %v3412_v39 = vadd.f32 %v3411_v52, %v3299_v25  ;;  %v3305_v5 = vadd.f32 %v8201_v54, %v8324_v8  ;;  %v3947_v52 = vmax.f32 %v3521_v55, 0.0 }
 0x270   :  { %v3415_v38 = vpop.f32.mrf.mxu1  ;;  %v3327_v25 = vadd.f32 %v8271_v18, %v8257_v49 }
 0x271   :  { %v3952_v7 = vmax.f32 %v3523_v15, 0.0  ;;  %v3416_v34 = vadd.f32 %v3415_v38, %v3303_v17  ;;  %v3528_v43 = vpop.f32.mrf.mxu0  ;;  %v3525_v31 = vadd.f32 %v3524_v58, %v3412_v39 }
 0x272   :  { %4569 = vmatmul.mubr.bf16.gmra.mxu1 %v8367_v61  ;;  %v3417_v30 = vpop.f32.mrf.mxu1 }
 0x273   :  { %v8417_v60 = vpack.c.bf16 %v3952_v7, %v3946_v9  ;;  %4576 = vmatprep.mubr.bf16.mxu1 %v4007_v45  ;;  %v3530_v3 = vpop.f32.mrf.mxu0  ;;  %v3529_v14 = vadd.f32 %v3528_v43, %v3416_v34  ;;  %v3953_v46 = vmax.f32 %v3525_v31, 0.0  ;;  %v3418_v33 = vadd.f32 %v3417_v30, %v3305_v5 }
 0x274   :  { %v3419_v36 = vpop.f32.mrf.mxu1  ;;  %v3319_v43 = vadd.f32 %v8241_v10, %v8324_v8 }
 0x275   :  { %v3420_v19 = vadd.f32 %v3419_v36, %v3307_v22  ;;  %v3532_v51 = vpop.f32.mrf.mxu0  ;;  %v3958_v40 = vmax.f32 %v3529_v14, 0.0  ;;  %v4019_v58 = vpack.c.bf16 %v3953_v46, %v3947_v52  ;;  %v3531_v21 = vadd.f32 %v3530_v3, %v3418_v33 }
 0x276   :  { %v3421_v61 = vpop.f32.mrf.mxu1 }
 0x277   :  { %v3533_v20 = vadd.f32 %v3532_v51, %v3420_v19  ;;  %v3534_v62 = vpop.f32.mrf.mxu0  ;;  %v3422_v57 = vadd.f32 %v3421_v61, %v3309_v11  ;;  %v3959_v51 = vmax.f32 %v3531_v21, 0.0 }
 0x278   :  { %v3425_v35 = vpop.f32.mrf.mxu1 }
 0x279   :  { %v3964_v1 = vmax.f32 %v3533_v20, 0.0  ;;  %v3426_v13 = vadd.f32 %v3425_v35, %v3313_v12  ;;  %v3538_v50 = vpop.f32.mrf.mxu0  ;;  %v3535_v38 = vadd.f32 %v3534_v62, %v3422_v57 }
 0x27a   :  { %4577 = vmatmul.mubr.bf16.gmra.mxu1 %v8392_v16  ;;  %v3427_v29 = vpop.f32.mrf.mxu1 }
 0x27b   :  { %v8428_v2 = vpack.c.bf16 %v3964_v1, %v3958_v40  ;;  %4584 = vmatprep.mubr.bf16.mxu1 %v4013_v23  ;;  %v3540_v53 = vpop.f32.mrf.mxu0  ;;  %v3539_v0 = vadd.f32 %v3538_v50, %v3426_v13  ;;  %v3965_v39 = vmax.f32 %v3535_v38, 0.0  ;;  %v3428_v37 = vadd.f32 %v3427_v29, %v3315_v63 }
 0x27c   :  { %v3429_v41 = vpop.f32.mrf.mxu1  ;;  %v3325_v23 = vadd.f32 %v8260_v44, %v8324_v8 }
 0x27d   :  { %v3430_v27 = vadd.f32 %v3429_v41, %v3317_v47  ;;  %v3542_v16 = vpop.f32.mrf.mxu0  ;;  %v3970_v28 = vmax.f32 %v3539_v0, 0.0  ;;  %v4025_v12 = vpack.c.bf16 %v3965_v39, %v3959_v51  ;;  %v3541_v62 = vadd.f32 %v3540_v53, %v3428_v37 }
 0x27e   :  { %v3431_v17 = vpop.f32.mrf.mxu1 }
 0x27f   :  { %v3543_v26 = vadd.f32 %v3542_v16, %v3430_v27  ;;  %v3544_v15 = vpop.f32.mrf.mxu0  ;;  %v3432_v36 = vadd.f32 %v3431_v17, %v3319_v43  ;;  %v3971_v55 = vmax.f32 %v3541_v62, 0.0 }
 0x280   :  { %v3435_v45 = vpop.f32.mrf.mxu1 }
 0x281   :  { %v3976_v9 = vmax.f32 %v3543_v26, 0.0  ;;  %v3436_v7 = vadd.f32 %v3435_v45, %v3323_v24  ;;  %v3548_v34 = vpop.f32.mrf.mxu0  ;;  %v3545_v49 = vadd.f32 %v3544_v15, %v3432_v36 }
 0x282   :  { %4585 = vmatmul.mubr.bf16.gmra.mxu1 %v8406_v6  ;;  %v3437_v54 = vpop.f32.mrf.mxu1 }
 0x283   :  { %v4030_v30 = vpack.c.bf16 %v3976_v9, %v3970_v28  ;;  %4592 = vmatprep.mubr.bf16.mxu1 %v4019_v58  ;;  %v3550_v22 = vpop.f32.mrf.mxu0  ;;  %v3549_v42 = vadd.f32 %v3548_v34, %v3436_v7  ;;  %v3977_v40 = vmax.f32 %v3545_v49, 0.0  ;;  %v3438_v29 = vadd.f32 %v3437_v54, %v3325_v23 }
 0x284   :  { %v3439_v4 = vpop.f32.mrf.mxu1  ;;  %v8934_v49 = vsub.s32 5, %v8929_v59 }
 0x285   :  { %v3440_v14 = vadd.f32 %v3439_v4, %v3327_v25  ;;  %v3552_v6 = vpop.f32.mrf.mxu0  ;;  %v3982_v18 = vmax.f32 %v3549_v42, 0.0  ;;  %v3551_v53 = vadd.f32 %v3550_v22, %v3438_v29 }
 0x286   :  { %v3441_v19 = vpop.f32.mrf.mxu1 }
 0x287   :  { %v3553_v10 = vadd.f32 %v3552_v6, %v3440_v14  ;;  %v3554_v61 = vpop.f32.mrf.mxu0  ;;  %v3442_v1 = vadd.f32 %v3441_v19, %v3329_v56  ;;  %v3983_v57 = vmax.f32 %v3551_v53, 0.0  ;;  %v8935_v56 = vsub.s32 4, %v8929_v59 }
 0x289   :  { %v3988_v3 = vmax.f32 %v3553_v10, 0.0  ;;  %v8441_v32 = vpop.f32.mrf.mxu1  ;;  %v3555_v47 = vadd.f32 %v3554_v61, %v3442_v1 }
 0x28a   :  { %v8443_v20 = vpop.f32.mrf.mxu0  ;;  %4593 = vmatmul.mubr.bf16.gmra.mxu1 %v8417_v60  ;;  %v4031_v60 = vpack.c.bf16 %v3977_v40, %v3971_v55 }
 0x28b   :  { %v4036_v31 = vpack.c.bf16 %v3988_v3, %v3982_v18  ;;  %4600 = vmatprep.mubr.bf16.mxu1 %v4025_v12  ;;  %v8448_v35 = vpop.f32.mrf.mxu1  ;;  %v3989_v44 = vmax.f32 %v3555_v47, 0.0  ;;  %v6118_v12 = vld [vmem:[%s8828_s4] sm:$0x3f] }
 0x28c   :  { %v8452_v50 = vpop.f32.mrf.mxu0  ;;  %v8534_v18 = vrot.slane %v6118_v12, %v8934_v49  ;;  %v8540_v62 = vrot.slane %v6118_v12, %v8935_v56 }
 0x28d   :  { %v3595_v13 = vpop.f32.mrf.mxu1  ;;  %v4037_v27 = vpack.c.bf16 %v3989_v44, %v3983_v57 }
 0x28e   :  { %v3708_v48 = vpop.f32.mrf.mxu0  ;;  %v3594_v40 = vadd.f32 %v8448_v35, %v8534_v18  ;;  %v3596_v1 = vadd.f32 %v3595_v13, %v8540_v62  ;;  %v3592_v55 = vadd.f32 %v8441_v32, %v8540_v62 }
 0x28f   :  { %v3597_v11 = vpop.f32.mrf.mxu1 }
 0x290   :  { %v3710_v5 = vpop.f32.mrf.mxu0  ;;  %v3598_v47 = vadd.f32 %v3597_v11, %v8534_v18  ;;  %v3707_v44 = vadd.f32 %v8452_v50, %v3594_v40  ;;  %v3709_v57 = vadd.f32 %v3708_v48, %v3596_v1 }
 0x291   :  { %v8454_v46 = vpop.f32.mrf.mxu1 }
 0x292   :  { %4601 = vmatmul.mubr.bf16.gmra.mxu1 %v8428_v2  ;;  %v8465_v52 = vpop.f32.mrf.mxu0  ;;  %v3711_v35 = vadd.f32 %v3710_v5, %v3598_v47  ;;  %v3602_v50 = vadd.f32 %v8454_v46, %v8540_v62 }
 0x293   :  { %4608 = vmatprep.mubr.bf16.mxu1 %v4031_v60  ;;  %v8457_v41 = vpop.f32.mrf.mxu1 }
 0x294   :  { %v8471_v24 = vpop.f32.mrf.mxu0  ;;  %v3604_v32 = vadd.f32 %v8457_v41, %v8534_v18 }
 0x295   :  { %v8459_v8 = vpop.f32.mrf.mxu1 }
 0x296   :  { %v8477_v15 = vpop.f32.mrf.mxu0  ;;  %v3606_v11 = vadd.f32 %v8459_v8, %v8540_v62  ;;  %v3717_v41 = vadd.f32 %v8471_v24, %v3604_v32 }
 0x297   :  { %v8461_v0 = vpop.f32.mrf.mxu1 }
 0x298   :  { %v8483_v38 = vpop.f32.mrf.mxu0  ;;  %v3608_v5 = vadd.f32 %v8461_v0, %v8534_v18 }
 0x299   :  { %v8463_v16 = vpop.f32.mrf.mxu1 }
 0x29a   :  { %4609 = vmatmul.mubr.bf16.gmra.mxu1 %v4030_v30  ;;  %v8489_v7 = vpop.f32.mrf.mxu0 }
 0x29b   :  { %4616 = vmatprep.mubr.bf16.mxu1 %v4037_v27  ;;  %v8467_v17 = vpop.f32.mrf.mxu1  ;;  %v3705_v27 = vadd.f32 %v8443_v20, %v3592_v55 }
 0x29c   :  { %v8495_v43 = vpop.f32.mrf.mxu0 }
 0x29d   :  { %v8469_v2 = vpop.f32.mrf.mxu1 }
 0x29e   :  { %v8501_v30 = vpop.f32.mrf.mxu0  ;;  %v3616_v24 = vadd.f32 %v8469_v2, %v8540_v62 }
 0x29f   :  { %v8473_v33 = vpop.f32.mrf.mxu1 }
 0x2a0   :  { %v8507_v4 = vpop.f32.mrf.mxu0  ;;  %v3618_v32 = vadd.f32 %v8473_v33, %v8534_v18 }
 0x2a1   :  { %v8475_v26 = vpop.f32.mrf.mxu1 }
 0x2a2   :  { %4617 = vmatmul.mubr.bf16.gmra.mxu1 %v4036_v31  ;;  %v8513_v42 = vpop.f32.mrf.mxu0 }
 0x2a3   :  { %v8479_v58 = vpop.f32.mrf.mxu1 }
 0x2a4   :  { %v8519_v19 = vpop.f32.mrf.mxu0 }
 0x2a5   :  { %v8481_v45 = vpop.f32.mrf.mxu1 }
 0x2a6   :  { %v8525_v10 = vpop.f32.mrf.mxu0 }
 0x2a7   :  { %v8485_v28 = vpop.f32.mrf.mxu1 }
 0x2a8   :  { %v8542_v31 = vpop.f32.mrf.mxu0 }
 0x2a9   :  { %v8487_v9 = vpop.f32.mrf.mxu1 }
 0x2aa   :  { %v8551_v29 = vpop.f32.mrf.mxu0 }
 0x2ab   :  { %v8491_v34 = vpop.f32.mrf.mxu1 }
 0x2ac   :  { %v8556_v12 = vpop.f32.mrf.mxu0 }
 0x2ad   :  { %v8493_v54 = vpop.f32.mrf.mxu1 }
 0x2ae   :  { %v8564_v48 = vpop.f32.mrf.mxu0 }
 0x2af   :  { %v8497_v25 = vpop.f32.mrf.mxu1 }
 0x2b1   :  { %v8499_v21 = vpop.f32.mrf.mxu1 }
 0x2b3   :  { %v8503_v22 = vpop.f32.mrf.mxu1 }
 0x2b5   :  { %v8505_v63 = vpop.f32.mrf.mxu1 }
 0x2b7   :  { %v8509_v39 = vpop.f32.mrf.mxu1 }
 0x2b9   :  { %v8511_v36 = vpop.f32.mrf.mxu1 }
 0x2bb   :  { %v8515_v14 = vpop.f32.mrf.mxu1 }
 0x2bd   :  { %v8517_v6 = vpop.f32.mrf.mxu1 }
 0x2bf   :  { %v8521_v51 = vpop.f32.mrf.mxu1 }
 0x2c1   :  { %v8523_v37 = vpop.f32.mrf.mxu1 }
 0x2c2   :  { %8933 = vst [vmem:[#allocation4_spill] sm:$0xff] %v8523_v37 }
 0x2c3   :  { %v8527_v61 = vpop.f32.mrf.mxu1 }
 0x2c5   :  { %v8536_v3 = vpop.f32.mrf.mxu1 }
 0x2c7   :  { %v8544_v23 = vpop.f32.mrf.mxu1 }
 0x2c8   :  { %8936 = vst [vmem:[#allocation14_spill] sm:$0xff] %v8544_v23 }
 0x2ca   :  { %v3817_v60 = vpop.f32.mrf.mxu1 }
 0x2cb   :  { %v3818_v59 = vadd.f32 %v3817_v60, %v3705_v27  ;;  %v3721_v27 = vadd.f32 %v8483_v38, %v3608_v5  ;;  %v3729_v5 = vadd.f32 %v8501_v30, %v3616_v24  ;;  %v3626_v30 = vadd.f32 %v8481_v45, %v8540_v62 }
 0x2cc   :  { %v3819_v53 = vpop.f32.mrf.mxu1 }
 0x2cd   :  { %v3820_v56 = vadd.f32 %v3819_v53, %v3707_v44  ;;  %v3900_v60 = vmax.f32 %v3818_v59, 0.0  ;;  %v3719_v53 = vadd.f32 %v8477_v15, %v3606_v11  ;;  %v8571_v44 = vpop.f32.mrf.mxu0  ;;  %v3614_v59 = vadd.f32 %v8467_v17, %v8534_v18 }
 0x2ce   :  { %v3821_v49 = vpop.f32.mrf.mxu1 }
 0x2cf   :  { %v3822_v13 = vadd.f32 %v3821_v49, %v3709_v57  ;;  %v3901_v1 = vmax.f32 %v3820_v56, 0.0  ;;  %v8580_v56 = vpop.f32.mrf.mxu0  ;;  %v3727_v17 = vadd.f32 %v8495_v43, %v3614_v59  ;;  %v3624_v43 = vadd.f32 %v8479_v58, %v8534_v18 }
 0x2d0   :  { %v3823_v23 = vpop.f32.mrf.mxu1  ;;  %v3739_v58 = vadd.f32 %v8525_v10, %v3626_v30 }
 0x2d1   :  { %v3824_v37 = vadd.f32 %v3823_v23, %v3711_v35  ;;  %v3906_v20 = vmax.f32 %v3822_v13, 0.0  ;;  %v3715_v23 = vadd.f32 %v8465_v52, %v3602_v50  ;;  %v3612_v52 = vadd.f32 %v8463_v16, %v8540_v62 }
 0x2d2   :  { %v3827_v40 = vpop.f32.mrf.mxu1  ;;  %v3737_v59 = vadd.f32 %v8519_v19, %v3624_v43  ;;  %v3636_v19 = vadd.f32 %v8493_v54, %v8540_v62 }
 0x2d3   :  { %v3907_v55 = vmax.f32 %v3824_v37, 0.0  ;;  %v3996_v46 = vpack.c.bf16 %v3906_v20, %v3900_v60  ;;  %v3828_v0 = vadd.f32 %v3827_v40, %v3715_v23 }
 0x2d4   :  { %v3829_v47 = vpop.f32.mrf.mxu1 }
 0x2d5   :  { %v3997_v8 = vpack.c.bf16 %v3907_v55, %v3901_v1  ;;  %v3830_v49 = vadd.f32 %v3829_v47, %v3717_v41  ;;  %v3912_v20 = vmax.f32 %v3828_v0, 0.0  ;;  %v3725_v1 = vadd.f32 %v8489_v7, %v3612_v52  ;;  %v8587_v55 = vpop.f32.mrf.mxu0 }
 0x2d6   :  { %v3831_v57 = vpop.f32.mrf.mxu1  ;;  %v3731_v47 = vadd.f32 %v8507_v4, %v3618_v32  ;;  %v3622_v7 = vadd.f32 %v8475_v26, %v8540_v62  ;;  %v3628_v4 = vadd.f32 %v8485_v28, %v8534_v18 }
 0x2d7   :  { %v3832_v35 = vadd.f32 %v3831_v57, %v3719_v53  ;;  %4657 = vmatprep.mubr.bf16.mxu0 %v3997_v8  ;;  %v3913_v11 = vmax.f32 %v3830_v49, 0.0 }
 0x2d8   :  { %v3833_v37 = vpop.f32.mrf.mxu1  ;;  %4658 = vmatmul.mubr.bf16.vlgmr.msra.gmra.mxu0 %v3996_v46  ;;  %v3758_v46 = vpop.f32.mrf.mxu0  ;;  %v3735_v45 = vadd.f32 %v8513_v42, %v3622_v7  ;;  %v3632_v42 = vadd.f32 %v8487_v9, %v8540_v62 }
 0x2d9   :  { %v3834_v15 = vadd.f32 %v3833_v37, %v3721_v27  ;;  %v3918_v13 = vmax.f32 %v3832_v35, 0.0 }
 0x2da   :  { %v3837_v38 = vpop.f32.mrf.mxu1 }
 0x2db   :  { %v3919_v50 = vmax.f32 %v3834_v15, 0.0  ;;  %v4002_v16 = vpack.c.bf16 %v3918_v13, %v3912_v20  ;;  %v3838_v33 = vadd.f32 %v3837_v38, %v3725_v1  ;;  %v3760_v15 = vpop.f32.mrf.mxu0  ;;  %v3741_v13 = vadd.f32 %v8542_v31, %v3628_v4 }
 0x2dc   :  { %v3839_v40 = vpop.f32.mrf.mxu1 }
 0x2dd   :  { %v4003_v2 = vpack.c.bf16 %v3919_v50, %v3913_v11  ;;  %v3840_v41 = vadd.f32 %v3839_v40, %v3727_v17  ;;  %v3924_v0 = vmax.f32 %v3838_v33, 0.0  ;;  %v3634_v50 = vadd.f32 %v8491_v34, %v8534_v18  ;;  %v8608_v20 = vpop.f32.mrf.mxu0 }
 0x2de   :  { %v3841_v60 = vpop.f32.mrf.mxu1  ;;  %v3638_v17 = vadd.f32 %v8497_v25, %v8534_v18 }
 0x2df   :  { %v3842_v53 = vadd.f32 %v3841_v60, %v3729_v5  ;;  %4665 = vmatprep.mubr.bf16.mxu0 %v4003_v2  ;;  %v3925_v49 = vmax.f32 %v3840_v41, 0.0  ;;  %v3747_v34 = vadd.f32 %v8556_v12, %v3634_v50  ;;  %v3749_v60 = vadd.f32 %v8564_v48, %v3636_v19  ;;  %v3766_v41 = vpop.f32.mrf.mxu0 }
 0x2e0   :  { %v3843_v8 = vpop.f32.mrf.mxu1  ;;  %4666 = vmatmul.mubr.bf16.gmra.mxu0 %v4002_v16  ;;  %v3751_v33 = vadd.f32 %v8571_v44, %v3638_v17  ;;  %v3646_v12 = vadd.f32 %v8505_v63, %v8540_v62  ;;  %v3648_v44 = vadd.f32 %v8509_v39, %v8534_v18  ;;  %v3654_v39 = vadd.f32 %v8515_v14, %v8534_v18 }
 0x2e1   :  { %v3844_v23 = vadd.f32 %v3843_v8, %v3731_v47  ;;  %v3930_v57 = vmax.f32 %v3842_v53, 0.0  ;;  %v3745_v47 = vadd.f32 %v8551_v29, %v3632_v42  ;;  %v3642_v29 = vadd.f32 %v8499_v21, %v8540_v62  ;;  %v3768_v7 = vpop.f32.mrf.mxu0 }
 0x2e2   :  { %v3847_v27 = vpop.f32.mrf.mxu1  ;;  %v3761_v21 = vadd.f32 %v3760_v15, %v3648_v44  ;;  %v3658_v15 = vadd.f32 %v8521_v51, %v8534_v18  ;;  %v3664_v51 = vadd.f32 %v8527_v61, %v8534_v18 }
 0x2e3   :  { %v3931_v35 = vmax.f32 %v3844_v23, 0.0  ;;  %v4008_v52 = vpack.c.bf16 %v3930_v57, %v3924_v0  ;;  %v3848_v28 = vadd.f32 %v3847_v27, %v3735_v45  ;;  %v3644_v23 = vadd.f32 %v8503_v22, %v8534_v18 }
 0x2e4   :  { %v3849_v37 = vpop.f32.mrf.mxu1  ;;  %v3759_v22 = vadd.f32 %v3758_v46, %v3646_v12  ;;  %v3755_v63 = vadd.f32 %v8580_v56, %v3642_v29  ;;  %v3652_v56 = vadd.f32 %v8511_v36, %v8540_v62 }
 0x2e5   :  { %v4009_v24 = vpack.c.bf16 %v3931_v35, %v3925_v49  ;;  %v3850_v38 = vadd.f32 %v3849_v37, %v3737_v59  ;;  %v3936_v1 = vmax.f32 %v3848_v28, 0.0  ;;  %v3757_v37 = vadd.f32 %v8587_v55, %v3644_v23 }
 0x2e6   :  { %v3851_v26 = vpop.f32.mrf.mxu1  ;;  %v3656_v55 = vadd.f32 %v8517_v6, %v8540_v62  ;;  %v3765_v17 = vadd.f32 %v8608_v20, %v3652_v56 }
 0x2e7   :  { %v3852_v32 = vadd.f32 %v3851_v26, %v3739_v58  ;;  %4673 = vmatprep.mubr.bf16.mxu0 %v4009_v24  ;;  %v3937_v5 = vmax.f32 %v3850_v38, 0.0  ;;  %v3770_v58 = vpop.f32.mrf.mxu0 }
 0x2e8   :  { %v3853_v11 = vpop.f32.mrf.mxu1  ;;  %4674 = vmatmul.mubr.bf16.gmra.mxu0 %v4008_v52 }
 0x2e9   :  { %v3854_v10 = vadd.f32 %v3853_v11, %v3741_v13  ;;  %v3942_v40 = vmax.f32 %v3852_v32, 0.0  ;;  %v3774_v32 = vpop.f32.mrf.mxu0 }
 0x2ea   :  { %v3857_v31 = vpop.f32.mrf.mxu1 }
 0x2eb   :  { %v3943_v2 = vmax.f32 %v3854_v10, 0.0  ;;  %v4014_v9 = vpack.c.bf16 %v3942_v40, %v3936_v1  ;;  %v3858_v25 = vadd.f32 %v3857_v31, %v3745_v47  ;;  %v3767_v40 = vadd.f32 %v3766_v41, %v3654_v39  ;;  %v3776_v6 = vpop.f32.mrf.mxu0  ;;  %v8937_v41 = vld [vmem:[#allocation4_spill] sm:$0xff] }
 0x2ec   :  { %v3859_v16 = vpop.f32.mrf.mxu1  ;;  %v3769_v31 = vadd.f32 %v3768_v7, %v3656_v55  ;;  %v3771_v1 = vadd.f32 %v3770_v58, %v3658_v15  ;;  %v3662_v20 = vadd.f32 %v8937_v41, %v8540_v62 }
 0x2ed   :  { %v4015_v54 = vpack.c.bf16 %v3943_v2, %v3937_v5  ;;  %v3860_v8 = vadd.f32 %v3859_v16, %v3747_v34  ;;  %v3948_v35 = vmax.f32 %v3858_v25, 0.0 }
 0x2ee   :  { %v3861_v53 = vpop.f32.mrf.mxu1  ;;  %v3775_v7 = vadd.f32 %v3774_v32, %v3662_v20 }
 0x2ef   :  { %v3862_v43 = vadd.f32 %v3861_v53, %v3749_v60  ;;  %4681 = vmatprep.mubr.bf16.mxu0 %v4015_v54  ;;  %v3949_v4 = vmax.f32 %v3860_v8, 0.0  ;;  %v3666_v54 = vadd.f32 %v8536_v3, %v8540_v62  ;;  %v8938_v8 = vld [vmem:[#allocation14_spill] sm:$0xff] }
 0x2f0   :  { %v3863_v30 = vpop.f32.mrf.mxu1  ;;  %4682 = vmatmul.mubr.bf16.gmra.mxu0 %v4014_v9  ;;  %v3778_v9 = vpop.f32.mrf.mxu0 }
 0x2f1   :  { %v3864_v48 = vadd.f32 %v3863_v30, %v3751_v33  ;;  %v3954_v57 = vmax.f32 %v3862_v43, 0.0  ;;  %v3668_v43 = vadd.f32 %v8938_v8, %v8534_v18  ;;  %v3779_v29 = vadd.f32 %v3778_v9, %v3666_v54 }
 0x2f2   :  { %v3867_v27 = vpop.f32.mrf.mxu1 }
 0x2f3   :  { %v3955_v49 = vmax.f32 %v3864_v48, 0.0  ;;  %v4020_v24 = vpack.c.bf16 %v3954_v57, %v3948_v35  ;;  %v3868_v13 = vadd.f32 %v3867_v27, %v3755_v63  ;;  %v3777_v48 = vadd.f32 %v3776_v6, %v3664_v51  ;;  %v3780_v57 = vpop.f32.mrf.mxu0 }
 0x2f4   :  { %v3869_v0 = vpop.f32.mrf.mxu1  ;;  %v3781_v44 = vadd.f32 %v3780_v57, %v3668_v43 }
 0x2f5   :  { %v4021_v59 = vpack.c.bf16 %v3955_v49, %v3949_v4  ;;  %v3870_v52 = vadd.f32 %v3869_v0, %v3757_v37  ;;  %v3960_v10 = vmax.f32 %v3868_v13, 0.0 }
 0x2f6   :  { %v3871_v45 = vpop.f32.mrf.mxu1 }
 0x2f7   :  { %v3872_v26 = vadd.f32 %v3871_v45, %v3759_v22  ;;  %4689 = vmatprep.mubr.bf16.mxu0 %v4021_v59  ;;  %v3961_v50 = vmax.f32 %v3870_v52, 0.0 }
 0x2f8   :  { %v3873_v38 = vpop.f32.mrf.mxu1  ;;  %4690 = vmatmul.mubr.bf16.gmra.mxu0 %v4020_v24 }
 0x2f9   :  { %v3874_v46 = vadd.f32 %v3873_v38, %v3761_v21  ;;  %v3966_v28 = vmax.f32 %v3872_v26, 0.0 }
 0x2fa   :  { %v3877_v11 = vpop.f32.mrf.mxu1 }
 0x2fb   :  { %v3967_v19 = vmax.f32 %v3874_v46, 0.0  ;;  %v4026_v5 = vpack.c.bf16 %v3966_v28, %v3960_v10  ;;  %v3878_v34 = vadd.f32 %v3877_v11, %v3765_v17 }
 0x2fc   :  { %v3879_v42 = vpop.f32.mrf.mxu1 }
 0x2fd   :  { %v4027_v14 = vpack.c.bf16 %v3967_v19, %v3961_v50  ;;  %v3880_v36 = vadd.f32 %v3879_v42, %v3767_v40  ;;  %v3972_v23 = vmax.f32 %v3878_v34, 0.0 }
 0x2fe   :  { %v3881_v2 = vpop.f32.mrf.mxu1 }
 0x2ff   :  { %v3882_v16 = vadd.f32 %v3881_v2, %v3769_v31  ;;  %4697 = vmatprep.mubr.bf16.mxu0 %v4027_v14  ;;  %v3973_v25 = vmax.f32 %v3880_v36, 0.0  ;;  %v5315_v2 = vpop.f32.mrf.mxu0 }
 0x300   :  { %v3883_v60 = vpop.f32.mrf.mxu1  ;;  %4698 = vmatmul.mubr.bf16.gmra.mxu0 %v4026_v5 }
 0x301   :  { %v3884_v47 = vadd.f32 %v3883_v60, %v3771_v1  ;;  %v3978_v53 = vmax.f32 %v3882_v16, 0.0  ;;  %v5316_v36 = vpop.f32.mrf.mxu0 }
 0x302   :  { %v3887_v33 = vpop.f32.mrf.mxu1 }
 0x303   :  { %v3979_v30 = vmax.f32 %v3884_v47, 0.0  ;;  %v4032_v3 = vpack.c.bf16 %v3978_v53, %v3972_v23  ;;  %v3888_v49 = vadd.f32 %v3887_v33, %v3775_v7  ;;  %v5318_v34 = vpop.f32.mrf.mxu0 }
 0x304   :  { %v3889_v12 = vpop.f32.mrf.mxu1 }
 0x305   :  { %v4033_v61 = vpack.c.bf16 %v3979_v30, %v3973_v25  ;;  %v3890_v4 = vadd.f32 %v3889_v12, %v3777_v48  ;;  %v3984_v63 = vmax.f32 %v3888_v49, 0.0  ;;  %v5319_v51 = vpop.f32.mrf.mxu0 }
 0x306   :  { %v3891_v27 = vpop.f32.mrf.mxu1 }
 0x307   :  { %v3892_v62 = vadd.f32 %v3891_v27, %v3779_v29  ;;  %4705 = vmatprep.mubr.bf16.mxu0 %v4033_v61  ;;  %v3985_v22 = vmax.f32 %v3890_v4, 0.0  ;;  %v5321_v47 = vpop.f32.mrf.mxu0 }
 0x308   :  { %v3893_v35 = vpop.f32.mrf.mxu1  ;;  %4706 = vmatmul.mubr.bf16.gmra.mxu0 %v4032_v3 }
 0x309   :  { %v3894_v0 = vadd.f32 %v3893_v35, %v3781_v44  ;;  %v3990_v18 = vmax.f32 %v3892_v62, 0.0  ;;  %v5322_v20 = vpop.f32.mrf.mxu0 }
 0x30a   :  { %v5339_v37 = vpop.f32.mrf.mxu1 }
 0x30b   :  { %v3991_v59 = vmax.f32 %v3894_v0, 0.0  ;;  %v4038_v21 = vpack.c.bf16 %v3990_v18, %v3984_v63  ;;  %v5324_v53 = vpop.f32.mrf.mxu0 }
 0x30c   :  { %v5340_v58 = vpop.f32.mrf.mxu1 }
 0x30d   :  { %v4039_v24 = vpack.c.bf16 %v3991_v59, %v3985_v22  ;;  %v8643_v45 = vadd.f32 %v5340_v58, %v5339_v37  ;;  %v5325_v8 = vpop.f32.mrf.mxu0 }
 0x30e   :  { %v5342_v52 = vpop.f32.mrf.mxu1 }
 0x30f   :  { %4713 = vmatprep.mubr.bf16.mxu0 %v4039_v24  ;;  %v5327_v25 = vpop.f32.mrf.mxu0  ;;  %v5317_v24 = vadd.f32 %v5316_v36, %v5315_v2  ;;  %v8942_v2 = vld [vmem:[#allocation2_spill] sm:$0xff] }
 0x310   :  { %v5343_v26 = vpop.f32.mrf.mxu1  ;;  %4714 = vmatmul.mubr.bf16.gmra.mxu0 %v4038_v21  ;;  %v4724_v36 = vadd.s32 8, %v8942_v2 }
 0x311   :  { %v8645_v13 = vadd.f32 %v5343_v26, %v5342_v52  ;;  %v5328_v23 = vpop.f32.mrf.mxu0  ;;  %v8696_v52 = vld [vmem:[%s8829_s6] ss:$0 sm:$0xff]  ;;  %v5320_v26 = vadd.f32 %v5319_v51, %v5318_v34 }
 0x312   :  { %v5345_v38 = vpop.f32.mrf.mxu1 }
 0x313   :  { %v5330_v48 = vpop.f32.mrf.mxu0  ;;  %v4469_v34 = vadd.f32 %v5320_v26, %v8696_v52 }
 0x314   :  { %v5346_v39 = vpop.f32.mrf.mxu1 }
 0x315   :  { %v8647_v55 = vadd.f32 %v5346_v39, %v5345_v38  ;;  %v5331_v61 = vpop.f32.mrf.mxu0  ;;  %v5323_v38 = vadd.f32 %v5322_v20, %v5321_v47  ;;  %v5326_v39 = vadd.f32 %v5325_v8, %v5324_v53 }
 0x316   :  { %v5348_v46 = vpop.f32.mrf.mxu1 }
 0x317   :  { %v5333_v57 = vpop.f32.mrf.mxu0  ;;  %v4474_v51 = vadd.f32 %v5323_v38, %v8696_v52  ;;  %v4477_v47 = vadd.f32 %v5326_v39, %v8696_v52 }
 0x318   :  { %v5349_v56 = vpop.f32.mrf.mxu1 }
 0x319   :  { %v8649_v32 = vadd.f32 %v5349_v56, %v5348_v46  ;;  %v5334_v27 = vpop.f32.mrf.mxu0  ;;  %v5329_v46 = vadd.f32 %v5328_v23, %v5327_v25  ;;  %v5332_v56 = vadd.f32 %v5331_v61, %v5330_v48  ;;  %v4726_v23 = vadd.s32 24, %v8942_v2 }
 0x31a   :  { %v5351_v28 = vpop.f32.mrf.mxu1 }
 0x31b   :  { %v5336_v4 = vpop.f32.mrf.mxu0  ;;  %v4482_v53 = vadd.f32 %v5329_v46, %v8696_v52  ;;  %v4485_v8 = vadd.f32 %v5332_v56, %v8696_v52 }
 0x31c   :  { %v5352_v11 = vpop.f32.mrf.mxu1 }
 0x31d   :  { %v8651_v15 = vadd.f32 %v5352_v11, %v5351_v28  ;;  %v5337_v49 = vpop.f32.mrf.mxu0  ;;  %v8941_v11 = vlaneseq }
 0x31e   :  { %v5354_v50 = vpop.f32.mrf.mxu1 }
 0x320   :  { %v5355_v19 = vpop.f32.mrf.mxu1 }
 0x321   :  { %v8653_v10 = vadd.f32 %v5355_v19, %v5354_v50  ;;  %v8701_v50 = vand.u32 127, %v8941_v11 }
 0x322   :  { %v5357_v42 = vpop.f32.mrf.mxu1 }
 0x323   :  { %vm4741_vm1 = vcmp.eq.s32.totalorder %v8942_v2, %v8701_v50  ;;  %vm4742_vm2 = vcmp.eq.s32.totalorder %v4724_v36, %v8701_v50  ;;  %vm4744_vm4 = vcmp.eq.s32.totalorder %v4726_v23, %v8701_v50  ;;  %v4730_v23 = vadd.s32 56, %v8942_v2 }
 0x324   :  { %v5358_v40 = vpop.f32.mrf.mxu1 }
 0x325   :  { %v8655_v31 = vadd.f32 %v5358_v40, %v5357_v42  ;;  %v4466_v42 = vadd.f32 %v5317_v24, %v8696_v52  ;;  %v5335_v40 = vadd.f32 %v5334_v27, %v5333_v57  ;;  %vm4748_vm8 = vcmp.eq.s32.totalorder %v4730_v23, %v8701_v50 }
 0x326   :  { %v8657_v14 = vpop.f32.mrf.mxu1 }
 0x327   :  { %8939 = vst [vmem:[#allocation15_spill] sm:$0xff] %v8657_v14  ;;  %v4490_v24 = vadd.f32 %v5335_v40, %v8696_v52 }
 0x328   :  { %v8659_v17 = vpop.f32.mrf.mxu1 }
 0x329   :  { %8940 = vst [vmem:[#allocation16_spill] sm:$0xff] %v8659_v17  ;;  %v4725_v17 = vadd.s32 16, %v8942_v2 }
 0x32a   :  { %v8661_v6 = vpop.f32.mrf.mxu1 }
 0x32b   :  { %vm4743_vm3 = vcmp.eq.s32.totalorder %v4725_v17, %v8701_v50  ;;  %v4729_v17 = vadd.s32 48, %v8942_v2 }
 0x32c   :  { %v8663_v5 = vpop.f32.mrf.mxu1 }
 0x32d   :  { %v5381_v61 = vadd.f32 %v8663_v5, %v8661_v6  ;;  %v6119_v5 = vmov 0.0   ;;  %vm4747_vm7 = vcmp.eq.s32.totalorder %v4729_v17, %v8701_v50 }
 0x32e   :  { %v5382_v1 = vpop.f32.mrf.mxu1 }
 0x330   :  { %v5383_v16 = vpop.f32.mrf.mxu1 }
 0x331   :  { %v5384_v20 = vadd.f32 %v5383_v16, %v5382_v1  ;;  %v5338_v1 = vadd.f32 %v5337_v49, %v5336_v4  ;;  %v4563_v49 = vadd.f32 %v5381_v61, %v4466_v42 }
 0x332   :  { %v5385_v60 = vpop.f32.mrf.mxu1 }
 0x333   :  { %v4566_v26 = vadd.f32 %v5384_v20, %v4469_v34 }
 0x334   :  { %v5386_v54 = vpop.f32.mrf.mxu1 }
 0x335   :  { %v5387_v57 = vadd.f32 %v5386_v54, %v5385_v60  ;;  %v5282_v60 = vsel %vm4741_vm1, 1.0, %v6119_v5  ;;  %v4727_v54 = vadd.s32 32, %v8942_v2 }
 0x336   :  { %v8665_v41 = vpop.f32.mrf.mxu1 }
 0x337   :  { %vm4745_vm5 = vcmp.eq.s32.totalorder %v4727_v54, %v8701_v50 }
 0x338   :  { %v8667_v9 = vpop.f32.mrf.mxu1 }
 0x339   :  { %v5390_v38 = vadd.f32 %v8667_v9, %v8665_v41  ;;  %v4571_v41 = vadd.f32 %v5387_v57, %v4474_v51 }
 0x33a   :  { %v8669_v33 = vpop.f32.mrf.mxu1 }
 0x33c   :  { %v8671_v43 = vpop.f32.mrf.mxu1 }
 0x33d   :  { %v5393_v56 = vadd.f32 %v8671_v43, %v8669_v33  ;;  %v5283_v43 = vsel %vm4742_vm2, 1.0, %v6119_v5 }
 0x33e   :  { %v8673_v30 = vpop.f32.mrf.mxu1 }
 0x33f   :  { %v4579_v40 = vadd.f32 %v5393_v56, %v4482_v53 }
 0x340   :  { %v8675_v12 = vpop.f32.mrf.mxu1 }
 0x341   :  { %v5396_v33 = vadd.f32 %v8675_v12, %v8673_v30  ;;  %v5285_v30 = vsel %vm4744_vm4, 1.0, %v6119_v5 }
 0x342   :  { %v8677_v29 = vpop.f32.mrf.mxu1 }
 0x344   :  { %v8679_v7 = vpop.f32.mrf.mxu1 }
 0x346   :  { %v8681_v3 = vpop.f32.mrf.mxu1 }
 0x348   :  { %v8683_v44 = vpop.f32.mrf.mxu1 }
 0x349   :  { %v5402_v20 = vadd.f32 %v8683_v44, %v8681_v3  ;;  %v4731_v3 = vadd.s32 64, %v8942_v2 }
 0x34a   :  { %v8685_v62 = vpop.f32.mrf.mxu1 }
 0x34b   :  { %vm4749_vm9 = vcmp.eq.s32.totalorder %v4731_v3, %v8701_v50 }
 0x34c   :  { %v8687_v35 = vpop.f32.mrf.mxu1 }
 0x34d   :  { %v5405_v56 = vadd.f32 %v8687_v35, %v8685_v62  ;;  %v4732_v35 = vadd.s32 72, %v8942_v2 }
 0x34e   :  { %v8689_v37 = vpop.f32.mrf.mxu1 }
 0x34f   :  { %vm4750_vm10 = vcmp.eq.s32.totalorder %v4732_v35, %v8701_v50 }
 0x350   :  { %v8691_v63 = vpop.f32.mrf.mxu1 }
 0x352   :  { %v8698_v28 = vpop.f32.mrf.mxu1 }
 0x354   :  { %v8711_v25 = vpop.f32.mrf.mxu1 }
 0x356   :  { %v8725_v6 = vpop.f32.mrf.mxu1 }
 0x398   :  { %v5443_v0 = vpop.f32.mrf.mxu0 }
 0x39a   :  { %v5444_v18 = vpop.f32.mrf.mxu0 }
 0x39b   :  { %v5445_v39 = vadd.f32 %v5444_v18, %v5443_v0  ;;  %v5284_v18 = vsel %vm4743_vm3, 1.0, %v6119_v5 }
 0x39c   :  { %v5446_v22 = vpop.f32.mrf.mxu0 }
 0x39e   :  { %v5447_v59 = vpop.f32.mrf.mxu0 }
 0x39f   :  { %v5448_v27 = vadd.f32 %v5447_v59, %v5446_v22  ;;  %v4728_v59 = vadd.s32 40, %v8942_v2 }
 0x3a0   :  { %v5449_v58 = vpop.f32.mrf.mxu0 }
 0x3a1   :  { %v4663_v9 = vadd.f32 %v5448_v27, %v4566_v26  ;;  %vm4746_vm6 = vcmp.eq.s32.totalorder %v4728_v59, %v8701_v50  ;;  %v5289_v59 = vsel %vm4748_vm8, 1.0, %v6119_v5 }
 0x3a2   :  { %v5450_v21 = vpop.f32.mrf.mxu0 }
 0x3a3   :  { %v5451_v46 = vadd.f32 %v5450_v21, %v5449_v58  ;;  %v4574_v58 = vadd.f32 %v5390_v38, %v4477_v47  ;;  %v4660_v21 = vadd.f32 %v5445_v39, %v4563_v49  ;;  %v4790_v36 = vmul.f32 %v5283_v43, %v4663_v9 }
 0x3a4   :  { %v5452_v19 = vpop.f32.mrf.mxu0  ;;  %v4582_v47 = vadd.f32 %v5396_v33, %v4485_v8 }
 0x3a5   :  { %v4668_v11 = vadd.f32 %v5451_v46, %v4571_v41 }
 0x3a6   :  { %v5453_v14 = vpop.f32.mrf.mxu0 }
 0x3a7   :  { %v5454_v0 = vadd.f32 %v5453_v14, %v5452_v19  ;;  %v8742_v14 = vpop.f32.mrf.mxu1  ;;  %v5399_v19 = vadd.f32 %v8679_v7, %v8677_v29  ;;  %v4791_v61 = vmul.f32 %v5284_v18, %v4668_v11  ;;  %v5286_v29 = vsel %vm4745_vm5, 1.0, %v6119_v5 }
 0x3a8   :  { %v5455_v48 = vpop.f32.mrf.mxu0 }
 0x3a9   :  { %v4671_v34 = vadd.f32 %v5454_v0, %v4574_v58  ;;  %v8756_v26 = vpop.f32.mrf.mxu1  ;;  %v4587_v44 = vadd.f32 %v5399_v19, %v4490_v24  ;;  %v4498_v24 = vadd.f32 %v8643_v45, %v8696_v52  ;;  %v5288_v0 = vsel %vm4747_vm7, 1.0, %v6119_v5 }
 0x3aa   :  { %v5456_v16 = vpop.f32.mrf.mxu0  ;;  %v5408_v45 = vadd.f32 %v8691_v63, %v8689_v37  ;;  %v5411_v37 = vadd.f32 %v8711_v25, %v8698_v28  ;;  %v5414_v25 = vadd.f32 %v8742_v14, %v8725_v6 }
 0x3ab   :  { %v5457_v42 = vadd.f32 %v5456_v16, %v5455_v48  ;;  %v4789_v48 = vmul.f32 %v5282_v60, %v4660_v21  ;;  %v4493_v16 = vadd.f32 %v5338_v1, %v8696_v52  ;;  %v4792_v38 = vmul.f32 %v5285_v30, %v4671_v34  ;;  %v5416_v9 = vpop.f32.mrf.mxu1 }
 0x3ac   :  { %v5458_v4 = vpop.f32.mrf.mxu0  ;;  %v5287_v1 = vsel %vm4746_vm6, 1.0, %v6119_v5  ;;  %v5417_v6 = vadd.f32 %v5416_v9, %v8756_v26  ;;  %v4517_v9 = vadd.f32 %v8653_v10, %v8696_v52  ;;  %v8944_v10 = vld [vmem:[#allocation16_spill] sm:$0xff] }
 0x3ad   :  { %v4676_v57 = vadd.f32 %v5457_v42, %v4579_v40  ;;  %v4805_v8 = vadd.f32 %v4790_v36, %v4789_v48  ;;  %v4590_v46 = vadd.f32 %v5402_v20, %v4493_v16  ;;  %v4501_v40 = vadd.f32 %v8645_v13, %v8696_v52  ;;  %v5418_v30 = vpop.f32.mrf.mxu1 }
 0x3ae   :  { %v5459_v22 = vpop.f32.mrf.mxu0  ;;  %v4506_v13 = vadd.f32 %v8647_v55, %v8696_v52  ;;  %v4509_v55 = vadd.f32 %v8649_v32, %v8696_v52 }
 0x3af   :  { %v5460_v51 = vadd.f32 %v5459_v22, %v5458_v4  ;;  %v4806_v54 = vadd.f32 %v4805_v8, %v4791_v61  ;;  %v4793_v4 = vmul.f32 %v5286_v29, %v4676_v57  ;;  %v4595_v22 = vadd.f32 %v5405_v56, %v4498_v24  ;;  %v5419_v48 = vpop.f32.mrf.mxu1 }
 0x3b0   :  { %v5461_v12 = vpop.f32.mrf.mxu0  ;;  %v5291_v61 = vsel %vm4750_vm10, 1.0, %v6119_v5  ;;  %v4734_v29 = vadd.s32 88, %v8942_v2 }
 0x3b1   :  { %v4679_v39 = vadd.f32 %v5460_v51, %v4582_v47  ;;  %v4807_v33 = vadd.f32 %v4806_v54, %v4792_v38  ;;  %v4733_v51 = vadd.s32 80, %v8942_v2  ;;  %v4598_v47 = vadd.f32 %v5408_v45, %v4501_v40  ;;  %v5421_v38 = vpop.f32.mrf.mxu1 }
 0x3b2   :  { %v5462_v53 = vpop.f32.mrf.mxu0  ;;  %vm4752_vm12 = vcmp.eq.s32.totalorder %v4734_v29, %v8701_v50 }
 0x3b3   :  { %v5463_v27 = vadd.f32 %v5462_v53, %v5461_v12  ;;  %v4794_v43 = vmul.f32 %v5287_v1, %v4679_v39  ;;  %v4808_v21 = vadd.f32 %v4807_v33, %v4793_v4  ;;  %v5290_v12 = vsel %vm4749_vm9, 1.0, %v6119_v5  ;;  %v5422_v32 = vpop.f32.mrf.mxu1 }
 0x3b4   :  { %v5464_v7 = vpop.f32.mrf.mxu0  ;;  %vm4751_vm11 = vcmp.eq.s32.totalorder %v4733_v51, %v8701_v50  ;;  %v4606_v4 = vadd.f32 %v5414_v25, %v4509_v55  ;;  %v5293_v24 = vsel %vm4752_vm12, 1.0, %v6119_v5  ;;  %v4736_v33 = vadd.s32 104, %v8942_v2 }
 0x3b5   :  { %v4684_v49 = vadd.f32 %v5463_v27, %v4587_v44  ;;  %v4809_v19 = vadd.f32 %v4808_v21, %v4794_v43  ;;  %v5292_v39 = vsel %vm4751_vm11, 1.0, %v6119_v5 }
 0x3b6   :  { %v5465_v60 = vpop.f32.mrf.mxu0  ;;  %vm4754_vm14 = vcmp.eq.s32.totalorder %v4736_v33, %v8701_v50 }
 0x3b7   :  { %v5466_v41 = vadd.f32 %v5465_v60, %v5464_v7  ;;  %v4795_v11 = vmul.f32 %v5288_v0, %v4684_v49  ;;  %v4603_v7 = vadd.f32 %v5411_v37, %v4506_v13  ;;  %v4735_v60 = vadd.s32 96, %v8942_v2 }
 0x3b8   :  { %v5467_v62 = vpop.f32.mrf.mxu0 }
 0x3b9   :  { %v4687_v18 = vadd.f32 %v5466_v41, %v4590_v46  ;;  %v4810_v20 = vadd.f32 %v4809_v19, %v4795_v11  ;;  %v4514_v41 = vadd.f32 %v8651_v15, %v8696_v52  ;;  %vm4753_vm13 = vcmp.eq.s32.totalorder %v4735_v60, %v8701_v50 }
 0x3ba   :  { %v5468_v58 = vpop.f32.mrf.mxu0  ;;  %v5294_v15 = vsel %vm4753_vm13, 1.0, %v6119_v5 }
 0x3bb   :  { %v5469_v42 = vadd.f32 %v5468_v58, %v5467_v62  ;;  %v4796_v36 = vmul.f32 %v5289_v59, %v4687_v18  ;;  %v4611_v18 = vadd.f32 %v5417_v6, %v4514_v41  ;;  %v5424_v58 = vpop.f32.mrf.mxu1 }
 0x3bc   :  { %v5470_v17 = vpop.f32.mrf.mxu0 }
 0x3bd   :  { %v4692_v34 = vadd.f32 %v5469_v42, %v4595_v22  ;;  %v4811_v27 = vadd.f32 %v4810_v20, %v4796_v36  ;;  %v5420_v22 = vadd.f32 %v5419_v48, %v5418_v30  ;;  %v4737_v42 = vadd.s32 112, %v8942_v2  ;;  %v5425_v37 = vpop.f32.mrf.mxu1 }
 0x3be   :  { %v5471_v63 = vpop.f32.mrf.mxu0  ;;  %v4522_v36 = vadd.f32 %v8655_v31, %v8696_v52 }
 0x3bf   :  { %v4797_v53 = vmul.f32 %v5290_v12, %v4692_v34  ;;  %v5472_v23 = vadd.f32 %v5471_v63, %v5470_v17  ;;  %v4614_v12 = vadd.f32 %v5420_v22, %v4517_v9  ;;  %v5423_v17 = vadd.f32 %v5422_v32, %v5421_v38  ;;  %v8943_v34 = vld [vmem:[#allocation15_spill] sm:$0xff] }
 0x3c0   :  { %v5473_v57 = vpop.f32.mrf.mxu0  ;;  %v5362_v51 = vadd.f32 %v8944_v10, %v8943_v34  ;;  %v5295_v63 = vsel %vm4754_vm14, 1.0, %v6119_v5  ;;  %vm4755_vm15 = vcmp.eq.s32.totalorder %v4737_v42, %v8701_v50 }
 0x3c1   :  { %v4695_v16 = vadd.f32 %v5472_v23, %v4598_v47  ;;  %v4812_v3 = vadd.f32 %v4811_v27, %v4797_v53  ;;  %v4738_v23 = vadd.s32 120, %v8942_v2  ;;  %v4619_v48 = vadd.f32 %v5423_v17, %v4522_v36 }
 0x3c2   :  { %v5474_v28 = vpop.f32.mrf.mxu0  ;;  %v5296_v31 = vsel %vm4755_vm15, 1.0, %v6119_v5  ;;  %v4525_v29 = vadd.f32 %v5362_v51, %v8696_v52 }
 0x3c3   :  { %v4798_v44 = vmul.f32 %v5291_v61, %v4695_v16  ;;  %v5475_v8 = vadd.f32 %v5474_v28, %v5473_v57  ;;  %v5426_v61 = vadd.f32 %v5425_v37, %v5424_v58  ;;  %vm4756_vm0 = vcmp.eq.s32.totalorder %v4738_v23, %v8701_v50 }
 0x3c4   :  { %v5476_v46 = vpop.f32.mrf.mxu0  ;;  %v5297_v2 = vsel %vm4756_vm0, 1.0, %v6119_v5 }
 0x3c5   :  { %v4813_v56 = vadd.f32 %v4812_v3, %v4798_v44  ;;  %v4700_v1 = vadd.f32 %v5475_v8, %v4603_v7  ;;  %v4622_v3 = vadd.f32 %v5426_v61, %v4525_v29 }
 0x3c6   :  { %v5477_v54 = vpop.f32.mrf.mxu0 }
 0x3c7   :  { %v4799_v14 = vmul.f32 %v5292_v39, %v4700_v1  ;;  %v5478_v49 = vadd.f32 %v5477_v54, %v5476_v46 }
 0x3c8   :  { %v5479_v0 = vpop.f32.mrf.mxu0 }
 0x3c9   :  { %v4814_v62 = vadd.f32 %v4813_v56, %v4799_v14  ;;  %v4703_v35 = vadd.f32 %v5478_v49, %v4606_v4 }
 0x3ca   :  { %v5480_v43 = vpop.f32.mrf.mxu0 }
 0x3cb   :  { %v4800_v59 = vmul.f32 %v5293_v24, %v4703_v35  ;;  %v5481_v26 = vadd.f32 %v5480_v43, %v5479_v0 }
 0x3cc   :  { %v5482_v45 = vpop.f32.mrf.mxu0 }
 0x3cd   :  { %v4815_v21 = vadd.f32 %v4814_v62, %v4800_v59  ;;  %v4708_v11 = vadd.f32 %v5481_v26, %v4611_v18 }
 0x3ce   :  { %v5483_v40 = vpop.f32.mrf.mxu0 }
 0x3cf   :  { %v4801_v19 = vmul.f32 %v5294_v15, %v4708_v11  ;;  %v5484_v30 = vadd.f32 %v5483_v40, %v5482_v45 }
 0x3d0   :  { %v5485_v47 = vpop.f32.mrf.mxu0 }
 0x3d1   :  { %v4816_v20 = vadd.f32 %v4815_v21, %v4801_v19  ;;  %v4711_v53 = vadd.f32 %v5484_v30, %v4614_v12 }
 0x3d2   :  { %v5486_v13 = vpop.f32.mrf.mxu0 }
 0x3d3   :  { %v4802_v57 = vmul.f32 %v5295_v63, %v4711_v53  ;;  %v5487_v27 = vadd.f32 %v5486_v13, %v5485_v47 }
 0x3d4   :  { %v5488_v16 = vpop.f32.mrf.mxu0 }
 0x3d5   :  { %v4817_v7 = vadd.f32 %v4816_v20, %v4802_v57  ;;  %v4716_v28 = vadd.f32 %v5487_v27, %v4619_v48 }
 0x3d6   :  { %v5489_v25 = vpop.f32.mrf.mxu0 }
 0x3d7   :  { %v4803_v44 = vmul.f32 %v5296_v31, %v4716_v28  ;;  %v5490_v8 = vadd.f32 %v5489_v25, %v5488_v16 }
 0x3d9   :  { %v4818_v55 = vadd.f32 %v4817_v7, %v4803_v44  ;;  %v4719_v38 = vadd.f32 %v5490_v8, %v4622_v3 }
 0x3db   :  { %v4804_v39 = vmul.f32 %v5297_v2, %v4719_v38 }
 0x3dd   :  { %v4819_v46 = vadd.f32 %v4818_v55, %v4804_v39 }
 0x3df   :  { %v4820_v56 = vrot.slane %v4819_v46, 4 }
 0x3e1   :  { %v4821_v1 = vadd.f32 %v4820_v56, %v4819_v46 }
 0x3e3   :  { %v4822_v60 = vrot.slane %v4821_v1, 2 }
 0x3e5   :  { %v4823_v54 = vadd.f32 %v4822_v60, %v4821_v1 }
 0x3e7   :  { %v4824_v4 = vrot.slane %v4823_v54, 1 }
 0x3e9   :  { %v4825_v52 = vadd.f32 %v4824_v4, %v4823_v54 }
 0x3eb   :  { %v5298_v6 = vmul.f32 -1.442695, %v4825_v52 }
 0x3ed   :  { %6114 = vpow2.f32 %v5298_v6 }
 0x3fa   :  { %v6115_v14 = vpop.eup %6114 }
 0x3fb   :  { %v4829_v50 = vadd.f32 1.0, %v6115_v14 }
 0x3fd   :  { %6116 = vrcp.f32 %v4829_v50 }
 0x40a   :  { %v6117_v49 = vpop.eup %6116 }
 0x40b   :  { %4832 = vst [vmem:[%s8830_s7] sm:$0x1] %v6117_v49 }

</bundles_post_ra>
